<compile_context>
chip_gen: v5e
topology: v5e:2x2
jax: 0.10.0
libtpu: 0.0.40
codegen_flags: <defaults>
</compile_context>

<pallas_src>
import jax
import jax.numpy as jnp
from jax import lax
from jax.experimental import pallas as pl
from jax.experimental.pallas import tpu as pltpu

EPS = 1e-5


# ----------------------------- kernel helpers -----------------------------
def _reflect_pad1(x):
    """ReflectionPad2d(1) on an (H, W, C) value held in VMEM/registers."""
    xr = jnp.concatenate([x[1:2], x, x[-2:-1]], axis=0)              # (H+2, W,   C)
    return jnp.concatenate([xr[:, 1:2], xr, xr[:, -2:-1]], axis=1)   # (H+2, W+2, C)


def _conv3x3_im2col(xp, w_ref, H, W, C):
    """3x3 VALID conv on a reflection-padded (H+2, W+2, C) tile as a single
    im2col matmul.  w_ref: (9*C, C), tap-major (dy, dx, cin) x cout.
    Returns (H*W, C) float32 accumulator."""
    cols = []
    for dy in range(3):
        for dx in range(3):
            cols.append(xp[dy:dy + H, dx:dx + W, :].reshape(H * W, C))
    patch = jnp.concatenate(cols, axis=-1)                           # (H*W, 9C)
    return jnp.dot(patch, w_ref[...], preferred_element_type=jnp.float32)


def _instance_norm(y):
    """InstanceNorm over axis 0 of an (N, C) float32 array (one-pass stats)."""
    inv_n = 1.0 / y.shape[0]
    s = jnp.sum(y, axis=0, keepdims=True)
    ss = jnp.sum(y * y, axis=0, keepdims=True)
    mean = s * inv_n
    var = jnp.maximum(ss * inv_n - mean * mean, 0.0)
    return (y - mean) * lax.rsqrt(var + EPS)


# -------------------------------- kernel ----------------------------------
def resnet_block_kernel(x_ref, w1_ref, b1_ref, w2_ref, b2_ref, o_ref):
    """o = x + IN(conv2(reflpad(ReLU(IN(conv1(reflpad(x)) + b1)))) + b2)
    for one batch element; the intermediate stays entirely in VMEM."""
    H, W, C = x_ref.shape[1], x_ref.shape[2], x_ref.shape[3]
    x = x_ref[0]                                                     # (H, W, C) native dtype

    # stage 1: ReLU(IN(conv1(reflpad(x)) + b1))
    h = _conv3x3_im2col(_reflect_pad1(x), w1_ref, H, W, C)           # (H*W, C) f32
    h = _instance_norm(h + b1_ref[...])
    h = jnp.maximum(h, 0.0)

    # stage 2: IN(conv2(reflpad(h)) + b2)   (h never leaves VMEM)
    h = h.reshape(H, W, C).astype(x.dtype)
    y = _conv3x3_im2col(_reflect_pad1(h), w2_ref, H, W, C)           # (H*W, C) f32
    y = _instance_norm(y + b2_ref[...])

    # residual add, cast back to output dtype
    o_ref[0] = (x.astype(jnp.float32) + y.reshape(H, W, C)).astype(o_ref.dtype)


# -------------------------------- wrapper ----------------------------------
def resnet_block_forward(x_nchw, w1_taps, b1, w2_taps, b2):
    """Full ResnetBlock forward.  x_nchw: (B, C, H, W).  Returns (B, C, H, W).
    w*_taps: (9, Cin, Cout) tap-major conv weights; b*: (C,) biases."""
    x = jnp.transpose(x_nchw, (0, 2, 3, 1))                          # -> NHWC
    B, H, W, C = x.shape

    w1m = w1_taps.reshape(9 * C, C)
    w2m = w2_taps.reshape(9 * C, C)
    b1_2d = b1.reshape(1, C).astype(jnp.float32)
    b2_2d = b2.reshape(1, C).astype(jnp.float32)

    x_spec = pl.BlockSpec((1, H, W, C), lambda b: (b, 0, 0, 0))
    w_spec = pl.BlockSpec((9 * C, C), lambda b: (0, 0))
    b_spec = pl.BlockSpec((1, C), lambda b: (0, 0))

    out = pl.pallas_call(
        resnet_block_kernel,
        out_shape=jax.ShapeDtypeStruct((B, H, W, C), x.dtype),
        grid_spec=pltpu.PrefetchScalarGridSpec(
            num_scalar_prefetch=0,
            grid=(B,),
            in_specs=[x_spec, w_spec, b_spec, w_spec, b_spec],
            out_specs=x_spec,
        ),
        input_output_aliases={0: 0},                                 # reuse x's HBM buffer
        compiler_params=pltpu.CompilerParams(
            dimension_semantics=("parallel",)),
    )(x, w1m, b1_2d, w2m, b2_2d)

    return jnp.transpose(out, (0, 3, 1, 2))                          # -> NCHW


# -------------------- pure-JAX reference (for verification) ----------------
def _ref_forward_nhwc(x, w1_hwio, b1, w2_hwio, b2):
    def pad(v):
        return jnp.pad(v, ((0, 0), (1, 1), (1, 1), (0, 0)), mode="reflect")

    def conv(v, w, b):
        y = lax.conv_general_dilated(
            pad(v), w, window_strides=(1, 1), padding="VALID",
            dimension_numbers=("NHWC", "HWIO", "NHWC"))
        return y + b.reshape(1, 1, 1, -1)

    def inorm(y):
        m = jnp.mean(y, axis=(1, 2), keepdims=True)
        v = jnp.mean((y - m) ** 2, axis=(1, 2), keepdims=True)
        return (y - m) * lax.rsqrt(v + EPS)

    h = jnp.maximum(inorm(conv(x, w1_hwio, b1)), 0.0)
    h = inorm(conv(h, w2_hwio, b2))
    return x + h


if __name__ == "__main__":
    B, C, H, W = 2, 4, 16, 16          # x: (batch, dim, H, W), dim=4
    key = jax.random.PRNGKey(0)
    kx, k1, kb1, k2, kb2 = jax.random.split(key, 5)

    x = jax.random.normal(kx, (B, C, H, W), dtype=jnp.float32)

    # PyTorch-style conv weights: (Cout, Cin, 3, 3)
    w1_oihw = jax.random.normal(k1, (C, C, 3, 3), dtype=jnp.float32) * 0.2
    b1 = jax.random.normal(kb1, (C,), dtype=jnp.float32) * 0.1
    w2_oihw = jax.random.normal(k2, (C, C, 3, 3), dtype=jnp.float32) * 0.2
    b2 = jax.random.normal(kb2, (C,), dtype=jnp.float32) * 0.1

    # tap-major (9, Cin, Cout) for the kernel (rows ordered (dy, dx, cin))
    w1_taps = jnp.transpose(w1_oihw, (2, 3, 1, 0)).reshape(9, C, C)
    w2_taps = jnp.transpose(w2_oihw, (2, 3, 1, 0)).reshape(9, C, C)
    # HWIO for the reference
    w1_hwio = jnp.transpose(w1_oihw, (2, 3, 1, 0))
    w2_hwio = jnp.transpose(w2_oihw, (2, 3, 1, 0))

    fwd = jax.jit(resnet_block_forward)
    out = jax.block_until_ready(fwd(x, w1_taps, b1, w2_taps, b2))

    ref = _ref_forward_nhwc(jnp.transpose(x, (0, 2, 3, 1)), w1_hwio, b1, w2_hwio, b2)
    ref = jnp.transpose(ref, (0, 3, 1, 2))

    assert out.shape == (B, C, H, W)
    max_err = float(jnp.max(jnp.abs(out - ref)))
    assert jnp.allclose(out, ref, atol=1e-4, rtol=1e-4), max_err
    print("KERNEL_OK")
</pallas_src>

<mosaic_0001>
module attributes {stable_mosaic.version = 11 : i64} {
  func.func @resnet_block_kernel(%arg0: i32, %arg1: memref<1x16x16x4xf32, #tpu.memory_space<vmem>>, %arg2: memref<36x4xf32, #tpu.memory_space<vmem>>, %arg3: memref<1x4xf32, #tpu.memory_space<vmem>>, %arg4: memref<36x4xf32, #tpu.memory_space<vmem>>, %arg5: memref<1x4xf32, #tpu.memory_space<vmem>>, %arg6: memref<1x16x16x4xf32, #tpu.memory_space<vmem>>) attributes {dimension_semantics = [#tpu.dimension_semantics<parallel>], iteration_bounds = array<i64: 2>, scalar_prefetch = 0 : i64, scratch_operands = 0 : i64, tpu.core_type = #tpu.core_type<tc>, window_params = [{transform_indices = @transform_0, window_bounds = array<i64: 1, 16, 16, 4>}, {pipeline_mode = #tpu.pipeline_mode<synchronous>, transform_indices = @transform_1, window_bounds = array<i64: 36, 4>}, {pipeline_mode = #tpu.pipeline_mode<synchronous>, transform_indices = @transform_2, window_bounds = array<i64: 1, 4>}, {pipeline_mode = #tpu.pipeline_mode<synchronous>, transform_indices = @transform_3, window_bounds = array<i64: 36, 4>}, {pipeline_mode = #tpu.pipeline_mode<synchronous>, transform_indices = @transform_4, window_bounds = array<i64: 1, 4>}, {transform_indices = @transform_5, window_bounds = array<i64: 1, 16, 16, 4>}]} {
    %c0 = arith.constant 0 : index
    %c0_0 = arith.constant 0 : index
    %c0_1 = arith.constant 0 : index
    %c0_2 = arith.constant 0 : index
    %0 = vector.load %arg1[%c0, %c0_0, %c0_1, %c0_2] : memref<1x16x16x4xf32, #tpu.memory_space<vmem>>, vector<1x16x16x4xf32>
    %1 = vector.shape_cast %0 : vector<1x16x16x4xf32> to vector<16x16x4xf32>
    %2 = vector.extract_strided_slice %1 {offsets = [1, 0, 0], sizes = [1, 16, 4], strides = [1, 1, 1]} : vector<16x16x4xf32> to vector<1x16x4xf32>
    %3 = vector.extract_strided_slice %1 {offsets = [14, 0, 0], sizes = [1, 16, 4], strides = [1, 1, 1]} : vector<16x16x4xf32> to vector<1x16x4xf32>
    %4 = tpu.concatenate %2, %1, %3 in 0 : vector<1x16x4xf32>, vector<16x16x4xf32>, vector<1x16x4xf32> -> vector<18x16x4xf32>
    %5 = vector.extract_strided_slice %4 {offsets = [0, 1, 0], sizes = [18, 1, 4], strides = [1, 1, 1]} : vector<18x16x4xf32> to vector<18x1x4xf32>
    %6 = vector.extract_strided_slice %4 {offsets = [0, 14, 0], sizes = [18, 1, 4], strides = [1, 1, 1]} : vector<18x16x4xf32> to vector<18x1x4xf32>
    %7 = tpu.concatenate %5, %4, %6 in 1 : vector<18x1x4xf32>, vector<18x16x4xf32>, vector<18x1x4xf32> -> vector<18x18x4xf32>
    %8 = vector.extract_strided_slice %7 {offsets = [0, 0, 0], sizes = [16, 16, 4], strides = [1, 1, 1]} : vector<18x18x4xf32> to vector<16x16x4xf32>
    %9 = vector.shape_cast %8 : vector<16x16x4xf32> to vector<256x4xf32>
    %10 = vector.extract_strided_slice %7 {offsets = [0, 1, 0], sizes = [16, 16, 4], strides = [1, 1, 1]} : vector<18x18x4xf32> to vector<16x16x4xf32>
    %11 = vector.shape_cast %10 : vector<16x16x4xf32> to vector<256x4xf32>
    %12 = vector.extract_strided_slice %7 {offsets = [0, 2, 0], sizes = [16, 16, 4], strides = [1, 1, 1]} : vector<18x18x4xf32> to vector<16x16x4xf32>
    %13 = vector.shape_cast %12 : vector<16x16x4xf32> to vector<256x4xf32>
    %14 = vector.extract_strided_slice %7 {offsets = [1, 0, 0], sizes = [16, 16, 4], strides = [1, 1, 1]} : vector<18x18x4xf32> to vector<16x16x4xf32>
    %15 = vector.shape_cast %14 : vector<16x16x4xf32> to vector<256x4xf32>
    %16 = vector.extract_strided_slice %7 {offsets = [1, 1, 0], sizes = [16, 16, 4], strides = [1, 1, 1]} : vector<18x18x4xf32> to vector<16x16x4xf32>
    %17 = vector.shape_cast %16 : vector<16x16x4xf32> to vector<256x4xf32>
    %18 = vector.extract_strided_slice %7 {offsets = [1, 2, 0], sizes = [16, 16, 4], strides = [1, 1, 1]} : vector<18x18x4xf32> to vector<16x16x4xf32>
    %19 = vector.shape_cast %18 : vector<16x16x4xf32> to vector<256x4xf32>
    %20 = vector.extract_strided_slice %7 {offsets = [2, 0, 0], sizes = [16, 16, 4], strides = [1, 1, 1]} : vector<18x18x4xf32> to vector<16x16x4xf32>
    %21 = vector.shape_cast %20 : vector<16x16x4xf32> to vector<256x4xf32>
    %22 = vector.extract_strided_slice %7 {offsets = [2, 1, 0], sizes = [16, 16, 4], strides = [1, 1, 1]} : vector<18x18x4xf32> to vector<16x16x4xf32>
    %23 = vector.shape_cast %22 : vector<16x16x4xf32> to vector<256x4xf32>
    %24 = vector.extract_strided_slice %7 {offsets = [2, 2, 0], sizes = [16, 16, 4], strides = [1, 1, 1]} : vector<18x18x4xf32> to vector<16x16x4xf32>
    %25 = vector.shape_cast %24 : vector<16x16x4xf32> to vector<256x4xf32>
    %26 = tpu.concatenate %9, %11, %13, %15, %17, %19, %21, %23, %25 in 1 : vector<256x4xf32>, vector<256x4xf32>, vector<256x4xf32>, vector<256x4xf32>, vector<256x4xf32>, vector<256x4xf32>, vector<256x4xf32>, vector<256x4xf32>, vector<256x4xf32> -> vector<256x36xf32>
    %c0_3 = arith.constant 0 : index
    %c0_4 = arith.constant 0 : index
    %27 = vector.load %arg2[%c0_3, %c0_4] : memref<36x4xf32, #tpu.memory_space<vmem>>, vector<36x4xf32>
    %cst = arith.constant dense<0.000000e+00> : vector<256x4xf32>
    %28 = tpu.matmul %26, %27, %cst {dimension_numbers = #tpu.dot_dimension_numbers<[1], [0], [0], [1], [0, 0, 1, 1], [], []>} : vector<256x36xf32>, vector<36x4xf32>, vector<256x4xf32> -> vector<256x4xf32>
    %c0_5 = arith.constant 0 : index
    %c0_6 = arith.constant 0 : index
    %29 = vector.load %arg3[%c0_5, %c0_6] : memref<1x4xf32, #tpu.memory_space<vmem>>, vector<1x4xf32>
    %30 = vector.broadcast %29 : vector<1x4xf32> to vector<256x4xf32>
    %31 = arith.addf %28, %30 : vector<256x4xf32>
    %cst_7 = arith.constant dense<0.000000e+00> : vector<4xf32>
    %32 = vector.multi_reduction <add>, %31, %cst_7 [0] : vector<256x4xf32> to vector<4xf32>
    %33 = vector.shape_cast %32 : vector<4xf32> to vector<1x4xf32>
    %34 = arith.mulf %31, %31 : vector<256x4xf32>
    %cst_8 = arith.constant dense<0.000000e+00> : vector<4xf32>
    %35 = vector.multi_reduction <add>, %34, %cst_8 [0] : vector<256x4xf32> to vector<4xf32>
    %36 = vector.shape_cast %35 : vector<4xf32> to vector<1x4xf32>
    %cst_9 = arith.constant 3.906250e-03 : f32
    %37 = vector.broadcast %cst_9 : f32 to vector<1x4xf32>
    %38 = arith.mulf %33, %37 : vector<1x4xf32>
    %cst_10 = arith.constant 3.906250e-03 : f32
    %39 = vector.broadcast %cst_10 : f32 to vector<1x4xf32>
    %40 = arith.mulf %36, %39 : vector<1x4xf32>
    %41 = arith.mulf %38, %38 : vector<1x4xf32>
    %42 = arith.subf %40, %41 : vector<1x4xf32>
    %cst_11 = arith.constant 0.000000e+00 : f32
    %43 = vector.broadcast %cst_11 : f32 to vector<1x4xf32>
    %44 = arith.maximumf %42, %43 : vector<1x4xf32>
    %45 = vector.broadcast %38 : vector<1x4xf32> to vector<256x4xf32>
    %46 = arith.subf %31, %45 : vector<256x4xf32>
    %cst_12 = arith.constant 9.99999974E-6 : f32
    %47 = vector.broadcast %cst_12 : f32 to vector<1x4xf32>
    %48 = arith.addf %44, %47 : vector<1x4xf32>
    %49 = math.rsqrt %48 : vector<1x4xf32>
    %50 = vector.broadcast %49 : vector<1x4xf32> to vector<256x4xf32>
    %51 = arith.mulf %46, %50 : vector<256x4xf32>
    %cst_13 = arith.constant 0.000000e+00 : f32
    %52 = vector.broadcast %cst_13 : f32 to vector<256x4xf32>
    %53 = arith.maximumf %51, %52 : vector<256x4xf32>
    %54 = vector.shape_cast %53 : vector<256x4xf32> to vector<16x16x4xf32>
    %55 = vector.extract_strided_slice %54 {offsets = [1, 0, 0], sizes = [1, 16, 4], strides = [1, 1, 1]} : vector<16x16x4xf32> to vector<1x16x4xf32>
    %56 = vector.extract_strided_slice %54 {offsets = [14, 0, 0], sizes = [1, 16, 4], strides = [1, 1, 1]} : vector<16x16x4xf32> to vector<1x16x4xf32>
    %57 = tpu.concatenate %55, %54, %56 in 0 : vector<1x16x4xf32>, vector<16x16x4xf32>, vector<1x16x4xf32> -> vector<18x16x4xf32>
    %58 = vector.extract_strided_slice %57 {offsets = [0, 1, 0], sizes = [18, 1, 4], strides = [1, 1, 1]} : vector<18x16x4xf32> to vector<18x1x4xf32>
    %59 = vector.extract_strided_slice %57 {offsets = [0, 14, 0], sizes = [18, 1, 4], strides = [1, 1, 1]} : vector<18x16x4xf32> to vector<18x1x4xf32>
    %60 = tpu.concatenate %58, %57, %59 in 1 : vector<18x1x4xf32>, vector<18x16x4xf32>, vector<18x1x4xf32> -> vector<18x18x4xf32>
    %61 = vector.extract_strided_slice %60 {offsets = [0, 0, 0], sizes = [16, 16, 4], strides = [1, 1, 1]} : vector<18x18x4xf32> to vector<16x16x4xf32>
    %62 = vector.shape_cast %61 : vector<16x16x4xf32> to vector<256x4xf32>
    %63 = vector.extract_strided_slice %60 {offsets = [0, 1, 0], sizes = [16, 16, 4], strides = [1, 1, 1]} : vector<18x18x4xf32> to vector<16x16x4xf32>
    %64 = vector.shape_cast %63 : vector<16x16x4xf32> to vector<256x4xf32>
    %65 = vector.extract_strided_slice %60 {offsets = [0, 2, 0], sizes = [16, 16, 4], strides = [1, 1, 1]} : vector<18x18x4xf32> to vector<16x16x4xf32>
    %66 = vector.shape_cast %65 : vector<16x16x4xf32> to vector<256x4xf32>
    %67 = vector.extract_strided_slice %60 {offsets = [1, 0, 0], sizes = [16, 16, 4], strides = [1, 1, 1]} : vector<18x18x4xf32> to vector<16x16x4xf32>
    %68 = vector.shape_cast %67 : vector<16x16x4xf32> to vector<256x4xf32>
    %69 = vector.extract_strided_slice %60 {offsets = [1, 1, 0], sizes = [16, 16, 4], strides = [1, 1, 1]} : vector<18x18x4xf32> to vector<16x16x4xf32>
    %70 = vector.shape_cast %69 : vector<16x16x4xf32> to vector<256x4xf32>
    %71 = vector.extract_strided_slice %60 {offsets = [1, 2, 0], sizes = [16, 16, 4], strides = [1, 1, 1]} : vector<18x18x4xf32> to vector<16x16x4xf32>
    %72 = vector.shape_cast %71 : vector<16x16x4xf32> to vector<256x4xf32>
    %73 = vector.extract_strided_slice %60 {offsets = [2, 0, 0], sizes = [16, 16, 4], strides = [1, 1, 1]} : vector<18x18x4xf32> to vector<16x16x4xf32>
    %74 = vector.shape_cast %73 : vector<16x16x4xf32> to vector<256x4xf32>
    %75 = vector.extract_strided_slice %60 {offsets = [2, 1, 0], sizes = [16, 16, 4], strides = [1, 1, 1]} : vector<18x18x4xf32> to vector<16x16x4xf32>
    %76 = vector.shape_cast %75 : vector<16x16x4xf32> to vector<256x4xf32>
    %77 = vector.extract_strided_slice %60 {offsets = [2, 2, 0], sizes = [16, 16, 4], strides = [1, 1, 1]} : vector<18x18x4xf32> to vector<16x16x4xf32>
    %78 = vector.shape_cast %77 : vector<16x16x4xf32> to vector<256x4xf32>
    %79 = tpu.concatenate %62, %64, %66, %68, %70, %72, %74, %76, %78 in 1 : vector<256x4xf32>, vector<256x4xf32>, vector<256x4xf32>, vector<256x4xf32>, vector<256x4xf32>, vector<256x4xf32>, vector<256x4xf32>, vector<256x4xf32>, vector<256x4xf32> -> vector<256x36xf32>
    %c0_14 = arith.constant 0 : index
    %c0_15 = arith.constant 0 : index
    %80 = vector.load %arg4[%c0_14, %c0_15] : memref<36x4xf32, #tpu.memory_space<vmem>>, vector<36x4xf32>
    %cst_16 = arith.constant dense<0.000000e+00> : vector<256x4xf32>
    %81 = tpu.matmul %79, %80, %cst_16 {dimension_numbers = #tpu.dot_dimension_numbers<[1], [0], [0], [1], [0, 0, 1, 1], [], []>} : vector<256x36xf32>, vector<36x4xf32>, vector<256x4xf32> -> vector<256x4xf32>
    %c0_17 = arith.constant 0 : index
    %c0_18 = arith.constant 0 : index
    %82 = vector.load %arg5[%c0_17, %c0_18] : memref<1x4xf32, #tpu.memory_space<vmem>>, vector<1x4xf32>
    %83 = vector.broadcast %82 : vector<1x4xf32> to vector<256x4xf32>
    %84 = arith.addf %81, %83 : vector<256x4xf32>
    %cst_19 = arith.constant dense<0.000000e+00> : vector<4xf32>
    %85 = vector.multi_reduction <add>, %84, %cst_19 [0] : vector<256x4xf32> to vector<4xf32>
    %86 = vector.shape_cast %85 : vector<4xf32> to vector<1x4xf32>
    %87 = arith.mulf %84, %84 : vector<256x4xf32>
    %cst_20 = arith.constant dense<0.000000e+00> : vector<4xf32>
    %88 = vector.multi_reduction <add>, %87, %cst_20 [0] : vector<256x4xf32> to vector<4xf32>
    %89 = vector.shape_cast %88 : vector<4xf32> to vector<1x4xf32>
    %cst_21 = arith.constant 3.906250e-03 : f32
    %90 = vector.broadcast %cst_21 : f32 to vector<1x4xf32>
    %91 = arith.mulf %86, %90 : vector<1x4xf32>
    %cst_22 = arith.constant 3.906250e-03 : f32
    %92 = vector.broadcast %cst_22 : f32 to vector<1x4xf32>
    %93 = arith.mulf %89, %92 : vector<1x4xf32>
    %94 = arith.mulf %91, %91 : vector<1x4xf32>
    %95 = arith.subf %93, %94 : vector<1x4xf32>
    %cst_23 = arith.constant 0.000000e+00 : f32
    %96 = vector.broadcast %cst_23 : f32 to vector<1x4xf32>
    %97 = arith.maximumf %95, %96 : vector<1x4xf32>
    %98 = vector.broadcast %91 : vector<1x4xf32> to vector<256x4xf32>
    %99 = arith.subf %84, %98 : vector<256x4xf32>
    %cst_24 = arith.constant 9.99999974E-6 : f32
    %100 = vector.broadcast %cst_24 : f32 to vector<1x4xf32>
    %101 = arith.addf %97, %100 : vector<1x4xf32>
    %102 = math.rsqrt %101 : vector<1x4xf32>
    %103 = vector.broadcast %102 : vector<1x4xf32> to vector<256x4xf32>
    %104 = arith.mulf %99, %103 : vector<256x4xf32>
    %105 = vector.shape_cast %104 : vector<256x4xf32> to vector<16x16x4xf32>
    %106 = arith.addf %1, %105 : vector<16x16x4xf32>
    %c0_25 = arith.constant 0 : index
    %c0_26 = arith.constant 0 : index
    %c0_27 = arith.constant 0 : index
    %c0_28 = arith.constant 0 : index
    %107 = vector.load %arg6[%c0_25, %c0_26, %c0_27, %c0_28] : memref<1x16x16x4xf32, #tpu.memory_space<vmem>>, vector<1x16x16x4xf32>
    %108 = vector.shape_cast %107 : vector<1x16x16x4xf32> to vector<16x16x4xf32>
    %109 = vector.shape_cast %106 : vector<16x16x4xf32> to vector<1x16x16x4xf32>
    tpu.vector_store %arg6[%c0_25, %c0_26, %c0_27, %c0_28], %109 {strides = array<i32>} : memref<1x16x16x4xf32, #tpu.memory_space<vmem>>, vector<1x16x16x4xf32>,
    return
  }
  func.func @transform_0(%arg0: i32) -> (i32, i32, i32, i32) {
    %c0_i32 = arith.constant 0 : i32
    %c0_i32_0 = arith.constant 0 : i32
    %c0_i32_1 = arith.constant 0 : i32
    %c0_i32_2 = arith.constant 0 : i32
    return %arg0, %c0_i32, %c0_i32_0, %c0_i32_1 : i32, i32, i32, i32
  }
  func.func @transform_1(%arg0: i32) -> (i32, i32) {
    %c0_i32 = arith.constant 0 : i32
    %c0_i32_0 = arith.constant 0 : i32
    %c0_i32_1 = arith.constant 0 : i32
    return %c0_i32, %c0_i32_0 : i32, i32
  }
  func.func @transform_2(%arg0: i32) -> (i32, i32) {
    %c0_i32 = arith.constant 0 : i32
    %c0_i32_0 = arith.constant 0 : i32
    %c0_i32_1 = arith.constant 0 : i32
    return %c0_i32, %c0_i32_0 : i32, i32
  }
  func.func @transform_3(%arg0: i32) -> (i32, i32) {
    %c0_i32 = arith.constant 0 : i32
    %c0_i32_0 = arith.constant 0 : i32
    %c0_i32_1 = arith.constant 0 : i32
    return %c0_i32, %c0_i32_0 : i32, i32
  }
  func.func @transform_4(%arg0: i32) -> (i32, i32) {
    %c0_i32 = arith.constant 0 : i32
    %c0_i32_0 = arith.constant 0 : i32
    %c0_i32_1 = arith.constant 0 : i32
    return %c0_i32, %c0_i32_0 : i32, i32
  }
  func.func @transform_5(%arg0: i32) -> (i32, i32, i32, i32) {
    %c0_i32 = arith.constant 0 : i32
    %c0_i32_0 = arith.constant 0 : i32
    %c0_i32_1 = arith.constant 0 : i32
    %c0_i32_2 = arith.constant 0 : i32
    return %arg0, %c0_i32, %c0_i32_0, %c0_i32_1 : i32, i32, i32, i32
  }
}

</mosaic_0001>

<bundles_post_ra>
// kernel: resnet_block_forward.1
= control target key start
LH: loop header
LB: loop body
LE: loop exit
PB: predicated region body
PF: predicated region fallthrough
CT: control target
= control target key end

     0   :  { %s4335_s18 = smov 0   ;;  %s9161_s0 = inlined_call_operand.vmem [shape: f32[2,16,16,4], index: 0, kind: input, shape index: {}, may-alias: {0,5}]   ;;  %s9162_s1 = inlined_call_operand.vmem [shape: f32[36,4], index: 1, kind: input, shape index: {}]   ;;  %s9163_s2 = inlined_call_operand.vmem [shape: f32[1,4], index: 2, kind: input, shape index: {}]   ;;  %s9164_s3 = inlined_call_operand.vmem [shape: f32[36,4], index: 3, kind: input, shape index: {}]   ;;  %s9165_s4 = inlined_call_operand.vmem [shape: f32[1,4], index: 4, kind: input, shape index: {}]   ;;  %s9166_s5 = inlined_call_operand.vmem [shape: f32[2,16,16,4], index: 5, kind: output, shape index: {}, may-alias: {0,5}]  }
   0x1 LB: > { %s4173_s19 = sadd.s32 4294967295, %s4295_s18   ;;  %p4177_p0 = scmp.ge.s32.totalorder %s4295_s18, 1  ;;  %s4295_s18 = sphi %s4335_s18, %s15_s18  }
   0x2   : > { %p187_p1 = scmp.lt.s32.totalorder %s4295_s18, 3 }
   0x4   : > { %p188_p2 = pnand %p4177_p0, %p187_p1 }
   0x6   : > { %191 = sbr.rel (%p188_p2) target bundleno = 2071 (0x817), region = 40 }
   0xb   : > { %p215_p3 = scmp.lt.s32.totalorder %s4173_s19, 1  ;;  %vm321_vm0 = vcmask 1040384   ;;  %vm511_vm1 = vcmask 1046528   ;;  %s4297_s24 = smov 4   ;;  %vm587_vm2 = vcmask 1045504   ;;  %vm1779_vm3 = vcmask 1043456  }
   0xc   : > { %s4298_s25 = smov 8   ;;  %s4299_s26 = smov 12   ;;  %vm1413_vm4 = vcmask 31744   ;;  %vm1444_vm5 = vcmask 64512   ;;  %vm1508_vm6 = vcmask 130048   ;;  %vm1475_vm7 = vcmask 97280  }
   0xd   : > { %s10369_s19 = smov (!%p215_p3, %s4173_s19), 1  ;;  %s4300_s27 = smov 16   ;;  %vm1541_vm8 = vcmask 162816   ;;  %vm1574_vm9 = vcmask 195584   ;;  %vm1607_vm10 = vcmask 228352   ;;  %vm1682_vm11 = vcmask 293888  }
   0xe   : > { %s4250_s20 = sshll.u32 %s10369_s19, 8  ;;  %s4301_s28 = smov 20   ;;  %vm1640_vm12 = vcmask 261120  }
   0xf   : > { %s4351_s23 = scalar_lea.vmem %s9161_s0, %s4250_s20  ;;  %s4302_s29 = smov 24  }
  0x10   : > { %v229_v0 = vld [vmem:[%s4351_s23 + $0x20] sm:$0xff]  ;;  %v4355_v1 = vld [vmem:[%s4351_s23 + $0x28] sm:$0xff]  ;;  %v227_v2 = vld [vmem:[%s4351_s23 + $0x10] sm:$0xff]  ;;  %s4303_s30 = smov 28   ;;  %s4304_s6 = smov 32  }
  0x11   : > { %9443 = vst [vmem:[#allocation2_spill] sm:$0xff] %v4355_v1  ;;  %v275_v3 = vrot.slane %v229_v0, 1  ;;  %v328_v4 = vrot.slane %v229_v0, 7  ;;  %v329_v5 = vrot.slane %v4355_v1, 7  ;;  %v228_v6 = vld [vmem:[%s4351_s23 + $0x18] sm:$0xff]  ;;  %v273_v7 = vrot.slane %v227_v2, 1 }
  0x12   : > { %v225_v8 = vld [vmem:[%s4351_s23] sm:$0xff]  ;;  %v322_v9 = vrot.slane %v227_v2, 7  ;;  %v323_v10 = vrot.slane %v228_v6, 7  ;;  %v226_v11 = vld [vmem:[%s4351_s23 + $0x8] sm:$0xff]  ;;  %v419_v17 = vrot.slane %v4355_v1, 5  ;;  %v417_v33 = vrot.slane %v228_v6, 5 }
  0x13   : > { %v274_v12 = vrot.slane %v225_v8, 1  ;;  %v325_v13 = vrot.slane %v225_v8, 7  ;;  %v4363_v14 = vsel %vm321_vm0, %v328_v4, %v329_v5  ;;  %v4366_v15 = vsel %vm321_vm0, %v275_v3, %v328_v4  ;;  %v4386_v26 = vld [vmem:[%s4351_s23 + $0x40] sm:$0xff]  ;;  %v4397_v31 = vld [vmem:[%s4351_s23 + $0x48] sm:$0xff]  ;;  %v4405_v35 = vld [vmem:[%s4351_s23 + $0x30] sm:$0xff] }
  0x14   : > { %v326_v16 = vrot.slane %v226_v11, 7  ;;  %v522_v18 = vrot.slane %v4366_v15, 1  ;;  %v523_v19 = vrot.slane %v4363_v14, 1  ;;  %v4372_v20 = vsel %vm321_vm0, %v322_v9, %v323_v10  ;;  %9446 = vst [vmem:[#allocation5_spill] sm:$0xff] %v4386_v26  ;;  %v4415_v39 = vld [vmem:[%s4351_s23 + $0x38] sm:$0xff]  ;;  %v4446_v54 = vld [vmem:[%s4351_s23 + $0x50] sm:$0xff] }
  0x15   : > { %v4375_v21 = vsel %vm321_vm0, %v273_v7, %v322_v9  ;;  %v513_v23 = vrot.slane %v4372_v20, 1  ;;  %v4383_v25 = vsel %vm321_vm0, %v274_v12, %v325_v13  ;;  %v4394_v30 = vsel %vm321_vm0, %v329_v5, %v419_v17  ;;  %9448 = vst [vmem:[#allocation7_spill] sm:$0xff] %v4397_v31  ;;  %v4449_v55 = vld [vmem:[%s4351_s23 + $0x58] sm:$0xff]  ;;  %v4495_v12 = vld [vmem:[%s4351_s23 + $0x70] sm:$0xff]  ;;  %v4504_v17 = vld [vmem:[%s4351_s23 + $0x60] sm:$0xff] }
  0x16   : > { %v512_v22 = vrot.slane %v4375_v21, 1  ;;  %v4380_v24 = vsel %vm321_vm0, %v325_v13, %v326_v16  ;;  %9445 = vst [vmem:[#allocation4_spill] sm:$0xff] %v4383_v25  ;;  %v4389_v27 = vsel %vm511_vm1, %v522_v18, %v523_v19  ;;  %v517_v28 = vrot.slane %v4383_v25, 1  ;;  %v4507_v18 = vld [vmem:[%s4351_s23 + $0x68] sm:$0xff] }
  0x17   : > { %9444 = vst [vmem:[#allocation3_spill] sm:$0xff] %v4380_v24  ;;  %v518_v29 = vrot.slane %v4380_v24, 1  ;;  %683 = vrot.lane.b32.xlu2 %v4389_v27, %s4297_s24  ;;  %v418_v34 = vrot.slane %v226_v11, 5  ;;  %v525_v37 = vrot.slane %v4394_v30, 1  ;;  %v277_v38 = vrot.slane %v4386_v26, 1 }
  0x18   : > { %9447 = vst [vmem:[#allocation6_spill] sm:$0xff] %v4389_v27  ;;  %v4402_v32 = vsel %vm511_vm1, %v512_v22, %v513_v23  ;;  %v4420_v40 = vsel %vm321_vm0, %v323_v10, %v417_v33  ;;  %v334_v42 = vrot.slane %v4386_v26, 7  ;;  %v335_v43 = vrot.slane %v4397_v31, 7 }
  0x19   : > { %9449 = vst [vmem:[#allocation8_spill] sm:$0xff] %v4405_v35  ;;  %675 = vrot.lane.b32.xlu0 %v4402_v32, %s4297_s24  ;;  %v4410_v36 = vsel %vm511_vm1, %v517_v28, %v518_v29  ;;  %v4423_v41 = vsel %vm321_vm0, %v326_v16, %v418_v34  ;;  %v515_v44 = vrot.slane %v4420_v40, 1  ;;  %v276_v46 = vrot.slane %v4405_v35, 1  ;;  %v4501_v16 = vld [vmem:[%s4351_s23 + $0x78] sm:$0xff] }
  0x1a   : > { %9450 = vst [vmem:[#allocation9_spill] sm:$0xff] %v4415_v39  ;;  %679 = vrot.lane.b32.xlu1 %v4410_v36, %s4297_s24  ;;  %v520_v45 = vrot.slane %v4423_v41, 1  ;;  %v331_v47 = vrot.slane %v4405_v35, 7  ;;  %v332_v48 = vrot.slane %v4415_v39, 7  ;;  %v4433_v49 = vsel %vm511_vm1, %v523_v19, %v525_v37 }
  0x1b   : > { %9451 = vst [vmem:[#allocation10_spill] sm:$0xff] %v4433_v49  ;;  %v420_v50 = vrot.slane %v4415_v39, 5  ;;  %v4437_v51 = vsel %vm511_vm1, %v513_v23, %v515_v44  ;;  %v4440_v52 = vsel %vm321_vm0, %v334_v42, %v335_v43  ;;  %v4443_v53 = vsel %vm321_vm0, %v277_v38, %v334_v42  ;;  %v4641_v39 = vld [vmem:[%s4351_s23 + $0xb0] sm:$0xff] }
  0x1c   : > { %9452 = vst [vmem:[#allocation11_spill] sm:$0xff] %v4440_v52  ;;  %v4452_v56 = vsel %vm511_vm1, %v518_v29, %v520_v45  ;;  %v4455_v57 = vsel %vm321_vm0, %v331_v47, %v332_v48  ;;  %v4458_v58 = vsel %vm321_vm0, %v276_v46, %v331_v47  ;;  %v532_v60 = vrot.slane %v4443_v53, 1 }
  0x1d   : > { %9453 = vst [vmem:[#allocation12_spill] sm:$0xff] %v4443_v53  ;;  %v4463_v59 = vsel %vm321_vm0, %v332_v48, %v420_v50  ;;  %v533_v61 = vrot.slane %v4440_v52, 1  ;;  %v337_v62 = vrot.slane %v4446_v54, 7  ;;  %v338_v63 = vrot.slane %v4449_v55, 7 }
  0x1e   : > { %9454 = vst [vmem:[#allocation13_spill] sm:$0xff] %v4446_v54  ;;  %v527_v0 = vrot.slane %v4458_v58, 1  ;;  %v528_v2 = vrot.slane %v4455_v57, 1  ;;  %v422_v3 = vrot.slane %v4449_v55, 5  ;;  %v421_v4 = vrot.slane %v4397_v31, 5 }
  0x1f   : > { %9455 = vst [vmem:[#allocation14_spill] sm:$0xff] %v4449_v55  ;;  %685 = vrot.lane.b32.xlu2 %v4433_v49, %s4297_s24  ;;  %v530_v5 = vrot.slane %v4463_v59, 1  ;;  %v278_v6 = vrot.slane %v4446_v54, 1  ;;  %v4480_v7 = vsel %vm511_vm1, %v532_v60, %v533_v61  ;;  %v4483_v8 = vsel %vm321_vm0, %v337_v62, %v338_v63 }
  0x20   : > { %9456 = vst [vmem:[#allocation15_spill] sm:$0xff] %v4455_v57  ;;  %v4486_v9 = vsel %vm511_vm1, %v527_v0, %v528_v2  ;;  %v4489_v10 = vsel %vm321_vm0, %v338_v63, %v422_v3  ;;  %v4492_v11 = vsel %vm321_vm0, %v335_v43, %v421_v4  ;;  %v538_v19 = vrot.slane %v4483_v8, 1  ;;  %v4551_v63 = vld [vmem:[%s4351_s23 + $0x80] sm:$0xff]  ;;  %v4554_v0 = vld [vmem:[%s4351_s23 + $0x88] sm:$0xff] }
  0x21   : > { %677 = vrot.lane.b32.xlu0 %v4437_v51, %s4297_s24  ;;  %9457 = vst [vmem:[#allocation16_spill] sm:$0xff] %v4480_v7  ;;  %v4498_v13 = vsel %vm511_vm1, %v528_v2, %v530_v5  ;;  %v4513_v22 = vsel %vm321_vm0, %v278_v6, %v337_v62  ;;  %v540_v23 = vrot.slane %v4489_v10, 1  ;;  %v535_v28 = vrot.slane %v4492_v11, 1 }
  0x22   : > { %681 = vrot.lane.b32.xlu1 %v4452_v56, %s4297_s24  ;;  %9458 = vst [vmem:[#allocation17_spill] sm:$0xff] %v4483_v8  ;;  %v280_v29 = vrot.slane %v4495_v12, 1  ;;  %v343_v33 = vrot.slane %v4495_v12, 7  ;;  %v344_v34 = vrot.slane %v4501_v16, 7  ;;  %v279_v37 = vrot.slane %v4504_v17, 1 }
  0x23   : > { %9459 = vst [vmem:[#allocation18_spill] sm:$0xff] %v4486_v9  ;;  %v340_v38 = vrot.slane %v4504_v17, 7  ;;  %v341_v42 = vrot.slane %v4507_v18, 7  ;;  %v537_v43 = vrot.slane %v4513_v22, 1  ;;  %v423_v44 = vrot.slane %v4507_v18, 5 }
  0x24   : > { %9460 = vst [vmem:[#allocation19_spill] sm:$0xff] %v4495_v12  ;;  %v4530_v45 = vsel %vm511_vm1, %v538_v19, %v540_v23  ;;  %v4533_v46 = vsel %vm511_vm1, %v533_v61, %v535_v28  ;;  %v4536_v47 = vsel %vm321_vm0, %v343_v33, %v344_v34  ;;  %v4539_v48 = vsel %vm321_vm0, %v280_v29, %v343_v33 }
  0x25   : > { %9461 = vst [vmem:[#allocation20_spill] sm:$0xff] %v4498_v13  ;;  %v4542_v50 = vsel %vm321_vm0, %v340_v38, %v341_v42  ;;  %v4545_v60 = vsel %vm321_vm0, %v279_v37, %v340_v38  ;;  %v4548_v62 = vsel %vm511_vm1, %v537_v43, %v538_v19  ;;  %v4559_v61 = vsel %vm321_vm0, %v341_v42, %v423_v44 }
  0x26   : > { %9462 = vst [vmem:[#allocation21_spill] sm:$0xff] %v4501_v16  ;;  %v547_v2 = vrot.slane %v4539_v48, 1  ;;  %v548_v3 = vrot.slane %v4536_v47, 1  ;;  %v542_v4 = vrot.slane %v4545_v60, 1  ;;  %v543_v5 = vrot.slane %v4542_v50, 1 }
  0x27   : > { %9463 = vst [vmem:[#allocation22_spill] sm:$0xff] %v4504_v17  ;;  %691 = vrot.lane.b32.xlu2 %v4480_v7, %s4297_s24  ;;  %v346_v6 = vrot.slane %v4551_v63, 7  ;;  %v347_v19 = vrot.slane %v4554_v0, 7  ;;  %v425_v23 = vrot.slane %v4554_v0, 5  ;;  %v424_v28 = vrot.slane %v4501_v16, 5 }
  0x28   : > { %9464 = vst [vmem:[#allocation23_spill] sm:$0xff] %v4507_v18  ;;  %v545_v29 = vrot.slane %v4559_v61, 1  ;;  %v281_v33 = vrot.slane %v4551_v63, 1  ;;  %v4576_v37 = vsel %vm511_vm1, %v547_v2, %v548_v3  ;;  %v4579_v38 = vsel %vm511_vm1, %v542_v4, %v543_v5  ;;  %v4600_v2 = vld [vmem:[%s4351_s23 + $0x90] sm:$0xff] }
  0x29   : > { %9465 = vst [vmem:[#allocation24_spill] sm:$0xff] %v4513_v22  ;;  %687 = vrot.lane.b32.xlu0 %v4486_v9, %s4297_s24  ;;  %v4582_v42 = vsel %vm321_vm0, %v346_v6, %v347_v19  ;;  %v4585_v43 = vsel %vm321_vm0, %v347_v19, %v425_v23  ;;  %v4588_v44 = vsel %vm321_vm0, %v344_v34, %v424_v28  ;;  %v4608_v19 = vld [vmem:[%s4351_s23 + $0x98] sm:$0xff]  ;;  %v349_v12 = vrot.slane %v4600_v2, 7 }
  0x2a   : > { %689 = vrot.lane.b32.xlu1 %v4498_v13, %s4297_s24  ;;  %9466 = vst [vmem:[#allocation25_spill] sm:$0xff] %v4530_v45  ;;  %v4594_v16 = vsel %vm511_vm1, %v543_v5, %v545_v29  ;;  %v4605_v4 = vsel %vm321_vm0, %v281_v33, %v346_v6  ;;  %v553_v34 = vrot.slane %v4582_v42, 1  ;;  %v555_v5 = vrot.slane %v4585_v43, 1 }
  0x2b   : > { %9467 = vst [vmem:[#allocation26_spill] sm:$0xff] %v4533_v46  ;;  %v550_v23 = vrot.slane %v4588_v44, 1  ;;  %v282_v33 = vrot.slane %v4600_v2, 1  ;;  %v552_v18 = vrot.slane %v4605_v4, 1  ;;  %v350_v17 = vrot.slane %v4608_v19, 7 }
  0x2c   : > { %9468 = vst [vmem:[#allocation27_spill] sm:$0xff] %v4542_v50  ;;  %v426_v55 = vrot.slane %v4608_v19, 5  ;;  %v4626_v54 = vsel %vm511_vm1, %v553_v34, %v555_v5  ;;  %v284_v1 = vrot.slane %v4641_v39, 1 }
  0x2d   : > { %9469 = vst [vmem:[#allocation28_spill] sm:$0xff] %v4545_v60  ;;  %v4629_v31 = vsel %vm511_vm1, %v548_v3, %v550_v23  ;;  %v4644_v35 = vsel %vm511_vm1, %v552_v18, %v553_v34  ;;  %v4647_v5 = vsel %vm321_vm0, %v349_v12, %v350_v17 }
  0x2e   : > { %9470 = vst [vmem:[#allocation29_spill] sm:$0xff] %v4548_v62  ;;  %v4655_v3 = vsel %vm321_vm0, %v350_v17, %v426_v55  ;;  %v558_v55 = vrot.slane %v4647_v5, 1 }
  0x2f   : > { %9471 = vst [vmem:[#allocation30_spill] sm:$0xff] %v4551_v63  ;;  %697 = vrot.lane.b32.xlu2 %v4530_v45, %s4297_s24  ;;  %v4597_v63 = vld [vmem:[%s4351_s23 + $0xa8] sm:$0xff] }
  0x30   : > { %9472 = vst [vmem:[#allocation31_spill] sm:$0xff] %v4554_v0  ;;  %v4591_v0 = vld [vmem:[%s4351_s23 + $0xa0] sm:$0xff]  ;;  %v353_v29 = vrot.slane %v4597_v63, 7 }
  0x31   : > { %693 = vrot.lane.b32.xlu0 %v4533_v46, %s4297_s24  ;;  %9473 = vst [vmem:[#allocation32_spill] sm:$0xff] %v4576_v37  ;;  %v283_v28 = vrot.slane %v4591_v0, 1  ;;  %v352_v6 = vrot.slane %v4591_v0, 7  ;;  %v4746_v46 = vld [vmem:[%s4351_s23 + $0xe8] sm:$0xff] }
  0x32   : > { %695 = vrot.lane.b32.xlu1 %v4548_v62, %s4297_s24  ;;  %9474 = vst [vmem:[#allocation33_spill] sm:$0xff] %v4579_v38 }
  0x33   : > { %9475 = vst [vmem:[#allocation34_spill] sm:$0xff] %v4591_v0  ;;  %v4632_v0 = vsel %vm321_vm0, %v352_v6, %v353_v29  ;;  %v4635_v26 = vsel %vm321_vm0, %v283_v28, %v352_v6  ;;  %v427_v6 = vrot.slane %v4597_v63, 5 }
  0x34   : > { %9476 = vst [vmem:[#allocation35_spill] sm:$0xff] %v4594_v16  ;;  %v562_v23 = vrot.slane %v4635_v26, 1  ;;  %v563_v18 = vrot.slane %v4632_v0, 1 }
  0x35   : > { %9477 = vst [vmem:[#allocation36_spill] sm:$0xff] %v4597_v63  ;;  %v4687_v63 = vld [vmem:[%s4351_s23 + $0xd0] sm:$0xff] }
  0x36   : > { %9478 = vst [vmem:[#allocation37_spill] sm:$0xff] %v4600_v2  ;;  %v4638_v2 = vsel %vm321_vm0, %v282_v33, %v349_v12  ;;  %v355_v12 = vrot.slane %v4641_v39, 7  ;;  %v560_v33 = vrot.slane %v4655_v3, 1 }
  0x37   : > { %703 = vrot.lane.b32.xlu2 %v4576_v37, %s4297_s24  ;;  %9479 = vst [vmem:[#allocation38_spill] sm:$0xff] %v4608_v19  ;;  %v4650_v19 = vld [vmem:[%s4351_s23 + $0xb8] sm:$0xff]  ;;  %v557_v34 = vrot.slane %v4638_v2, 1 }
  0x38   : > { %9480 = vst [vmem:[#allocation39_spill] sm:$0xff] %v4626_v54  ;;  %v356_v17 = vrot.slane %v4650_v19, 7  ;;  %v428_v28 = vrot.slane %v4650_v19, 5 }
  0x39   : > { %699 = vrot.lane.b32.xlu0 %v4579_v38, %s4297_s24  ;;  %9481 = vst [vmem:[#allocation40_spill] sm:$0xff] %v4629_v31  ;;  %v4675_v37 = vsel %vm511_vm1, %v557_v34, %v558_v55  ;;  %v4701_v34 = vsel %vm321_vm0, %v284_v1, %v355_v12  ;;  %v361_v1 = vrot.slane %v4687_v63, 7 }
  0x3a   : > { %701 = vrot.lane.b32.xlu1 %v4594_v16, %s4297_s24  ;;  %9482 = vst [vmem:[#allocation41_spill] sm:$0xff] %v4632_v0  ;;  %v4681_v16 = vsel %vm321_vm0, %v356_v17, %v428_v28 }
  0x3b   : > { %9483 = vst [vmem:[#allocation42_spill] sm:$0xff] %v4635_v26 }
  0x3c   : > { %9484 = vst [vmem:[#allocation43_spill] sm:$0xff] %v4641_v39  ;;  %v4693_v39 = vld [vmem:[%s4351_s23 + $0xd8] sm:$0xff] }
  0x3d   : > { %9485 = vst [vmem:[#allocation44_spill] sm:$0xff] %v4644_v35 }
  0x3e   : > { %9486 = vst [vmem:[#allocation45_spill] sm:$0xff] %v4647_v5 }
  0x3f   : > { %9487 = vst [vmem:[#allocation46_spill] sm:$0xff] %v4650_v19  ;;  %709 = vrot.lane.b32.xlu2 %v4626_v54, %s4297_s24  ;;  %v4672_v54 = vsel %vm511_vm1, %v562_v23, %v563_v18  ;;  %v4684_v19 = vsel %vm321_vm0, %v353_v29, %v427_v6  ;;  %v4696_v23 = vld [vmem:[%s4351_s23 + $0xc0] sm:$0xff]  ;;  %v286_v6 = vrot.slane %v4687_v63, 1 }
  0x40   : > { %9488 = vst [vmem:[#allocation47_spill] sm:$0xff] %v4672_v54  ;;  %v565_v28 = vrot.slane %v4684_v19, 1 }
  0x41   : > { %705 = vrot.lane.b32.xlu0 %v4629_v31, %s4297_s24  ;;  %9489 = vst [vmem:[#allocation48_spill] sm:$0xff] %v4675_v37  ;;  %v4690_v31 = vsel %vm511_vm1, %v558_v55, %v560_v33  ;;  %v570_v55 = vrot.slane %v4681_v16, 1  ;;  %v285_v33 = vrot.slane %v4696_v23, 1  ;;  %v4731_v7 = vsel %vm321_vm0, %v286_v6, %v361_v1 }
  0x42   : > { %707 = vrot.lane.b32.xlu1 %v4644_v35, %s4297_s24  ;;  %v4678_v35 = vsel %vm321_vm0, %v355_v12, %v356_v17  ;;  %9491 = vst [vmem:[#allocation50_spill] sm:$0xff] %v4687_v63  ;;  %v4704_v17 = vld [vmem:[%s4351_s23 + $0xc8] sm:$0xff]  ;;  %v362_v12 = vrot.slane %v4693_v39, 7 }
  0x43   : > { %9490 = vst [vmem:[#allocation49_spill] sm:$0xff] %v4678_v35  ;;  %v568_v29 = vrot.slane %v4678_v35, 1  ;;  %v359_v45 = vrot.slane %v4704_v17, 7  ;;  %v429_v62 = vrot.slane %v4704_v17, 5 }
  0x44   : > { %9492 = vst [vmem:[#allocation51_spill] sm:$0xff] %v4690_v31  ;;  %v4728_v63 = vsel %vm321_vm0, %v361_v1, %v362_v12  ;;  %v365_v1 = vrot.slane %v4746_v46, 7 }
  0x45   : > { %9493 = vst [vmem:[#allocation52_spill] sm:$0xff] %v4693_v39  ;;  %v4722_v38 = vsel %vm511_vm1, %v568_v29, %v570_v55  ;;  %v4743_v55 = vld [vmem:[%s4351_s23 + $0xe0] sm:$0xff] }
  0x46   : > { %9494 = vst [vmem:[#allocation53_spill] sm:$0xff] %v4696_v23  ;;  %v364_v6 = vrot.slane %v4743_v55, 7 }
  0x47   : > { %715 = vrot.lane.b32.xlu2 %v4672_v54, %s4297_s24  ;;  %9495 = vst [vmem:[#allocation54_spill] sm:$0xff] %v4701_v34  ;;  %v358_v54 = vrot.slane %v4696_v23, 7 }
  0x48   : > { %9496 = vst [vmem:[#allocation55_spill] sm:$0xff] %v4704_v17 }
  0x49   : > { %711 = vrot.lane.b32.xlu0 %v4675_v37, %s4297_s24  ;;  %v567_v37 = vrot.slane %v4701_v34, 1  ;;  %9497 = vst [vmem:[#allocation56_spill] sm:$0xff] %v4722_v38  ;;  %v4734_v23 = vsel %vm321_vm0, %v285_v33, %v358_v54  ;;  %v4740_v17 = vsel %vm321_vm0, %v358_v54, %v359_v45  ;;  %v430_v33 = vrot.slane %v4693_v39, 5 }
  0x4a   : > { %713 = vrot.lane.b32.xlu1 %v4690_v31, %s4297_s24  ;;  %v4725_v31 = vsel %vm511_vm1, %v563_v18, %v565_v28  ;;  %9499 = vst [vmem:[#allocation58_spill] sm:$0xff] %v4728_v63  ;;  %v4751_v18 = vsel %vm321_vm0, %v359_v45, %v429_v62  ;;  %v577_v28 = vrot.slane %v4731_v7, 1  ;;  %v572_v54 = vrot.slane %v4734_v23, 1 }
  0x4b   : > { %9498 = vst [vmem:[#allocation57_spill] sm:$0xff] %v4725_v31  ;;  %v4737_v13 = vsel %vm511_vm1, %v567_v37, %v568_v29  ;;  %v578_v37 = vrot.slane %v4728_v63, 1  ;;  %v573_v29 = vrot.slane %v4740_v17, 1  ;;  %v431_v45 = vrot.slane %v4746_v46, 5 }
  0x4c   : > { %9500 = vst [vmem:[#allocation59_spill] sm:$0xff] %v4731_v7  ;;  %v575_v62 = vrot.slane %v4751_v18, 1  ;;  %v4783_v9 = vsel %vm321_vm0, %v362_v12, %v430_v33  ;;  %v594_v33 = vrot.slane %v4380_v24, 2  ;;  %v599_v39 = vrot.slane %v4363_v14, 2 }
  0x4d   : > { %9501 = vst [vmem:[#allocation60_spill] sm:$0xff] %v4734_v23  ;;  %v4771_v49 = vsel %vm511_vm1, %v572_v54, %v573_v29  ;;  %v4777_v27 = vsel %vm321_vm0, %v365_v1, %v431_v45 }
  0x4e   : > { %9502 = vst [vmem:[#allocation61_spill] sm:$0xff] %v4737_v13 }
  0x4f   : > { %9503 = vst [vmem:[#allocation62_spill] sm:$0xff] %v4740_v17  ;;  %721 = vrot.lane.b32.xlu2 %v4722_v38, %s4297_s24  ;;  %v287_v38 = vrot.slane %v4743_v55, 1 }
  0x50   : > { %9504 = vst [vmem:[#allocation63_spill] sm:$0xff] %v4743_v55 }
  0x51   : > { %9505 = vst [vmem:[#allocation64_spill] sm:$0xff] %v4746_v46  ;;  %717 = vrot.lane.b32.xlu0 %v4725_v31, %s4297_s24  ;;  %v4768_v31 = vsel %vm511_vm1, %v577_v28, %v578_v37  ;;  %v4780_v46 = vsel %vm511_vm1, %v573_v29, %v575_v62  ;;  %v4788_v28 = vsel %vm321_vm0, %v287_v38, %v364_v6  ;;  %v580_v29 = vrot.slane %v4783_v9, 1 }
  0x52   : > { %719 = vrot.lane.b32.xlu1 %v4737_v13, %s4297_s24  ;;  %9506 = vst [vmem:[#allocation65_spill] sm:$0xff] %v4771_v49  ;;  %v4774_v13 = vsel %vm321_vm0, %v364_v6, %v365_v1  ;;  %v585_v1 = vrot.slane %v4777_v27, 1  ;;  %v582_v12 = vrot.slane %v4788_v28, 1  ;;  %v593_v62 = vrot.slane %v4383_v25, 2 }
  0x53   : > { %9507 = vst [vmem:[#allocation66_spill] sm:$0xff] %v4774_v13  ;;  %v583_v54 = vrot.slane %v4774_v13, 1  ;;  %v4802_v38 = vsel %vm511_vm1, %v578_v37, %v580_v29  ;;  %v588_v37 = vrot.slane %v4375_v21, 2 }
  0x54   : > { %9508 = vst [vmem:[#allocation67_spill] sm:$0xff] %v4788_v28  ;;  %v4819_v29 = vsel %vm587_vm2, %v593_v62, %v594_v33  ;;  %v596_v62 = vrot.slane %v4423_v41, 2  ;;  %v609_v41 = vrot.slane %v4440_v52, 2 }
  0x55   : > { %v4799_v45 = vsel %vm511_vm1, %v583_v54, %v585_v1  ;;  %9509 = vst [vmem:[#allocation68_spill] sm:$0xff] %v4802_v38  ;;  %v4805_v6 = vsel %vm511_vm1, %v582_v12, %v583_v54  ;;  %v589_v1 = vrot.slane %v4372_v20, 2  ;;  %v591_v54 = vrot.slane %v4420_v40, 2 }
  0x56   : > { %9510 = vst [vmem:[#allocation69_spill] sm:$0xff] %v4819_v29  ;;  %v601_v40 = vrot.slane %v4394_v30, 2  ;;  %v608_v30 = vrot.slane %v4443_v53, 2 }
  0x57   : > { %727 = vrot.lane.b32.xlu2 %v4768_v31, %s4297_s24  ;;  %v4822_v12 = vsel %vm587_vm2, %v588_v37, %v589_v1  ;;  %v4825_v55 = vsel %vm587_vm2, %v589_v1, %v591_v54  ;;  %v598_v37 = vrot.slane %v4366_v15, 2  ;;  %v4841_v54 = vsel %vm587_vm2, %v594_v33, %v596_v62 }
  0x58   : > { %9511 = vst [vmem:[#allocation70_spill] sm:$0xff] %v4822_v12  ;;  %v4838_v1 = vsel %vm587_vm2, %v599_v39, %v601_v40  ;;  %v603_v33 = vrot.slane %v4458_v58, 2  ;;  %v606_v62 = vrot.slane %v4463_v59, 2 }
  0x59   : > { %723 = vrot.lane.b32.xlu0 %v4771_v49, %s4297_s24  ;;  %9512 = vst [vmem:[#allocation71_spill] sm:$0xff] %v4825_v55 }
  0x5a   : > { %725 = vrot.lane.b32.xlu1 %v4780_v46, %s4297_s24  ;;  %9513 = vst [vmem:[#allocation72_spill] sm:$0xff] %v4838_v1 }
  0x5f   : > { %733 = vrot.lane.b32.xlu2 %v4799_v45, %s4297_s24 }
  0x61   : > { %729 = vrot.lane.b32.xlu0 %v4802_v38, %s4297_s24 }
  0x62   : > { %731 = vrot.lane.b32.xlu1 %v4805_v6, %s4297_s24 }
  0x67   : > { %769 = vrot.lane.b32.xlu2 %v4819_v29, %s4298_s25  ;;  %v4844_v29 = vsel %vm587_vm2, %v598_v37, %v599_v39  ;;  %v604_v39 = vrot.slane %v4455_v57, 2  ;;  %v4860_v37 = vsel %vm587_vm2, %v608_v30, %v609_v41  ;;  %v611_v30 = vrot.slane %v4492_v11, 2 }
  0x68   : > { %9515 = vst [vmem:[#allocation74_spill] sm:$0xff] %v4860_v37  ;;  %v624_v11 = vrot.slane %v4536_v47, 2 }
  0x69   : > { %765 = vrot.lane.b32.xlu0 %v4822_v12, %s4298_s25  ;;  %v616_v12 = vrot.slane %v4489_v10, 2  ;;  %v623_v10 = vrot.slane %v4539_v48, 2 }
  0x6a   : > { %767 = vrot.lane.b32.xlu1 %v4825_v55, %s4298_s25  ;;  %v4866_v55 = vsel %vm587_vm2, %v604_v39, %v606_v62  ;;  %v4884_v62 = vsel %vm587_vm2, %v609_v41, %v611_v30  ;;  %v618_v41 = vrot.slane %v4545_v60, 2  ;;  %v621_v30 = vrot.slane %v4559_v61, 2 }
  0x6b   : > { %9519 = vst [vmem:[#allocation78_spill] sm:$0xff] %v4884_v62 }
  0x6f   : > { %775 = vrot.lane.b32.xlu2 %v4838_v1, %s4298_s25  ;;  %v4863_v1 = vsel %vm587_vm2, %v603_v33, %v604_v39  ;;  %v613_v33 = vrot.slane %v4513_v22, 2 }
  0x70   : > { %9516 = vst [vmem:[#allocation75_spill] sm:$0xff] %v4863_v1 }
  0x71   : > { %771 = vrot.lane.b32.xlu0 %v4841_v54, %s4298_s25  ;;  %v4854_v40 = vpop.permute.xlu2 %683 }
  0x72   : > { %773 = vrot.lane.b32.xlu1 %v4844_v29, %s4298_s25  ;;  %9514 = vst [vmem:[#allocation73_spill] sm:$0xff] %v4854_v40  ;;  %v614_v40 = vrot.slane %v4483_v8, 2 }
  0x74   : > { %v4881_v39 = vsel %vm587_vm2, %v614_v40, %v616_v12 }
  0x75   : > { %9518 = vst [vmem:[#allocation77_spill] sm:$0xff] %v4881_v39 }
  0x77   : > { %781 = vrot.lane.b32.xlu2 %v4860_v37, %s4298_s25  ;;  %v4887_v37 = vsel %vm587_vm2, %v613_v33, %v614_v40  ;;  %v619_v40 = vrot.slane %v4542_v50, 2  ;;  %v4903_v33 = vsel %vm587_vm2, %v623_v10, %v624_v11  ;;  %v626_v10 = vrot.slane %v4588_v44, 2 }
  0x78   : > { %9521 = vst [vmem:[#allocation80_spill] sm:$0xff] %v4903_v33  ;;  %v638_v44 = vrot.slane %v4635_v26, 2 }
  0x79   : > { %777 = vrot.lane.b32.xlu0 %v4863_v1, %s4298_s25  ;;  %v4876_v59 = vpop.permute.xlu2 %685 }
  0x7a   : > { %779 = vrot.lane.b32.xlu1 %v4866_v55, %s4298_s25  ;;  %9517 = vst [vmem:[#allocation76_spill] sm:$0xff] %v4876_v59  ;;  %v4906_v59 = vsel %vm587_vm2, %v618_v41, %v619_v40 }
  0x7b   : > { %9522 = vst [vmem:[#allocation81_spill] sm:$0xff] %v4906_v59 }
  0x7f   : > { %787 = vrot.lane.b32.xlu2 %v4881_v39, %s4298_s25  ;;  %v4909_v39 = vsel %vm587_vm2, %v619_v40, %v621_v30  ;;  %v628_v40 = vrot.slane %v4605_v4, 2 }
  0x81   : > { %783 = vrot.lane.b32.xlu0 %v4884_v62, %s4298_s25  ;;  %v4897_v12 = vpop.permute.xlu2 %691  ;;  %v631_v62 = vrot.slane %v4585_v43, 2 }
  0x82   : > { %785 = vrot.lane.b32.xlu1 %v4887_v37, %s4298_s25  ;;  %9520 = vst [vmem:[#allocation79_spill] sm:$0xff] %v4897_v12  ;;  %v629_v12 = vrot.slane %v4582_v42, 2 }
  0x84   : > { %v4934_v43 = vsel %vm587_vm2, %v628_v40, %v629_v12  ;;  %v636_v40 = vrot.slane %v4655_v3, 2  ;;  %v646_v3 = vrot.slane %v4681_v16, 2 }
  0x87   : > { %793 = vrot.lane.b32.xlu2 %v4903_v33, %s4298_s25  ;;  %v4928_v33 = vsel %vm587_vm2, %v629_v12, %v631_v62  ;;  %v634_v12 = vrot.slane %v4647_v5, 2 }
  0x88   : > { %9526 = vst [vmem:[#allocation85_spill] sm:$0xff] %v4928_v33 }
  0x89   : > { %789 = vrot.lane.b32.xlu0 %v4906_v59, %s4298_s25  ;;  %v4919_v61 = vpop.permute.xlu2 %697  ;;  %v4931_v59 = vsel %vm587_vm2, %v624_v11, %v626_v10  ;;  %v633_v11 = vrot.slane %v4638_v2, 2 }
  0x8a   : > { %791 = vrot.lane.b32.xlu1 %v4909_v39, %s4298_s25  ;;  %9523 = vst [vmem:[#allocation82_spill] sm:$0xff] %v4919_v61  ;;  %v639_v61 = vrot.slane %v4632_v0, 2 }
  0x8b   : > { %v4922_v41 = vpop.permute.xlu0 %675  ;;  %9527 = vst [vmem:[#allocation86_spill] sm:$0xff] %v4931_v59 }
  0x8c   : > { %9524 = vst [vmem:[#allocation83_spill] sm:$0xff] %v4922_v41  ;;  %v4925_v30 = vpop.permute.xlu1 %679  ;;  %v4954_v41 = vsel %vm587_vm2, %v638_v44, %v639_v61 }
  0x8d   : > { %9525 = vst [vmem:[#allocation84_spill] sm:$0xff] %v4925_v30 }
  0x8e   : > { %9531 = vst [vmem:[#allocation90_spill] sm:$0xff] %v4954_v41 }
  0x8f   : > { %799 = vrot.lane.b32.xlu2 %v4928_v33, %s4298_s25  ;;  %v4957_v33 = vsel %vm587_vm2, %v633_v11, %v634_v12  ;;  %v641_v11 = vrot.slane %v4684_v19, 2  ;;  %v653_v19 = vrot.slane %v4731_v7, 2 }
  0x90   : > { %9532 = vst [vmem:[#allocation91_spill] sm:$0xff] %v4957_v33 }
  0x91   : > { %795 = vrot.lane.b32.xlu0 %v4931_v59, %s4298_s25  ;;  %v4944_v62 = vpop.permute.xlu2 %703  ;;  %v4960_v59 = vsel %vm587_vm2, %v634_v12, %v636_v40  ;;  %v643_v12 = vrot.slane %v4701_v34, 2 }
  0x92   : > { %797 = vrot.lane.b32.xlu1 %v4934_v43, %s4298_s25  ;;  %9528 = vst [vmem:[#allocation87_spill] sm:$0xff] %v4944_v62  ;;  %v644_v62 = vrot.slane %v4678_v35, 2 }
  0x93   : > { %v4948_v10 = vpop.permute.xlu0 %677 }
  0x94   : > { %9529 = vst [vmem:[#allocation88_spill] sm:$0xff] %v4948_v10  ;;  %v4951_v30 = vpop.permute.xlu1 %681  ;;  %v4979_v10 = vsel %vm587_vm2, %v644_v62, %v646_v3  ;;  %v4985_v16 = vsel %vm587_vm2, %v643_v12, %v644_v62  ;;  %v649_v62 = vrot.slane %v4740_v17, 2  ;;  %v651_v12 = vrot.slane %v4751_v18, 2 }
  0x95   : > { %9530 = vst [vmem:[#allocation89_spill] sm:$0xff] %v4951_v30  ;;  %v661_v18 = vrot.slane %v4777_v27, 2 }
  0x96   : > { %9536 = vst [vmem:[#allocation95_spill] sm:$0xff] %v4979_v10 }
  0x97   : > { %805 = vrot.lane.b32.xlu2 %v4954_v41, %s4298_s25  ;;  %v4982_v41 = vsel %vm587_vm2, %v639_v61, %v641_v11  ;;  %v648_v61 = vrot.slane %v4734_v23, 2 }
  0x98   : > { %9537 = vst [vmem:[#allocation96_spill] sm:$0xff] %v4982_v41 }
  0x99   : > { %801 = vrot.lane.b32.xlu0 %v4957_v33, %s4298_s25  ;;  %v4970_v44 = vpop.permute.xlu2 %709 }
  0x9a   : > { %803 = vrot.lane.b32.xlu1 %v4960_v59, %s4298_s25  ;;  %9533 = vst [vmem:[#allocation92_spill] sm:$0xff] %v4970_v44  ;;  %v654_v44 = vrot.slane %v4728_v63, 2 }
  0x9b   : > { %v4973_v30 = vpop.permute.xlu0 %687 }
  0x9c   : > { %9534 = vst [vmem:[#allocation93_spill] sm:$0xff] %v4973_v30  ;;  %v4976_v40 = vpop.permute.xlu1 %689  ;;  %v5005_v30 = vsel %vm587_vm2, %v653_v19, %v654_v44 }
  0x9d   : > { %9535 = vst [vmem:[#allocation94_spill] sm:$0xff] %v4976_v40 }
  0x9e   : > { %9541 = vst [vmem:[#allocation100_spill] sm:$0xff] %v5005_v30 }
  0x9f   : > { %811 = vrot.lane.b32.xlu2 %v4979_v10, %s4298_s25  ;;  %v5008_v10 = vsel %vm587_vm2, %v648_v61, %v649_v62  ;;  %v656_v61 = vrot.slane %v4783_v9, 2 }
  0xa0   : > { %9542 = vst [vmem:[#allocation101_spill] sm:$0xff] %v5008_v10 }
  0xa1   : > { %807 = vrot.lane.b32.xlu0 %v4982_v41, %s4298_s25  ;;  %v4995_v3 = vpop.permute.xlu2 %715  ;;  %v5011_v41 = vsel %vm587_vm2, %v649_v62, %v651_v12  ;;  %v658_v62 = vrot.slane %v4788_v28, 2 }
  0xa2   : > { %809 = vrot.lane.b32.xlu1 %v4985_v16, %s4298_s25  ;;  %9538 = vst [vmem:[#allocation97_spill] sm:$0xff] %v4995_v3  ;;  %v659_v3 = vrot.slane %v4774_v13, 2 }
  0xa3   : > { %v4999_v11 = vpop.permute.xlu0 %693 }
  0xa4   : > { %9539 = vst [vmem:[#allocation98_spill] sm:$0xff] %v4999_v11  ;;  %v5002_v40 = vpop.permute.xlu1 %695  ;;  %v5030_v11 = vsel %vm587_vm2, %v659_v3, %v661_v18  ;;  %v5036_v27 = vsel %vm587_vm2, %v658_v62, %v659_v3 }
  0xa5   : > { %9540 = vst [vmem:[#allocation99_spill] sm:$0xff] %v5002_v40 }
  0xa6   : > { %9546 = vst [vmem:[#allocation105_spill] sm:$0xff] %v5036_v27 }
  0xa7   : > { %817 = vrot.lane.b32.xlu2 %v5005_v30, %s4298_s25  ;;  %v5033_v30 = vsel %vm587_vm2, %v654_v44, %v656_v61 }
  0xa9   : > { %813 = vrot.lane.b32.xlu0 %v5008_v10, %s4298_s25  ;;  %v5021_v19 = vpop.permute.xlu2 %721 }
  0xaa   : > { %815 = vrot.lane.b32.xlu1 %v5011_v41, %s4298_s25  ;;  %9543 = vst [vmem:[#allocation102_spill] sm:$0xff] %v5021_v19 }
  0xab   : > { %v5024_v40 = vpop.permute.xlu0 %699 }
  0xac   : > { %9544 = vst [vmem:[#allocation103_spill] sm:$0xff] %v5024_v40  ;;  %v5027_v12 = vpop.permute.xlu1 %701 }
  0xad   : > { %9545 = vst [vmem:[#allocation104_spill] sm:$0xff] %v5027_v12 }
  0xaf   : > { %823 = vrot.lane.b32.xlu2 %v5030_v11, %s4298_s25 }
  0xb1   : > { %819 = vrot.lane.b32.xlu0 %v5033_v30, %s4298_s25  ;;  %v5044_v9 = vpop.permute.xlu2 %727 }
  0xb2   : > { %821 = vrot.lane.b32.xlu1 %v5036_v27, %s4298_s25  ;;  %9547 = vst [vmem:[#allocation106_spill] sm:$0xff] %v5044_v9 }
  0xb3   : > { %v5046_v12 = vpop.permute.xlu0 %705 }
  0xb4   : > { %9548 = vst [vmem:[#allocation107_spill] sm:$0xff] %v5046_v12  ;;  %v5048_v18 = vpop.permute.xlu1 %707 }
  0xb5   : > { %9549 = vst [vmem:[#allocation108_spill] sm:$0xff] %v5048_v18 }
  0xb7   : > { %859 = vrot.lane.b32.xlu2 %v4375_v21, %s4299_s26 }
  0xb9   : > { %855 = vrot.lane.b32.xlu0 %v4383_v25, %s4299_s26  ;;  %v5056_v44 = vpop.permute.xlu2 %733 }
  0xba   : > { %857 = vrot.lane.b32.xlu1 %v4380_v24, %s4299_s26  ;;  %9550 = vst [vmem:[#allocation109_spill] sm:$0xff] %v5056_v44 }
  0xbb   : > { %v5058_v3 = vpop.permute.xlu0 %711 }
  0xbc   : > { %9551 = vst [vmem:[#allocation110_spill] sm:$0xff] %v5058_v3  ;;  %v5060_v61 = vpop.permute.xlu1 %713 }
  0xbd   : > { %9552 = vst [vmem:[#allocation111_spill] sm:$0xff] %v5060_v61 }
  0xbf   : > { %865 = vrot.lane.b32.xlu2 %v4363_v14, %s4299_s26 }
  0xc1   : > { %861 = vrot.lane.b32.xlu0 %v4372_v20, %s4299_s26  ;;  %v5068_v62 = vpop.permute.xlu2 %769 }
  0xc2   : > { %863 = vrot.lane.b32.xlu1 %v4366_v15, %s4299_s26  ;;  %9553 = vst [vmem:[#allocation112_spill] sm:$0xff] %v5068_v62 }
  0xc3   : > { %v5070_v9 = vpop.permute.xlu0 %717 }
  0xc4   : > { %9554 = vst [vmem:[#allocation113_spill] sm:$0xff] %v5070_v9  ;;  %v5072_v19 = vpop.permute.xlu1 %719 }
  0xc5   : > { %9555 = vst [vmem:[#allocation114_spill] sm:$0xff] %v5072_v19 }
  0xc7   : > { %871 = vrot.lane.b32.xlu2 %v4443_v53, %s4299_s26 }
  0xc9   : > { %867 = vrot.lane.b32.xlu0 %v4458_v58, %s4299_s26  ;;  %v5080_v44 = vpop.permute.xlu2 %775 }
  0xca   : > { %869 = vrot.lane.b32.xlu1 %v4455_v57, %s4299_s26  ;;  %9556 = vst [vmem:[#allocation115_spill] sm:$0xff] %v5080_v44 }
  0xcb   : > { %v5082_v40 = vpop.permute.xlu0 %723 }
  0xcc   : > { %9557 = vst [vmem:[#allocation116_spill] sm:$0xff] %v5082_v40  ;;  %v5084_v61 = vpop.permute.xlu1 %725 }
  0xcd   : > { %9558 = vst [vmem:[#allocation117_spill] sm:$0xff] %v5084_v61 }
  0xcf   : > { %877 = vrot.lane.b32.xlu2 %v4483_v8, %s4299_s26 }
  0xd1   : > { %873 = vrot.lane.b32.xlu0 %v4440_v52, %s4299_s26  ;;  %v5092_v19 = vpop.permute.xlu2 %781 }
  0xd2   : > { %875 = vrot.lane.b32.xlu1 %v4513_v22, %s4299_s26  ;;  %9559 = vst [vmem:[#allocation118_spill] sm:$0xff] %v5092_v19 }
  0xd3   : > { %v5094_v9 = vpop.permute.xlu0 %729 }
  0xd4   : > { %9560 = vst [vmem:[#allocation119_spill] sm:$0xff] %v5094_v9  ;;  %v5096_v3 = vpop.permute.xlu1 %731 }
  0xd5   : > { %9561 = vst [vmem:[#allocation120_spill] sm:$0xff] %v5096_v3 }
  0xd7   : > { %883 = vrot.lane.b32.xlu2 %v4539_v48, %s4299_s26 }
  0xd9   : > { %879 = vrot.lane.b32.xlu0 %v4545_v60, %s4299_s26  ;;  %v5104_v61 = vpop.permute.xlu2 %787 }
  0xda   : > { %881 = vrot.lane.b32.xlu1 %v4542_v50, %s4299_s26  ;;  %9562 = vst [vmem:[#allocation121_spill] sm:$0xff] %v5104_v61 }
  0xdb   : > { %v5106_v40 = vpop.permute.xlu0 %765 }
  0xdc   : > { %9563 = vst [vmem:[#allocation122_spill] sm:$0xff] %v5106_v40  ;;  %v5108_v44 = vpop.permute.xlu1 %767 }
  0xdd   : > { %9564 = vst [vmem:[#allocation123_spill] sm:$0xff] %v5108_v44 }
  0xdf   : > { %889 = vrot.lane.b32.xlu2 %v4582_v42, %s4299_s26 }
  0xe1   : > { %885 = vrot.lane.b32.xlu0 %v4536_v47, %s4299_s26  ;;  %v5116_v3 = vpop.permute.xlu2 %793 }
  0xe2   : > { %887 = vrot.lane.b32.xlu1 %v4605_v4, %s4299_s26  ;;  %9565 = vst [vmem:[#allocation124_spill] sm:$0xff] %v5116_v3 }
  0xe3   : > { %v5118_v9 = vpop.permute.xlu0 %771 }
  0xe4   : > { %9566 = vst [vmem:[#allocation125_spill] sm:$0xff] %v5118_v9  ;;  %v5120_v19 = vpop.permute.xlu1 %773 }
  0xe5   : > { %9567 = vst [vmem:[#allocation126_spill] sm:$0xff] %v5120_v19 }
  0xe7   : > { %895 = vrot.lane.b32.xlu2 %v4635_v26, %s4299_s26 }
  0xe9   : > { %891 = vrot.lane.b32.xlu0 %v4638_v2, %s4299_s26  ;;  %v5128_v61 = vpop.permute.xlu2 %799 }
  0xea   : > { %893 = vrot.lane.b32.xlu1 %v4647_v5, %s4299_s26  ;;  %9568 = vst [vmem:[#allocation127_spill] sm:$0xff] %v5128_v61 }
  0xeb   : > { %v5130_v18 = vpop.permute.xlu0 %777 }
  0xec   : > { %9569 = vst [vmem:[#allocation128_spill] sm:$0xff] %v5130_v18  ;;  %v5132_v12 = vpop.permute.xlu1 %779 }
  0xed   : > { %9570 = vst [vmem:[#allocation129_spill] sm:$0xff] %v5132_v12 }
  0xef   : > { %901 = vrot.lane.b32.xlu2 %v4678_v35, %s4299_s26 }
  0xf1   : > { %897 = vrot.lane.b32.xlu0 %v4632_v0, %s4299_s26  ;;  %v5140_v19 = vpop.permute.xlu2 %805 }
  0xf2   : > { %899 = vrot.lane.b32.xlu1 %v4701_v34, %s4299_s26  ;;  %9571 = vst [vmem:[#allocation130_spill] sm:$0xff] %v5140_v19  ;;  %v5159_v19 = vld [vmem:[%s4351_s23 + $0xf0] sm:$0xff] }
  0xf3   : > { %v5142_v3 = vpop.permute.xlu0 %783  ;;  %9577 = vst [vmem:[#allocation136_spill] sm:$0xff] %v5159_v19 }
  0xf4   : > { %9572 = vst [vmem:[#allocation131_spill] sm:$0xff] %v5142_v3  ;;  %v5144_v9 = vpop.permute.xlu1 %785 }
  0xf5   : > { %9573 = vst [vmem:[#allocation132_spill] sm:$0xff] %v5144_v9  ;;  %v5164_v9 = vld [vmem:[%s4351_s23 + $0xf8] sm:$0xff] }
  0xf6   : > { %9578 = vst [vmem:[#allocation137_spill] sm:$0xff] %v5164_v9  ;;  %v9264_v24 = vrot.slane %v5164_v9, 7 }
  0xf7   : > { %907 = vrot.lane.b32.xlu2 %v4731_v7, %s4299_s26 }
  0xf9   : > { %903 = vrot.lane.b32.xlu0 %v4734_v23, %s4299_s26  ;;  %v5152_v12 = vpop.permute.xlu2 %811 }
  0xfa   : > { %905 = vrot.lane.b32.xlu1 %v4740_v17, %s4299_s26  ;;  %9574 = vst [vmem:[#allocation133_spill] sm:$0xff] %v5152_v12  ;;  %v288_v12 = vrot.slane %v5159_v19, 1 }
  0xfb   : > { %v5154_v61 = vpop.permute.xlu0 %789 }
  0xfc   : > { %9575 = vst [vmem:[#allocation134_spill] sm:$0xff] %v5154_v61  ;;  %v5156_v18 = vpop.permute.xlu1 %791  ;;  %v367_v61 = vrot.slane %v5159_v19, 7 }
  0xfd   : > { %9576 = vst [vmem:[#allocation135_spill] sm:$0xff] %v5156_v18 }
  0xfe   : > { %v5180_v25 = vsel %vm321_vm0, %v288_v12, %v367_v61  ;;  %v5185_v44 = vsel %vm321_vm0, %v367_v61, %v9264_v24 }
  0xff   : > { %913 = vrot.lane.b32.xlu2 %v4774_v13, %s4299_s26 }
 0x101   : > { %909 = vrot.lane.b32.xlu0 %v4728_v63, %s4299_s26  ;;  %v5170_v3 = vpop.permute.xlu2 %817 }
 0x102   : > { %911 = vrot.lane.b32.xlu1 %v4788_v28, %s4299_s26  ;;  %9579 = vst [vmem:[#allocation138_spill] sm:$0xff] %v5170_v3 }
 0x103   : > { %v5174_v18 = vpop.permute.xlu0 %795 }
 0x104   : > { %9580 = vst [vmem:[#allocation139_spill] sm:$0xff] %v5174_v18  ;;  %v5177_v62 = vpop.permute.xlu1 %797 }
 0x105   : > { %9581 = vst [vmem:[#allocation140_spill] sm:$0xff] %v5177_v62 }
 0x107   : > { %951 = vrot.lane.b32.xlu2 %v4410_v36, %s4300_s27 }
 0x109   : > { %915 = vrot.lane.b32.xlu0 %v5180_v25, %s4299_s26  ;;  %v5193_v19 = vpop.permute.xlu2 %823 }
 0x10a   : > { %917 = vrot.lane.b32.xlu1 %v5185_v44, %s4299_s26  ;;  %9582 = vst [vmem:[#allocation141_spill] sm:$0xff] %v5193_v19  ;;  %v9588_v19 = vld [vmem:[#allocation18_spill] sm:$0xff] }
 0x10b   : > { %v5195_v3 = vpop.permute.xlu0 %801 }
 0x10c   : > { %9583 = vst [vmem:[#allocation142_spill] sm:$0xff] %v5195_v3  ;;  %v5197_v12 = vpop.permute.xlu1 %803  ;;  %v9590_v3 = vld [vmem:[#allocation10_spill] sm:$0xff] }
 0x10d   : > { %9584 = vst [vmem:[#allocation143_spill] sm:$0xff] %v5197_v12  ;;  %v9589_v12 = vld [vmem:[#allocation6_spill] sm:$0xff] }
 0x10f   : > { %957 = vrot.lane.b32.xlu2 %v4437_v51, %s4300_s27 }
 0x111   : > { %953 = vrot.lane.b32.xlu0 %v4452_v56, %s4300_s27  ;;  %v5205_v36 = vpop.permute.xlu2 %859 }
 0x112   : > { %955 = vrot.lane.b32.xlu1 %v4402_v32, %s4300_s27  ;;  %9585 = vst [vmem:[#allocation144_spill] sm:$0xff] %v5205_v36  ;;  %v9594_v36 = vld [vmem:[#allocation26_spill] sm:$0xff] }
 0x113   : > { %v5207_v61 = vpop.permute.xlu0 %807 }
 0x114   : > { %9586 = vst [vmem:[#allocation145_spill] sm:$0xff] %v5207_v61  ;;  %v5209_v24 = vpop.permute.xlu1 %809  ;;  %v9596_v61 = vld [vmem:[#allocation16_spill] sm:$0xff] }
 0x115   : > { %9587 = vst [vmem:[#allocation146_spill] sm:$0xff] %v5209_v24  ;;  %v9595_v24 = vld [vmem:[#allocation20_spill] sm:$0xff] }
 0x117   : > { %963 = vrot.lane.b32.xlu2 %v9588_v19, %s4300_s27 }
 0x119   : > { %959 = vrot.lane.b32.xlu0 %v9589_v12, %s4300_s27  ;;  %v5217_v62 = vpop.permute.xlu2 %865 }
 0x11a   : > { %961 = vrot.lane.b32.xlu1 %v9590_v3, %s4300_s27  ;;  %9591 = vst [vmem:[#allocation6_spill] sm:$0xff] %v5217_v62  ;;  %v9600_v62 = vld [vmem:[#allocation33_spill] sm:$0xff] }
 0x11b   : > { %v5219_v56 = vpop.permute.xlu0 %813 }
 0x11c   : > { %9592 = vst [vmem:[#allocation147_spill] sm:$0xff] %v5219_v56  ;;  %v5221_v18 = vpop.permute.xlu1 %815  ;;  %v9602_v56 = vld [vmem:[#allocation25_spill] sm:$0xff] }
 0x11d   : > { %9593 = vst [vmem:[#allocation148_spill] sm:$0xff] %v5221_v18  ;;  %v9601_v18 = vld [vmem:[#allocation29_spill] sm:$0xff] }
 0x11f   : > { %969 = vrot.lane.b32.xlu2 %v9594_v36, %s4300_s27 }
 0x121   : > { %965 = vrot.lane.b32.xlu0 %v9595_v24, %s4300_s27  ;;  %v5229_v40 = vpop.permute.xlu2 %871 }
 0x122   : > { %967 = vrot.lane.b32.xlu1 %v9596_v61, %s4300_s27  ;;  %9597 = vst [vmem:[#allocation149_spill] sm:$0xff] %v5229_v40  ;;  %v9606_v40 = vld [vmem:[#allocation40_spill] sm:$0xff] }
 0x123   : > { %v5231_v19 = vpop.permute.xlu0 %819 }
 0x124   : > { %9598 = vst [vmem:[#allocation150_spill] sm:$0xff] %v5231_v19  ;;  %v5233_v3 = vpop.permute.xlu1 %821  ;;  %v9608_v19 = vld [vmem:[#allocation32_spill] sm:$0xff] }
 0x125   : > { %9599 = vst [vmem:[#allocation151_spill] sm:$0xff] %v5233_v3  ;;  %v9607_v3 = vld [vmem:[#allocation35_spill] sm:$0xff] }
 0x127   : > { %975 = vrot.lane.b32.xlu2 %v9600_v62, %s4300_s27 }
 0x129   : > { %971 = vrot.lane.b32.xlu0 %v9601_v18, %s4300_s27  ;;  %v5241_v36 = vpop.permute.xlu2 %877 }
 0x12a   : > { %973 = vrot.lane.b32.xlu1 %v9602_v56, %s4300_s27  ;;  %9603 = vst [vmem:[#allocation152_spill] sm:$0xff] %v5241_v36  ;;  %v9612_v36 = vld [vmem:[#allocation48_spill] sm:$0xff] }
 0x12b   : > { %v5243_v24 = vpop.permute.xlu0 %855 }
 0x12c   : > { %9604 = vst [vmem:[#allocation153_spill] sm:$0xff] %v5243_v24  ;;  %v5245_v61 = vpop.permute.xlu1 %857  ;;  %v9614_v24 = vld [vmem:[#allocation39_spill] sm:$0xff] }
 0x12d   : > { %9605 = vst [vmem:[#allocation154_spill] sm:$0xff] %v5245_v61  ;;  %v9613_v61 = vld [vmem:[#allocation44_spill] sm:$0xff] }
 0x12f   : > { %981 = vrot.lane.b32.xlu2 %v9606_v40, %s4300_s27 }
 0x131   : > { %977 = vrot.lane.b32.xlu0 %v9607_v3, %s4300_s27  ;;  %v5253_v62 = vpop.permute.xlu2 %883 }
 0x132   : > { %979 = vrot.lane.b32.xlu1 %v9608_v19, %s4300_s27  ;;  %9609 = vst [vmem:[#allocation155_spill] sm:$0xff] %v5253_v62  ;;  %v9618_v62 = vld [vmem:[#allocation57_spill] sm:$0xff] }
 0x133   : > { %v5255_v18 = vpop.permute.xlu0 %861 }
 0x134   : > { %9610 = vst [vmem:[#allocation156_spill] sm:$0xff] %v5255_v18  ;;  %v5257_v56 = vpop.permute.xlu1 %863  ;;  %v9620_v18 = vld [vmem:[#allocation47_spill] sm:$0xff] }
 0x135   : > { %9611 = vst [vmem:[#allocation157_spill] sm:$0xff] %v5257_v56  ;;  %v9619_v56 = vld [vmem:[#allocation51_spill] sm:$0xff] }
 0x137   : > { %987 = vrot.lane.b32.xlu2 %v9612_v36, %s4300_s27 }
 0x139   : > { %983 = vrot.lane.b32.xlu0 %v9613_v61, %s4300_s27  ;;  %v5265_v40 = vpop.permute.xlu2 %889 }
 0x13a   : > { %985 = vrot.lane.b32.xlu1 %v9614_v24, %s4300_s27  ;;  %9615 = vst [vmem:[#allocation158_spill] sm:$0xff] %v5265_v40  ;;  %v9625_v40 = vld [vmem:[#allocation56_spill] sm:$0xff] }
 0x13b   : > { %v5267_v3 = vpop.permute.xlu0 %867 }
 0x13c   : > { %9616 = vst [vmem:[#allocation159_spill] sm:$0xff] %v5267_v3  ;;  %v5269_v19 = vpop.permute.xlu1 %869 }
 0x13d   : > { %9617 = vst [vmem:[#allocation160_spill] sm:$0xff] %v5269_v19  ;;  %v9624_v19 = vld [vmem:[#allocation61_spill] sm:$0xff] }
 0x13f   : > { %993 = vrot.lane.b32.xlu2 %v9618_v62, %s4300_s27 }
 0x141   : > { %989 = vrot.lane.b32.xlu0 %v9619_v56, %s4300_s27  ;;  %v5277_v36 = vpop.permute.xlu2 %895 }
 0x142   : > { %991 = vrot.lane.b32.xlu1 %v9620_v18, %s4300_s27  ;;  %9621 = vst [vmem:[#allocation51_spill] sm:$0xff] %v5277_v36  ;;  %v666_v36 = vrot.slane %v5185_v44, 1 }
 0x143   : > { %v5279_v61 = vpop.permute.xlu0 %873 }
 0x144   : > { %9622 = vst [vmem:[#allocation161_spill] sm:$0xff] %v5279_v61  ;;  %v5281_v24 = vpop.permute.xlu1 %875 }
 0x145   : > { %9623 = vst [vmem:[#allocation162_spill] sm:$0xff] %v5281_v24  ;;  %v665_v24 = vrot.slane %v5180_v25, 1 }
 0x147   : > { %999 = vrot.lane.b32.xlu2 %v4771_v49, %s4300_s27  ;;  %v9632_v49 = vrot.slane %v5164_v9, 7 }
 0x149   : > { %995 = vrot.lane.b32.xlu0 %v9624_v19, %s4300_s27  ;;  %v5289_v3 = vpop.permute.xlu2 %901 }
 0x14a   : > { %997 = vrot.lane.b32.xlu1 %v9625_v40, %s4300_s27  ;;  %9626 = vst [vmem:[#allocation61_spill] sm:$0xff] %v5289_v3 }
 0x14b   : > { %v5291_v62 = vpop.permute.xlu0 %879 }
 0x14c   : > { %9627 = vst [vmem:[#allocation163_spill] sm:$0xff] %v5291_v62  ;;  %v5293_v18 = vpop.permute.xlu1 %881  ;;  %v432_v62 = vrot.slane %v5164_v9, 5 }
 0x14d   : > { %9628 = vst [vmem:[#allocation164_spill] sm:$0xff] %v5293_v18 }
 0x14e   : > { %v5316_v40 = vsel %vm321_vm0, %v9632_v49, %v432_v62  ;;  %v9636_v62 = vld [vmem:[#allocation69_spill] sm:$0xff] }
 0x14f   : > { %1005 = vrot.lane.b32.xlu2 %v4802_v38, %s4300_s27  ;;  %v5311_v38 = vsel %vm511_vm1, %v665_v24, %v666_v36 }
 0x151   : > { %1001 = vrot.lane.b32.xlu0 %v4780_v46, %s4300_s27  ;;  %v5303_v61 = vpop.permute.xlu2 %907 }
 0x152   : > { %1003 = vrot.lane.b32.xlu1 %v4768_v31, %s4300_s27  ;;  %9629 = vst [vmem:[#allocation165_spill] sm:$0xff] %v5303_v61 }
 0x153   : > { %v5305_v3 = vpop.permute.xlu0 %885 }
 0x154   : > { %9630 = vst [vmem:[#allocation166_spill] sm:$0xff] %v5305_v3  ;;  %v5308_v18 = vpop.permute.xlu1 %887  ;;  %v668_v3 = vrot.slane %v5316_v40, 1 }
 0x155   : > { %9631 = vst [vmem:[#allocation167_spill] sm:$0xff] %v5308_v18 }
 0x156   : > { %v5332_v49 = vsel %vm511_vm1, %v666_v36, %v668_v3  ;;  %v9640_v3 = vld [vmem:[#allocation70_spill] sm:$0xff] }
 0x157   : > { %1011 = vrot.lane.b32.xlu2 %v5311_v38, %s4300_s27 }
 0x159   : > { %1007 = vrot.lane.b32.xlu0 %v4805_v6, %s4300_s27  ;;  %v5324_v61 = vpop.permute.xlu2 %913 }
 0x15a   : > { %1009 = vrot.lane.b32.xlu1 %v4799_v45, %s4300_s27  ;;  %9633 = vst [vmem:[#allocation168_spill] sm:$0xff] %v5324_v61 }
 0x15b   : > { %v5327_v24 = vpop.permute.xlu0 %891 }
 0x15c   : > { %9634 = vst [vmem:[#allocation169_spill] sm:$0xff] %v5327_v24  ;;  %v5329_v18 = vpop.permute.xlu1 %893 }
 0x15d   : > { %9635 = vst [vmem:[#allocation170_spill] sm:$0xff] %v5329_v18 }
 0x15f   : > { %1049 = vrot.lane.b32.xlu2 %v4841_v54, %s4301_s28  ;;  %v9641_v54 = vld [vmem:[#allocation71_spill] sm:$0xff] }
 0x161   : > { %1013 = vrot.lane.b32.xlu0 %v5332_v49, %s4300_s27  ;;  %v5340_v9 = vpop.permute.xlu2 %951 }
 0x162   : > { %1047 = vrot.lane.b32.xlu1 %v9636_v62, %s4301_s28  ;;  %9637 = vst [vmem:[#allocation69_spill] sm:$0xff] %v5340_v9 }
 0x163   : > { %v5342_v61 = vpop.permute.xlu0 %897 }
 0x164   : > { %9638 = vst [vmem:[#allocation171_spill] sm:$0xff] %v5342_v61  ;;  %v5344_v24 = vpop.permute.xlu1 %899 }
 0x165   : > { %9639 = vst [vmem:[#allocation172_spill] sm:$0xff] %v5344_v24  ;;  %v9645_v24 = vld [vmem:[#allocation72_spill] sm:$0xff] }
 0x167   : > { %1055 = vrot.lane.b32.xlu2 %v4844_v29, %s4301_s28 }
 0x169   : > { %1051 = vrot.lane.b32.xlu0 %v9640_v3, %s4301_s28  ;;  %v5352_v36 = vpop.permute.xlu2 %957 }
 0x16a   : > { %1053 = vrot.lane.b32.xlu1 %v9641_v54, %s4301_s28  ;;  %9642 = vst [vmem:[#allocation70_spill] sm:$0xff] %v5352_v36 }
 0x16b   : > { %v5354_v18 = vpop.permute.xlu0 %903 }
 0x16c   : > { %9643 = vst [vmem:[#allocation173_spill] sm:$0xff] %v5354_v18  ;;  %v5356_v62 = vpop.permute.xlu1 %905  ;;  %v9650_v18 = vld [vmem:[#allocation78_spill] sm:$0xff] }
 0x16d   : > { %9644 = vst [vmem:[#allocation174_spill] sm:$0xff] %v5356_v62  ;;  %v9649_v62 = vld [vmem:[#allocation74_spill] sm:$0xff] }
 0x16f   : > { %1061 = vrot.lane.b32.xlu2 %v4866_v55, %s4301_s28 }
 0x171   : > { %1057 = vrot.lane.b32.xlu0 %v9645_v24, %s4301_s28  ;;  %v5364_v61 = vpop.permute.xlu2 %963 }
 0x172   : > { %1059 = vrot.lane.b32.xlu1 %v4863_v1, %s4301_s28  ;;  %9646 = vst [vmem:[#allocation175_spill] sm:$0xff] %v5364_v61 }
 0x173   : > { %v5366_v9 = vpop.permute.xlu0 %909 }
 0x174   : > { %9647 = vst [vmem:[#allocation176_spill] sm:$0xff] %v5366_v9  ;;  %v5368_v54 = vpop.permute.xlu1 %911  ;;  %v9655_v9 = vld [vmem:[#allocation81_spill] sm:$0xff] }
 0x175   : > { %9648 = vst [vmem:[#allocation177_spill] sm:$0xff] %v5368_v54  ;;  %v9654_v54 = vld [vmem:[#allocation77_spill] sm:$0xff] }
 0x177   : > { %1067 = vrot.lane.b32.xlu2 %v4887_v37, %s4301_s28 }
 0x179   : > { %1063 = vrot.lane.b32.xlu0 %v9649_v62, %s4301_s28  ;;  %v5376_v36 = vpop.permute.xlu2 %969 }
 0x17a   : > { %1065 = vrot.lane.b32.xlu1 %v9650_v18, %s4301_s28  ;;  %9651 = vst [vmem:[#allocation178_spill] sm:$0xff] %v5376_v36 }
 0x17b   : > { %v5378_v24 = vpop.permute.xlu0 %915 }
 0x17c   : > { %9652 = vst [vmem:[#allocation179_spill] sm:$0xff] %v5378_v24  ;;  %v5380_v1 = vpop.permute.xlu1 %917  ;;  %v9660_v24 = vld [vmem:[#allocation86_spill] sm:$0xff] }
 0x17d   : > { %9653 = vst [vmem:[#allocation180_spill] sm:$0xff] %v5380_v1  ;;  %v9659_v1 = vld [vmem:[#allocation80_spill] sm:$0xff] }
 0x17f   : > { %1073 = vrot.lane.b32.xlu2 %v4909_v39, %s4301_s28 }
 0x181   : > { %1069 = vrot.lane.b32.xlu0 %v9654_v54, %s4301_s28  ;;  %v5388_v61 = vpop.permute.xlu2 %975 }
 0x182   : > { %1071 = vrot.lane.b32.xlu1 %v9655_v9, %s4301_s28  ;;  %9656 = vst [vmem:[#allocation181_spill] sm:$0xff] %v5388_v61  ;;  %v9664_v61 = vld [vmem:[#allocation85_spill] sm:$0xff] }
 0x183   : > { %v5390_v62 = vpop.permute.xlu0 %953 }
 0x184   : > { %9657 = vst [vmem:[#allocation182_spill] sm:$0xff] %v5390_v62  ;;  %v5392_v18 = vpop.permute.xlu1 %955 }
 0x185   : > { %9658 = vst [vmem:[#allocation183_spill] sm:$0xff] %v5392_v18 }
 0x187   : > { %1079 = vrot.lane.b32.xlu2 %v4934_v43, %s4301_s28 }
 0x189   : > { %1075 = vrot.lane.b32.xlu0 %v9659_v1, %s4301_s28  ;;  %v5400_v36 = vpop.permute.xlu2 %981 }
 0x18a   : > { %1077 = vrot.lane.b32.xlu1 %v9660_v24, %s4301_s28  ;;  %9661 = vst [vmem:[#allocation80_spill] sm:$0xff] %v5400_v36  ;;  %v9668_v36 = vld [vmem:[#allocation90_spill] sm:$0xff] }
 0x18b   : > { %v5402_v54 = vpop.permute.xlu0 %959 }
 0x18c   : > { %9662 = vst [vmem:[#allocation184_spill] sm:$0xff] %v5402_v54  ;;  %v5404_v9 = vpop.permute.xlu1 %961 }
 0x18d   : > { %9663 = vst [vmem:[#allocation185_spill] sm:$0xff] %v5404_v9  ;;  %v9669_v9 = vld [vmem:[#allocation96_spill] sm:$0xff] }
 0x18f   : > { %1085 = vrot.lane.b32.xlu2 %v4960_v59, %s4301_s28 }
 0x191   : > { %1081 = vrot.lane.b32.xlu0 %v9664_v61, %s4301_s28  ;;  %v5412_v18 = vpop.permute.xlu2 %987 }
 0x192   : > { %1083 = vrot.lane.b32.xlu1 %v4957_v33, %s4301_s28  ;;  %9665 = vst [vmem:[#allocation186_spill] sm:$0xff] %v5412_v18 }
 0x193   : > { %v5414_v62 = vpop.permute.xlu0 %965 }
 0x194   : > { %9666 = vst [vmem:[#allocation187_spill] sm:$0xff] %v5414_v62  ;;  %v5416_v24 = vpop.permute.xlu1 %967 }
 0x195   : > { %9667 = vst [vmem:[#allocation188_spill] sm:$0xff] %v5416_v24  ;;  %v9673_v24 = vld [vmem:[#allocation95_spill] sm:$0xff] }
 0x197   : > { %1091 = vrot.lane.b32.xlu2 %v4985_v16, %s4301_s28 }
 0x199   : > { %1087 = vrot.lane.b32.xlu0 %v9668_v36, %s4301_s28  ;;  %v5424_v54 = vpop.permute.xlu2 %993 }
 0x19a   : > { %1089 = vrot.lane.b32.xlu1 %v9669_v9, %s4301_s28  ;;  %9670 = vst [vmem:[#allocation90_spill] sm:$0xff] %v5424_v54  ;;  %v9677_v54 = vld [vmem:[#allocation100_spill] sm:$0xff] }
 0x19b   : > { %v5426_v61 = vpop.permute.xlu0 %971 }
 0x19c   : > { %9671 = vst [vmem:[#allocation189_spill] sm:$0xff] %v5426_v61  ;;  %v5428_v33 = vpop.permute.xlu1 %973  ;;  %v673_v61 = vrot.slane %v5316_v40, 2 }
 0x19d   : > { %9672 = vst [vmem:[#allocation190_spill] sm:$0xff] %v5428_v33  ;;  %v671_v33 = vrot.slane %v5185_v44, 2 }
 0x19f   : > { %1097 = vrot.lane.b32.xlu2 %v5011_v41, %s4301_s28 }
 0x1a1   : > { %1093 = vrot.lane.b32.xlu0 %v9673_v24, %s4301_s28  ;;  %v5436_v18 = vpop.permute.xlu2 %999 }
 0x1a2   : > { %1095 = vrot.lane.b32.xlu1 %v5008_v10, %s4301_s28  ;;  %9674 = vst [vmem:[#allocation191_spill] sm:$0xff] %v5436_v18  ;;  %v670_v18 = vrot.slane %v5180_v25, 2 }
 0x1a3   : > { %v5438_v62 = vpop.permute.xlu0 %977 }
 0x1a4   : > { %9675 = vst [vmem:[#allocation192_spill] sm:$0xff] %v5438_v62  ;;  %v5440_v9 = vpop.permute.xlu1 %979  ;;  %v5461_v24 = vsel %vm587_vm2, %v670_v18, %v671_v33 }
 0x1a5   : > { %9676 = vst [vmem:[#allocation193_spill] sm:$0xff] %v5440_v9 }
 0x1a7   : > { %1103 = vrot.lane.b32.xlu2 %v5036_v27, %s4301_s28  ;;  %v5458_v27 = vsel %vm587_vm2, %v671_v33, %v673_v61 }
 0x1a9   : > { %1099 = vrot.lane.b32.xlu0 %v9677_v54, %s4301_s28  ;;  %v5450_v10 = vpop.permute.xlu2 %1005 }
 0x1aa   : > { %1101 = vrot.lane.b32.xlu1 %v5033_v30, %s4301_s28  ;;  %9678 = vst [vmem:[#allocation100_spill] sm:$0xff] %v5450_v10 }
 0x1ab   : > { %v5453_v62 = vpop.permute.xlu0 %983 }
 0x1ac   : > { %v5455_v9 = vpop.permute.xlu1 %985 }
 0x1ad   : > { %9679 = vst [vmem:[#allocation194_spill] sm:$0xff] %v5455_v9 }
 0x1af   : > { %1109 = vrot.lane.b32.xlu2 %v5458_v27, %s4301_s28 }
 0x1b1   : > { %1105 = vrot.lane.b32.xlu0 %v5030_v11, %s4301_s28  ;;  %v5469_v40 = vpop.permute.xlu2 %1011 }
 0x1b2   : > { %1107 = vrot.lane.b32.xlu1 %v5461_v24, %s4301_s28  ;;  %9680 = vst [vmem:[#allocation195_spill] sm:$0xff] %v5469_v40 }
 0x1b3   : > { %v5471_v10 = vpop.permute.xlu0 %989 }
 0x1b4   : > { %9681 = vst [vmem:[#allocation196_spill] sm:$0xff] %v5471_v10  ;;  %v5473_v9 = vpop.permute.xlu1 %991 }
 0x1b5   : > { %9682 = vst [vmem:[#allocation197_spill] sm:$0xff] %v5473_v9 }
 0x1b7   : > { %1147 = vrot.lane.b32.xlu2 %v4366_v15, %s4302_s29 }
 0x1b9   : > { %1143 = vrot.lane.b32.xlu0 %v4375_v21, %s4302_s29  ;;  %v5481_v33 = vpop.permute.xlu2 %1049 }
 0x1ba   : > { %1145 = vrot.lane.b32.xlu1 %v4372_v20, %s4302_s29 }
 0x1bb   : > { %v5483_v18 = vpop.permute.xlu0 %995 }
 0x1bc   : > { %9683 = vst [vmem:[#allocation198_spill] sm:$0xff] %v5483_v18  ;;  %v5485_v61 = vpop.permute.xlu1 %997 }
 0x1bd   : > { %9684 = vst [vmem:[#allocation199_spill] sm:$0xff] %v5485_v61 }
 0x1bf   : > { %1153 = vrot.lane.b32.xlu2 %v4455_v57, %s4302_s29 }
 0x1c1   : > { %1149 = vrot.lane.b32.xlu0 %v4363_v14, %s4302_s29  ;;  %v5493_v40 = vpop.permute.xlu2 %1055 }
 0x1c2   : > { %1151 = vrot.lane.b32.xlu1 %v4458_v58, %s4302_s29 }
 0x1c3   : > { %v5495_v9 = vpop.permute.xlu0 %1001 }
 0x1c4   : > { %9685 = vst [vmem:[#allocation200_spill] sm:$0xff] %v5495_v9  ;;  %v5497_v10 = vpop.permute.xlu1 %1003 }
 0x1c5   : > { %9686 = vst [vmem:[#allocation201_spill] sm:$0xff] %v5497_v10 }
 0x1c7   : > { %1159 = vrot.lane.b32.xlu2 %v4513_v22, %s4302_s29 }
 0x1c9   : > { %1155 = vrot.lane.b32.xlu0 %v4443_v53, %s4302_s29  ;;  %v5505_v61 = vpop.permute.xlu2 %1061 }
 0x1ca   : > { %1157 = vrot.lane.b32.xlu1 %v4440_v52, %s4302_s29 }
 0x1cb   : > { %v5507_v18 = vpop.permute.xlu0 %1007 }
 0x1cc   : > { %9687 = vst [vmem:[#allocation202_spill] sm:$0xff] %v5507_v18  ;;  %v5509_v57 = vpop.permute.xlu1 %1009 }
 0x1cd   : > { %9688 = vst [vmem:[#allocation203_spill] sm:$0xff] %v5509_v57 }
 0x1cf   : > { %1165 = vrot.lane.b32.xlu2 %v4542_v50, %s4302_s29 }
 0x1d1   : > { %1161 = vrot.lane.b32.xlu0 %v4483_v8, %s4302_s29  ;;  %v5517_v10 = vpop.permute.xlu2 %1067 }
 0x1d2   : > { %1163 = vrot.lane.b32.xlu1 %v4545_v60, %s4302_s29  ;;  %9689 = vst [vmem:[#allocation204_spill] sm:$0xff] %v5517_v10 }
 0x1d3   : > { %v5519_v9 = vpop.permute.xlu0 %1013 }
 0x1d4   : > { %9690 = vst [vmem:[#allocation205_spill] sm:$0xff] %v5519_v9  ;;  %v5521_v22 = vpop.permute.xlu1 %1047 }
 0x1d7   : > { %1171 = vrot.lane.b32.xlu2 %v4605_v4, %s4302_s29 }
 0x1d9   : > { %1167 = vrot.lane.b32.xlu0 %v4539_v48, %s4302_s29  ;;  %v5529_v57 = vpop.permute.xlu2 %1073 }
 0x1da   : > { %1169 = vrot.lane.b32.xlu1 %v4536_v47, %s4302_s29  ;;  %9691 = vst [vmem:[#allocation206_spill] sm:$0xff] %v5529_v57 }
 0x1db   : > { %v5531_v18 = vpop.permute.xlu0 %1051 }
 0x1dc   : > { %v5533_v50 = vpop.permute.xlu1 %1053 }
 0x1df   : > { %1177 = vrot.lane.b32.xlu2 %v4647_v5, %s4302_s29 }
 0x1e1   : > { %1173 = vrot.lane.b32.xlu0 %v4582_v42, %s4302_s29  ;;  %v5541_v9 = vpop.permute.xlu2 %1079 }
 0x1e2   : > { %1175 = vrot.lane.b32.xlu1 %v4638_v2, %s4302_s29 }
 0x1e3   : > { %v5543_v60 = vpop.permute.xlu0 %1057 }
 0x1e4   : > { %v5545_v8 = vpop.permute.xlu1 %1059 }
 0x1e7   : > { %1183 = vrot.lane.b32.xlu2 %v4701_v34, %s4302_s29 }
 0x1e9   : > { %1179 = vrot.lane.b32.xlu0 %v4635_v26, %s4302_s29  ;;  %v5553_v57 = vpop.permute.xlu2 %1085 }
 0x1ea   : > { %1181 = vrot.lane.b32.xlu1 %v4632_v0, %s4302_s29 }
 0x1eb   : > { %v5555_v52 = vpop.permute.xlu0 %1063 }
 0x1ec   : > { %v5557_v10 = vpop.permute.xlu1 %1065 }
 0x1ef   : > { %1189 = vrot.lane.b32.xlu2 %v4740_v17, %s4302_s29 }
 0x1f1   : > { %1185 = vrot.lane.b32.xlu0 %v4678_v35, %s4302_s29  ;;  %v5565_v34 = vpop.permute.xlu2 %1091 }
 0x1f2   : > { %1187 = vrot.lane.b32.xlu1 %v4734_v23, %s4302_s29  ;;  %9692 = vst [vmem:[#allocation207_spill] sm:$0xff] %v5565_v34  ;;  %v9711_v34 = vld [vmem:[#allocation35_spill] sm:$0xff] }
 0x1f3   : > { %v5567_v26 = vpop.permute.xlu0 %1069 }
 0x1f4   : > { %9693 = vst [vmem:[#allocation208_spill] sm:$0xff] %v5567_v26  ;;  %v5569_v0 = vpop.permute.xlu1 %1071  ;;  %v9716_v26 = vld [vmem:[#allocation44_spill] sm:$0xff] }
 0x1f5   : > { %9694 = vst [vmem:[#allocation209_spill] sm:$0xff] %v5569_v0 }
 0x1f7   : > { %1195 = vrot.lane.b32.xlu2 %v4788_v28, %s4302_s29 }
 0x1f9   : > { %1191 = vrot.lane.b32.xlu0 %v4731_v7, %s4302_s29  ;;  %v5577_v17 = vpop.permute.xlu2 %1097 }
 0x1fa   : > { %1193 = vrot.lane.b32.xlu1 %v4728_v63, %s4302_s29  ;;  %9695 = vst [vmem:[#allocation210_spill] sm:$0xff] %v5577_v17 }
 0x1fb   : > { %v5579_v35 = vpop.permute.xlu0 %1075 }
 0x1fc   : > { %9696 = vst [vmem:[#allocation211_spill] sm:$0xff] %v5579_v35  ;;  %v5581_v23 = vpop.permute.xlu1 %1077  ;;  %v9707_v35 = vld [vmem:[#allocation16_spill] sm:$0xff] }
 0x1fd   : > { %9697 = vst [vmem:[#allocation212_spill] sm:$0xff] %v5581_v23  ;;  %v9702_v23 = vld [vmem:[#allocation10_spill] sm:$0xff] }
 0x1ff   : > { %1201 = vrot.lane.b32.xlu2 %v5185_v44, %s4302_s29 }
 0x201   : > { %1197 = vrot.lane.b32.xlu0 %v4774_v13, %s4302_s29  ;;  %v5589_v28 = vpop.permute.xlu2 %1103 }
 0x202   : > { %1199 = vrot.lane.b32.xlu1 %v5180_v25, %s4302_s29  ;;  %9698 = vst [vmem:[#allocation213_spill] sm:$0xff] %v5589_v28  ;;  %v9701_v28 = vld [vmem:[#allocation20_spill] sm:$0xff] }
 0x203   : > { %v5591_v7 = vpop.permute.xlu0 %1081 }
 0x204   : > { %v5593_v63 = vpop.permute.xlu1 %1083 }
 0x207   : > { %1237 = vrot.lane.b32.xlu2 %v9589_v12, %s4303_s30  ;;  %v9703_v12 = vld [vmem:[#allocation18_spill] sm:$0xff] }
 0x209   : > { %1233 = vrot.lane.b32.xlu0 %v4402_v32, %s4303_s30  ;;  %v5601_v44 = vpop.permute.xlu2 %1109 }
 0x20a   : > { %1235 = vrot.lane.b32.xlu1 %v4437_v51, %s4303_s30  ;;  %9699 = vst [vmem:[#allocation214_spill] sm:$0xff] %v5601_v44  ;;  %v9706_v44 = vld [vmem:[#allocation29_spill] sm:$0xff] }
 0x20b   : > { %v5603_v13 = vpop.permute.xlu0 %1087 }
 0x20c   : > { %v5605_v25 = vpop.permute.xlu1 %1089 }
 0x20d   : > { %9700 = vst [vmem:[#allocation215_spill] sm:$0xff] %v5605_v25 }
 0x20f   : > { %1243 = vrot.lane.b32.xlu2 %v9701_v28, %s4303_s30  ;;  %v9708_v28 = vld [vmem:[#allocation26_spill] sm:$0xff] }
 0x211   : > { %1239 = vrot.lane.b32.xlu0 %v9702_v23, %s4303_s30  ;;  %v5613_v17 = vpop.permute.xlu2 %1147 }
 0x212   : > { %1241 = vrot.lane.b32.xlu1 %v9703_v12, %s4303_s30 }
 0x213   : > { %v5615_v32 = vpop.permute.xlu0 %1093 }
 0x214   : > { %9704 = vst [vmem:[#allocation20_spill] sm:$0xff] %v5615_v32  ;;  %v5617_v51 = vpop.permute.xlu1 %1095 }
 0x215   : > { %9705 = vst [vmem:[#allocation10_spill] sm:$0xff] %v5617_v51  ;;  %v9712_v51 = vld [vmem:[#allocation25_spill] sm:$0xff] }
 0x217   : > { %1249 = vrot.lane.b32.xlu2 %v9706_v44, %s4303_s30  ;;  %v9713_v44 = vld [vmem:[#allocation33_spill] sm:$0xff] }
 0x219   : > { %1245 = vrot.lane.b32.xlu0 %v9707_v35, %s4303_s30  ;;  %v5625_v0 = vpop.permute.xlu2 %1153 }
 0x21a   : > { %1247 = vrot.lane.b32.xlu1 %v9708_v28, %s4303_s30 }
 0x21b   : > { %v5627_v23 = vpop.permute.xlu0 %1099 }
 0x21c   : > { %9709 = vst [vmem:[#allocation18_spill] sm:$0xff] %v5627_v23  ;;  %v5629_v12 = vpop.permute.xlu1 %1101 }
 0x21d   : > { %9710 = vst [vmem:[#allocation29_spill] sm:$0xff] %v5629_v12  ;;  %v9717_v12 = vld [vmem:[#allocation32_spill] sm:$0xff] }
 0x21f   : > { %1255 = vrot.lane.b32.xlu2 %v9711_v34, %s4303_s30  ;;  %v9718_v34 = vld [vmem:[#allocation40_spill] sm:$0xff] }
 0x221   : > { %1251 = vrot.lane.b32.xlu0 %v9712_v51, %s4303_s30  ;;  %v5637_v32 = vpop.permute.xlu2 %1159 }
 0x222   : > { %1253 = vrot.lane.b32.xlu1 %v9713_v44, %s4303_s30 }
 0x223   : > { %v5639_v35 = vpop.permute.xlu0 %1105 }
 0x224   : > { %9714 = vst [vmem:[#allocation16_spill] sm:$0xff] %v5639_v35  ;;  %v5641_v28 = vpop.permute.xlu1 %1107 }
 0x225   : > { %9715 = vst [vmem:[#allocation26_spill] sm:$0xff] %v5641_v28  ;;  %v9720_v28 = vld [vmem:[#allocation39_spill] sm:$0xff] }
 0x227   : > { %1261 = vrot.lane.b32.xlu2 %v9716_v26, %s4303_s30  ;;  %v9721_v26 = vld [vmem:[#allocation48_spill] sm:$0xff] }
 0x229   : > { %1257 = vrot.lane.b32.xlu0 %v9717_v12, %s4303_s30  ;;  %v5649_v23 = vpop.permute.xlu2 %1165 }
 0x22a   : > { %1259 = vrot.lane.b32.xlu1 %v9718_v34, %s4303_s30  ;;  %9719 = vst [vmem:[#allocation35_spill] sm:$0xff] %v5649_v23  ;;  %v9723_v23 = vld [vmem:[#allocation47_spill] sm:$0xff] }
 0x22b   : > { %v5651_v51 = vpop.permute.xlu0 %1143 }
 0x22c   : > { %v5653_v44 = vpop.permute.xlu1 %1145 }
 0x22f   : > { %1267 = vrot.lane.b32.xlu2 %v9619_v56, %s4303_s30  ;;  %v9724_v56 = vld [vmem:[#allocation57_spill] sm:$0xff] }
 0x231   : > { %1263 = vrot.lane.b32.xlu0 %v9720_v28, %s4303_s30  ;;  %v5661_v35 = vpop.permute.xlu2 %1171 }
 0x232   : > { %1265 = vrot.lane.b32.xlu1 %v9721_v26, %s4303_s30  ;;  %9722 = vst [vmem:[#allocation25_spill] sm:$0xff] %v5661_v35  ;;  %v9725_v35 = vld [vmem:[#allocation56_spill] sm:$0xff] }
 0x233   : > { %v5663_v12 = vpop.permute.xlu0 %1149 }
 0x234   : > { %v5665_v34 = vpop.permute.xlu1 %1151 }
 0x237   : > { %1273 = vrot.lane.b32.xlu2 %v9624_v19, %s4303_s30  ;;  %v9726_v19 = vld [vmem:[#allocation65_spill] sm:$0xff] }
 0x239   : > { %1269 = vrot.lane.b32.xlu0 %v9723_v23, %s4303_s30  ;;  %v5673_v25 = vpop.permute.xlu2 %1177 }
 0x23a   : > { %1271 = vrot.lane.b32.xlu1 %v9724_v56, %s4303_s30 }
 0x23b   : > { %v5675_v28 = vpop.permute.xlu0 %1155 }
 0x23c   : > { %v5677_v26 = vpop.permute.xlu1 %1157 }
 0x23f   : > { %1279 = vrot.lane.b32.xlu2 %v4780_v46, %s4303_s30  ;;  %v9730_v46 = vld [vmem:[#allocation68_spill] sm:$0xff] }
 0x241   : > { %1275 = vrot.lane.b32.xlu0 %v9725_v35, %s4303_s30  ;;  %v5685_v5 = vpop.permute.xlu2 %1183 }
 0x242   : > { %1277 = vrot.lane.b32.xlu1 %v9726_v19, %s4303_s30  ;;  %9727 = vst [vmem:[#allocation33_spill] sm:$0xff] %v5685_v5  ;;  %v9781_v5 = vld [vmem:[#allocation182_spill] sm:$0xff] }
 0x243   : > { %v5687_v23 = vpop.permute.xlu0 %1161 }
 0x244   : > { %9728 = vst [vmem:[#allocation44_spill] sm:$0xff] %v5687_v23  ;;  %v5689_v56 = vpop.permute.xlu1 %1163  ;;  %v9783_v23 = vld [vmem:[#allocation4_spill] sm:$0xff] }
 0x245   : > { %9729 = vst [vmem:[#allocation32_spill] sm:$0xff] %v5689_v56 }
 0x247   : > { %1285 = vrot.lane.b32.xlu2 %v4805_v6, %s4303_s30 }
 0x249   : > { %1281 = vrot.lane.b32.xlu0 %v4768_v31, %s4303_s30  ;;  %v5697_v53 = vpop.permute.xlu2 %1189 }
 0x24a   : > { %1283 = vrot.lane.b32.xlu1 %v9730_v46, %s4303_s30  ;;  %9731 = vst [vmem:[#allocation40_spill] sm:$0xff] %v5697_v53 }
 0x24b   : > { %v5699_v35 = vpop.permute.xlu0 %1167 }
 0x24c   : > { %9732 = vst [vmem:[#allocation39_spill] sm:$0xff] %v5699_v35  ;;  %v5701_v19 = vpop.permute.xlu1 %1169  ;;  %v9746_v35 = vld [vmem:[#allocation77_spill] sm:$0xff] }
 0x24d   : > { %9733 = vst [vmem:[#allocation48_spill] sm:$0xff] %v5701_v19 }
 0x24f   : > { %1291 = vrot.lane.b32.xlu2 %v5332_v49, %s4303_s30  ;;  %v9736_v49 = vld [vmem:[#allocation71_spill] sm:$0xff] }
 0x251   : > { %1287 = vrot.lane.b32.xlu0 %v4799_v45, %s4303_s30  ;;  %v5709_v6 = vpop.permute.xlu2 %1195 }
 0x252   : > { %1289 = vrot.lane.b32.xlu1 %v5311_v38, %s4303_s30  ;;  %9734 = vst [vmem:[#allocation47_spill] sm:$0xff] %v5709_v6  ;;  %v9738_v6 = vld [vmem:[#allocation72_spill] sm:$0xff] }
 0x253   : > { %v5711_v31 = vpop.permute.xlu0 %1173 }
 0x254   : > { %9735 = vst [vmem:[#allocation57_spill] sm:$0xff] %v5711_v31  ;;  %v5713_v46 = vpop.permute.xlu1 %1175 }
 0x257   : > { %1327 = vrot.lane.b32.xlu2 %v4844_v29, %s4304_s6  ;;  %v9739_v29 = vld [vmem:[#allocation75_spill] sm:$0xff] }
 0x259   : > { %1323 = vrot.lane.b32.xlu0 %v9640_v3, %s4304_s6  ;;  %v5721_v45 = vpop.permute.xlu2 %1201 }
 0x25a   : > { %1325 = vrot.lane.b32.xlu1 %v9736_v49, %s4304_s6  ;;  %9737 = vst [vmem:[#allocation56_spill] sm:$0xff] %v5721_v45  ;;  %v9742_v45 = vld [vmem:[#allocation74_spill] sm:$0xff] }
 0x25b   : > { %v5723_v19 = vpop.permute.xlu0 %1179 }
 0x25c   : > { %v5725_v38 = vpop.permute.xlu1 %1181 }
 0x25f   : > { %1333 = vrot.lane.b32.xlu2 %v4866_v55, %s4304_s6  ;;  %v9743_v55 = vld [vmem:[#allocation78_spill] sm:$0xff] }
 0x261   : > { %1329 = vrot.lane.b32.xlu0 %v9738_v6, %s4304_s6  ;;  %v5735_v3 = vpop.permute.xlu2 %1237 }
 0x262   : > { %1331 = vrot.lane.b32.xlu1 %v9739_v29, %s4304_s6 }
 0x263   : > { %v5733_v31 = vpop.permute.xlu0 %1185 }
 0x264   : > { %9740 = vst [vmem:[#allocation65_spill] sm:$0xff] %v5733_v31  ;;  %v5737_v49 = vpop.permute.xlu1 %1187  ;;  %v9760_v31 = vld [vmem:[#allocation105_spill] sm:$0xff] }
 0x265   : > { %9741 = vst [vmem:[#allocation68_spill] sm:$0xff] %v5737_v49 }
 0x267   : > { %1339 = vrot.lane.b32.xlu2 %v4887_v37, %s4304_s6  ;;  %v9747_v37 = vld [vmem:[#allocation81_spill] sm:$0xff] }
 0x269   : > { %1335 = vrot.lane.b32.xlu0 %v9742_v45, %s4304_s6  ;;  %v5749_v29 = vpop.permute.xlu2 %1243 }
 0x26a   : > { %1337 = vrot.lane.b32.xlu1 %v9743_v55, %s4304_s6 }
 0x26b   : > { %v5745_v53 = vpop.permute.xlu0 %1191 }
 0x26c   : > { %9744 = vst [vmem:[#allocation71_spill] sm:$0xff] %v5745_v53  ;;  %v5747_v6 = vpop.permute.xlu1 %1193 }
 0x26d   : > { %9745 = vst [vmem:[#allocation72_spill] sm:$0xff] %v5747_v6 }
 0x26f   : > { %1345 = vrot.lane.b32.xlu2 %v4909_v39, %s4304_s6  ;;  %v9750_v39 = vld [vmem:[#allocation86_spill] sm:$0xff] }
 0x271   : > { %1341 = vrot.lane.b32.xlu0 %v9746_v35, %s4304_s6  ;;  %v5761_v55 = vpop.permute.xlu2 %1249 }
 0x272   : > { %1343 = vrot.lane.b32.xlu1 %v9747_v37, %s4304_s6  ;;  %v9751_v37 = vld [vmem:[#allocation85_spill] sm:$0xff] }
 0x273   : > { %v5757_v49 = vpop.permute.xlu0 %1197 }
 0x274   : > { %9748 = vst [vmem:[#allocation75_spill] sm:$0xff] %v5757_v49  ;;  %v5759_v45 = vpop.permute.xlu1 %1199 }
 0x275   : > { %9749 = vst [vmem:[#allocation74_spill] sm:$0xff] %v5759_v45 }
 0x277   : > { %1351 = vrot.lane.b32.xlu2 %v4934_v43, %s4304_s6  ;;  %v9753_v43 = vld [vmem:[#allocation91_spill] sm:$0xff] }
 0x279   : > { %1347 = vrot.lane.b32.xlu0 %v9659_v1, %s4304_s6  ;;  %v5777_v45 = vpop.permute.xlu2 %1255 }
 0x27a   : > { %1349 = vrot.lane.b32.xlu1 %v9750_v39, %s4304_s6  ;;  %9752 = vst [vmem:[#allocation78_spill] sm:$0xff] %v5777_v45 }
 0x27b   : > { %v5769_v6 = vpop.permute.xlu0 %1233 }
 0x27c   : > { %v5771_v35 = vpop.permute.xlu1 %1235 }
 0x27f   : > { %1357 = vrot.lane.b32.xlu2 %v4960_v59, %s4304_s6  ;;  %v9754_v59 = vld [vmem:[#allocation96_spill] sm:$0xff] }
 0x281   : > { %1353 = vrot.lane.b32.xlu0 %v9751_v37, %s4304_s6  ;;  %v5793_v37 = vpop.permute.xlu2 %1261 }
 0x282   : > { %1355 = vrot.lane.b32.xlu1 %v9753_v43, %s4304_s6  ;;  %9755 = vst [vmem:[#allocation77_spill] sm:$0xff] %v5793_v37  ;;  %v9756_v43 = vld [vmem:[#allocation95_spill] sm:$0xff] }
 0x283   : > { %v5781_v49 = vpop.permute.xlu0 %1239 }
 0x284   : > { %v5783_v1 = vpop.permute.xlu1 %1241 }
 0x287   : > { %1363 = vrot.lane.b32.xlu2 %v4985_v16, %s4304_s6  ;;  %v9757_v16 = vld [vmem:[#allocation101_spill] sm:$0xff] }
 0x289   : > { %1359 = vrot.lane.b32.xlu0 %v9668_v36, %s4304_s6 }
 0x28a   : > { %1361 = vrot.lane.b32.xlu1 %v9754_v59, %s4304_s6  ;;  %v5807_v59 = vpop.permute.xlu2 %1267 }
 0x28b   : > { %v5791_v39 = vpop.permute.xlu0 %1245 }
 0x28c   : > { %v5795_v53 = vpop.permute.xlu1 %1247 }
 0x28f   : > { %1369 = vrot.lane.b32.xlu2 %v5011_v41, %s4304_s6 }
 0x291   : > { %1365 = vrot.lane.b32.xlu0 %v9756_v43, %s4304_s6 }
 0x292   : > { %1367 = vrot.lane.b32.xlu1 %v9757_v16, %s4304_s6  ;;  %v5819_v16 = vpop.permute.xlu2 %1273 }
 0x293   : > { %v5803_v45 = vpop.permute.xlu0 %1251  ;;  %9763 = vst [vmem:[#allocation96_spill] sm:$0xff] %v5819_v16 }
 0x294   : > { %9758 = vst [vmem:[#allocation81_spill] sm:$0xff] %v5803_v45  ;;  %v5805_v36 = vpop.permute.xlu1 %1253  ;;  %v9774_v45 = vld [vmem:[#allocation83_spill] sm:$0xff] }
 0x295   : > { %9759 = vst [vmem:[#allocation86_spill] sm:$0xff] %v5805_v36 }
 0x297   : > { %1375 = vrot.lane.b32.xlu2 %v9760_v31, %s4304_s6 }
 0x299   : > { %1371 = vrot.lane.b32.xlu0 %v9677_v54, %s4304_s6 }
 0x29a   : > { %1373 = vrot.lane.b32.xlu1 %v5033_v30, %s4304_s6  ;;  %v1677_v30 = vld [vmem:[%s9162_s1 + $0x20] sm:$0xf] }
 0x29b   : > { %v5815_v41 = vpop.permute.xlu0 %1257  ;;  %4182 = vmatpush.msk.msra.mxu0 %vm1779_vm3, %v1677_v30  ;;  %4252 = vmatpush.msk.msra.mxu2 %vm1779_vm3, %v1677_v30  ;;  %v1673_v30 = vld [vmem:[%s9162_s1] sm:$0xff] }
 0x29c   : > { %9761 = vst [vmem:[#allocation85_spill] sm:$0xff] %v5815_v41  ;;  %v5817_v43 = vpop.permute.xlu1 %1259 }
 0x29d   : > { %9762 = vst [vmem:[#allocation91_spill] sm:$0xff] %v5817_v43 }
 0x29f   : > { %1381 = vrot.lane.b32.xlu2 %v5458_v27, %s4304_s6  ;;  %v1676_v27 = vld [vmem:[%s9162_s1 + $0x18] sm:$0xff] }
 0x2a0   : > { %1795 = vmatpush.msra.mxu0 %v1676_v27  ;;  %4253 = vmatpush.msra.mxu2 %v1676_v27 }
 0x2a1   : > { %1377 = vrot.lane.b32.xlu0 %v5030_v11, %s4304_s6  ;;  %v1675_v11 = vld [vmem:[%s9162_s1 + $0x10] sm:$0xff] }
 0x2a2   : > { %1379 = vrot.lane.b32.xlu1 %v5461_v24, %s4304_s6  ;;  %v1674_v24 = vld [vmem:[%s9162_s1 + $0x8] sm:$0xff]  ;;  %1796 = vmatpush.msra.mxu0 %v1675_v11 }
 0x2a3   : > { %v5827_v31 = vpop.permute.xlu0 %1263  ;;  %4254 = vmatpush.msra.mxu2 %v1675_v11 }
 0x2a4   : > { %9764 = vst [vmem:[#allocation95_spill] sm:$0xff] %v5827_v31  ;;  %v5829_v54 = vpop.permute.xlu1 %1265  ;;  %v5845_v31 = vpop.permute.xlu2 %1279  ;;  %1797 = vmatpush.msra.mxu0 %v1674_v24 }
 0x2a5   : > { %9765 = vst [vmem:[#allocation101_spill] sm:$0xff] %v5845_v31  ;;  %4255 = vmatpush.msra.mxu2 %v1674_v24 }
 0x2a6   : > { %1798 = vmatpush.msra.mxu0 %v1673_v30 }
 0x2a7   : > { %4256 = vmatpush.msra.mxu2 %v1673_v30  ;;  %v1414_v30 = vsel %vm1413_vm4, %v4375_v21, %v9774_v45 }
 0x2ab   : > { %v5847_v37 = vpop.permute.xlu0 %1269 }
 0x2ac   : > { %v5849_v43 = vpop.permute.xlu1 %1271  ;;  %v5856_v41 = vpop.permute.xlu2 %1285 }
 0x2ad   : > { %9767 = vst [vmem:[#allocation216_spill] sm:$0xff] %v5856_v41  ;;  %v9775_v41 = vld [vmem:[#allocation122_spill] sm:$0xff] }
 0x2b3   : > { %v5854_v27 = vpop.permute.xlu0 %1275 }
 0x2b4   : > { %9766 = vst [vmem:[#allocation105_spill] sm:$0xff] %v5854_v27  ;;  %v5858_v36 = vpop.permute.xlu1 %1277  ;;  %v5864_v56 = vpop.permute.xlu2 %1291  ;;  %v9777_v27 = vld [vmem:[#allocation69_spill] sm:$0xff] }
 0x2b5   : > { %9768 = vst [vmem:[#allocation217_spill] sm:$0xff] %v5858_v36  ;;  %v1445_v36 = vsel %vm1444_vm5, %v1414_v30, %v9775_v41 }
 0x2b6   : > { %9771 = vst [vmem:[#allocation220_spill] sm:$0xff] %v5864_v56 }
 0x2bb   : > { %v5860_v11 = vpop.permute.xlu0 %1281 }
 0x2bc   : > { %9769 = vst [vmem:[#allocation218_spill] sm:$0xff] %v5860_v11  ;;  %v5862_v31 = vpop.permute.xlu1 %1283  ;;  %v9776_v11 = vld [vmem:[#allocation153_spill] sm:$0xff] }
 0x2bd   : > { %9770 = vst [vmem:[#allocation219_spill] sm:$0xff] %v5862_v31  ;;  %v1476_v31 = vsel %vm1475_vm7, %v1445_v36, %v9776_v11 }
 0x2be   : > { %v1509_v56 = vsel %vm1508_vm6, %v1476_v31, %v9777_v27  ;;  %v9778_v31 = vld [vmem:[#allocation88_spill] sm:$0xff] }
 0x2bf   : > { %v1415_v27 = vsel %vm1413_vm4, %v4372_v20, %v9778_v31 }
 0x2c3   : > { %v5866_v24 = vpop.permute.xlu0 %1287 }
 0x2c4   : > { %9772 = vst [vmem:[#allocation221_spill] sm:$0xff] %v5866_v24  ;;  %v5868_v16 = vpop.permute.xlu1 %1289  ;;  %v1328_v24 = vpop.permute.xlu2 %1327 }
 0x2c5   : > { %9773 = vst [vmem:[#allocation222_spill] sm:$0xff] %v5868_v16  ;;  %v1542_v16 = vsel %vm1541_vm8, %v1509_v56, %v5521_v22  ;;  %v9779_v22 = vld [vmem:[#allocation123_spill] sm:$0xff] }
 0x2c6   : > { %v1575_v21 = vsel %vm1574_vm9, %v1542_v16, %v5651_v51  ;;  %v1446_v56 = vsel %vm1444_vm5, %v1415_v27, %v9779_v22  ;;  %v9780_v51 = vld [vmem:[#allocation154_spill] sm:$0xff]  ;;  %v9782_v22 = vld [vmem:[#allocation84_spill] sm:$0xff] }
 0x2c7   : > { %v1608_v45 = vsel %vm1607_vm10, %v1575_v21, %v5769_v6  ;;  %v1477_v16 = vsel %vm1475_vm7, %v1446_v56, %v9780_v51  ;;  %v1416_v51 = vsel %vm1413_vm4, %v9783_v23, %v9782_v22 }
 0x2c8   : > { %v1510_v6 = vsel %vm1508_vm6, %v1477_v16, %v9781_v5  ;;  %v9784_v5 = vld [vmem:[#allocation112_spill] sm:$0xff] }
 0x2c9   : > { %v1543_v21 = vsel %vm1541_vm8, %v1510_v6, %v5481_v33  ;;  %v1447_v33 = vsel %vm1444_vm5, %v1416_v51, %v9784_v5  ;;  %v9785_v16 = vld [vmem:[#allocation144_spill] sm:$0xff]  ;;  %v9786_v6 = vld [vmem:[#allocation183_spill] sm:$0xff]  ;;  %v9787_v51 = vld [vmem:[#allocation89_spill] sm:$0xff] }
 0x2ca   : > { %v9788_v5 = vld [vmem:[#allocation3_spill] sm:$0xff] }
 0x2cb   : > { %v1324_v41 = vpop.permute.xlu0 %1323 }
 0x2cc   : > { %v1326_v11 = vpop.permute.xlu1 %1325  ;;  %v1641_v30 = vsel %vm1640_vm12, %v1608_v45, %v1324_v41  ;;  %v1576_v45 = vsel %vm1574_vm9, %v1543_v21, %v5653_v44  ;;  %v1334_v41 = vpop.permute.xlu2 %1333  ;;  %v1478_v44 = vsel %vm1475_vm7, %v1447_v33, %v9785_v16  ;;  %v1417_v33 = vsel %vm1413_vm4, %v9788_v5, %v9787_v51  ;;  %v9792_v5 = vld [vmem:[#allocation157_spill] sm:$0xff] }
 0x2cd   : > { %4183 = vmatmul.msk.f32.vlgmr.msra.gmra.mxu0 %vm1682_vm11, %v1641_v30  ;;  %v1609_v20 = vsel %vm1607_vm10, %v1576_v45, %v5771_v35  ;;  %v1511_v21 = vsel %vm1508_vm6, %v1478_v44, %v9786_v6 }
 0x2ce   : > { %v1642_v27 = vsel %vm1640_vm12, %v1609_v20, %v1326_v11  ;;  %v1544_v35 = vsel %vm1541_vm8, %v1511_v21, %v5531_v18  ;;  %v9789_v18 = vld [vmem:[#allocation125_spill] sm:$0xff] }
 0x2cf   : > { %v1577_v11 = vsel %vm1574_vm9, %v1544_v35, %v5613_v17  ;;  %v1448_v16 = vsel %vm1444_vm5, %v1417_v33, %v9789_v18  ;;  %v9790_v17 = vld [vmem:[#allocation156_spill] sm:$0xff]  ;;  %v1480_v33 = vsel %vm1475_vm7, %v1445_v36, %v9792_v5 }
 0x2d0   : > { %v1610_v23 = vsel %vm1607_vm10, %v1577_v11, %v5735_v3  ;;  %v1479_v44 = vsel %vm1475_vm7, %v1448_v16, %v9790_v17  ;;  %v9791_v3 = vld [vmem:[#allocation70_spill] sm:$0xff] }
 0x2d1   : > { %v1643_v22 = vsel %vm1640_vm12, %v1610_v23, %v1328_v24  ;;  %v1512_v6 = vsel %vm1508_vm6, %v1479_v44, %v9791_v3  ;;  %v9794_v44 = vld [vmem:[#allocation87_spill] sm:$0xff] }
 0x2d2   : > { %v1545_v21 = vsel %vm1541_vm8, %v1512_v6, %v5533_v50  ;;  %v9793_v50 = vld [vmem:[#allocation184_spill] sm:$0xff]  ;;  %v1428_v36 = vsel %vm1413_vm4, %v4539_v48, %v9794_v44  ;;  %v9803_v44 = vld [vmem:[#allocation159_spill] sm:$0xff] }
 0x2d3   : > { %v1330_v30 = vpop.permute.xlu0 %1329  ;;  %v1578_v24 = vsel %vm1574_vm9, %v1545_v21, %v5663_v12  ;;  %v1513_v18 = vsel %vm1508_vm6, %v1480_v33, %v9793_v50  ;;  %v9795_v6 = vld [vmem:[#allocation124_spill] sm:$0xff]  ;;  %v9796_v21 = vld [vmem:[#allocation6_spill] sm:$0xff] }
 0x2d4   : > { %v1332_v31 = vpop.permute.xlu1 %1331  ;;  %v5919_v20 = vpop.permute.xlu2 %1339  ;;  %v1611_v35 = vsel %vm1607_vm10, %v1578_v24, %v5781_v49  ;;  %v1546_v12 = vsel %vm1541_vm8, %v1513_v18, %v5493_v40  ;;  %v1459_v40 = vsel %vm1444_vm5, %v1428_v36, %v9795_v6  ;;  %v9797_v24 = vld [vmem:[#allocation167_spill] sm:$0xff] }
 0x2d5   : > { %4184 = vmatmul.msk.f32.gmra.mxu0 %vm1682_vm11, %v1642_v27  ;;  %v1579_v49 = vsel %vm1574_vm9, %v1546_v12, %v5665_v34  ;;  %v1481_v34 = vsel %vm1475_vm7, %v1446_v56, %v9796_v21 }
 0x2d6   : > { %v1612_v16 = vsel %vm1607_vm10, %v1579_v49, %v5783_v1  ;;  %v1492_v1 = vsel %vm1475_vm7, %v1459_v40, %v9797_v24  ;;  %v9805_v40 = vld [vmem:[#allocation175_spill] sm:$0xff] }
 0x2d7   : > { %v1645_v17 = vsel %vm1640_vm12, %v1612_v16, %v1332_v31  ;;  %v1525_v5 = vsel %vm1508_vm6, %v1492_v1, %v5453_v62  ;;  %v9799_v16 = vld [vmem:[#allocation73_spill] sm:$0xff] }
 0x2d8   : > { %v1558_v33 = vsel %vm1541_vm8, %v1525_v5, %v5541_v9  ;;  %v9800_v9 = vld [vmem:[#allocation107_spill] sm:$0xff] }
 0x2d9   : > { %v1591_v50 = vsel %vm1574_vm9, %v1558_v33, %v5713_v46  ;;  %v1429_v46 = vsel %vm1413_vm4, %v4536_v47, %v9800_v9  ;;  %v9806_v47 = vld [vmem:[#allocation194_spill] sm:$0xff] }
 0x2da   : > { %v1624_v12 = vsel %vm1607_vm10, %v1591_v50, %v5829_v54  ;;  %v9802_v54 = vld [vmem:[#allocation139_spill] sm:$0xff]  ;;  %v9814_v9 = vld [vmem:[#allocation186_spill] sm:$0xff] }
 0x2db   : > { %v1336_v45 = vpop.permute.xlu0 %1335 }
 0x2dc   : > { %v5921_v27 = vpop.permute.xlu1 %1337  ;;  %v5946_v51 = vpop.permute.xlu2 %1345 }
 0x2dd   : > { %4185 = vmatmul.msk.f32.gmra.mxu0 %vm1682_vm11, %v1643_v22  ;;  %v1644_v22 = vsel %vm1640_vm12, %v1611_v35, %v1330_v30  ;;  %v9798_v35 = vld [vmem:[#allocation185_spill] sm:$0xff] }
 0x2de   : > { %v1514_v31 = vsel %vm1508_vm6, %v1481_v34, %v9798_v35 }
 0x2df   : > { %v1547_v48 = vsel %vm1541_vm8, %v1514_v31, %v5543_v60  ;;  %v1418_v60 = vsel %vm1413_vm4, %v4366_v15, %v9799_v16  ;;  %v9804_v15 = vld [vmem:[#allocation158_spill] sm:$0xff] }
 0x2e0   : > { %v1580_v56 = vsel %vm1574_vm9, %v1547_v48, %v5625_v0 }
 0x2e1   : > { %v1613_v18 = vsel %vm1607_vm10, %v1580_v56, %v5749_v29 }
 0x2e2   : > { %v1646_v62 = vsel %vm1640_vm12, %v1613_v18, %v1334_v41  ;;  %v1460_v41 = vsel %vm1444_vm5, %v1429_v46, %v9802_v54  ;;  %v9807_v18 = vld [vmem:[#allocation76_spill] sm:$0xff] }
 0x2e3   : > { %v5940_v11 = vpop.permute.xlu0 %1341  ;;  %v1493_v6 = vsel %vm1475_vm7, %v1460_v41, %v9804_v15 }
 0x2e4   : > { %v5942_v23 = vpop.permute.xlu1 %1343  ;;  %v1526_v24 = vsel %vm1508_vm6, %v1493_v6, %v9806_v47  ;;  %v9816_v6 = vld [vmem:[#allocation92_spill] sm:$0xff] }
 0x2e5   : > { %4186 = vmatmul.msk.f32.gmra.mxu0 %vm1682_vm11, %v1644_v22  ;;  %v5975_v22 = vpop.permute.xlu2 %1351  ;;  %v1559_v35 = vsel %vm1541_vm8, %v1526_v24, %v5591_v7 }
 0x2e6   : > { %v1592_v48 = vsel %vm1574_vm9, %v1559_v35, %v5673_v25 }
 0x2e7   : > { %v1625_v56 = vsel %vm1607_vm10, %v1592_v48, %v5807_v59  ;;  %v9810_v59 = vld [vmem:[#allocation140_spill] sm:$0xff] }
 0x2eb   : > { %v5965_v3 = vpop.permute.xlu0 %1347 }
 0x2ec   : > { %v5958_v30 = vpop.permute.xlu1 %1349 }
 0x2ed   : > { %4187 = vmatmul.msk.f32.gmra.mxu0 %vm1682_vm11, %v1645_v17  ;;  %v9801_v17 = vld [vmem:[#allocation126_spill] sm:$0xff]  ;;  %v1358_v5 = vpop.permute.xlu2 %1357 }
 0x2ee   : > { %v1449_v29 = vsel %vm1444_vm5, %v1418_v60, %v9801_v17  ;;  %v1658_v7 = vsel %vm1640_vm12, %v1625_v56, %v1358_v5  ;;  %v9813_v60 = vld [vmem:[#allocation187_spill] sm:$0xff] }
 0x2ef   : > { %v1482_v36 = vsel %vm1475_vm7, %v1449_v29, %v9803_v44 }
 0x2f0   : > { %v1515_v21 = vsel %vm1508_vm6, %v1482_v36, %v9805_v40  ;;  %v9817_v40 = vld [vmem:[#allocation128_spill] sm:$0xff] }
 0x2f1   : > { %v1548_v1 = vsel %vm1541_vm8, %v1515_v21, %v5545_v8  ;;  %v1419_v8 = vsel %vm1413_vm4, %v4363_v14, %v9807_v18  ;;  %v9812_v14 = vld [vmem:[#allocation169_spill] sm:$0xff] }
 0x2f2   : > { %v1581_v31 = vsel %vm1574_vm9, %v1548_v1, %v5675_v28  ;;  %v9808_v28 = vld [vmem:[#allocation108_spill] sm:$0xff]  ;;  %v9819_v21 = vld [vmem:[#allocation149_spill] sm:$0xff] }
 0x2f3   : > { %v6011_v34 = vpop.permute.xlu0 %1353  ;;  %v1614_v33 = vsel %vm1607_vm10, %v1581_v31, %v5791_v39  ;;  %v1430_v25 = vsel %vm1413_vm4, %v4605_v4, %v9808_v28  ;;  %v9821_v1 = vld [vmem:[#allocation188_spill] sm:$0xff]  ;;  %v9824_v28 = vld [vmem:[#allocation15_spill] sm:$0xff] }
 0x2f4   : > { %v1356_v49 = vpop.permute.xlu1 %1355  ;;  %v1647_v50 = vsel %vm1640_vm12, %v1614_v33, %v1336_v45  ;;  %v1461_v45 = vsel %vm1444_vm5, %v1430_v25, %v9810_v59  ;;  %v9822_v31 = vld [vmem:[#allocation196_spill] sm:$0xff]  ;;  %v9825_v25 = vld [vmem:[#allocation110_spill] sm:$0xff] }
 0x2f5   : > { %4188 = vmatmul.msk.f32.gmra.mxu0 %vm1682_vm11, %v1646_v62  ;;  %v1657_v0 = vsel %vm1640_vm12, %v1624_v12, %v1356_v49  ;;  %v9809_v12 = vld [vmem:[#allocation115_spill] sm:$0xff]  ;;  %v9811_v49 = vld [vmem:[#allocation160_spill] sm:$0xff]  ;;  %v1494_v16 = vsel %vm1475_vm7, %v1461_v45, %v9812_v14 }
 0x2f6   : > { %4199 = vmatmul.msk.f32.vlgmr.msra.gmra.mxu2 %vm1682_vm11, %v1657_v0  ;;  %v1450_v39 = vsel %vm1444_vm5, %v1419_v8, %v9809_v12  ;;  %v1527_v4 = vsel %vm1508_vm6, %v1494_v16, %v9814_v9  ;;  %v9826_v12 = vld [vmem:[#allocation129_spill] sm:$0xff]  ;;  %v9829_v45 = vld [vmem:[#allocation51_spill] sm:$0xff]  ;;  %v9832_v9 = vld [vmem:[#allocation44_spill] sm:$0xff] }
 0x2f7   : > { %v1483_v62 = vsel %vm1475_vm7, %v1450_v39, %v9811_v49  ;;  %v1560_v17 = vsel %vm1541_vm8, %v1527_v4, %v5593_v63  ;;  %v9828_v39 = vld [vmem:[#allocation161_spill] sm:$0xff] }
 0x2f8   : > { %v1516_v0 = vsel %vm1508_vm6, %v1483_v62, %v9813_v60  ;;  %v1593_v41 = vsel %vm1574_vm9, %v1560_v17, %v5723_v19  ;;  %v1431_v19 = vsel %vm1413_vm4, %v4582_v42, %v9816_v6  ;;  %v9830_v62 = vld [vmem:[#allocation178_spill] sm:$0xff]  ;;  %v9831_v16 = vld [vmem:[#allocation197_spill] sm:$0xff] }
 0x2f9   : > { %v1549_v46 = vsel %vm1541_vm8, %v1516_v0, %v5505_v61  ;;  %v1626_v36 = vsel %vm1607_vm10, %v1593_v41, %v5847_v37  ;;  %v9815_v61 = vld [vmem:[#allocation93_spill] sm:$0xff]  ;;  %v9818_v37 = vld [vmem:[#allocation127_spill] sm:$0xff] }
 0x2fa   : > { %v1582_v29 = vsel %vm1574_vm9, %v1549_v46, %v5677_v26  ;;  %v1420_v63 = vsel %vm1413_vm4, %v4458_v58, %v9815_v61  ;;  %v9820_v58 = vld [vmem:[#allocation170_spill] sm:$0xff]  ;;  %v1364_v46 = vpop.permute.xlu2 %1363  ;;  %v9833_v17 = vld [vmem:[#allocation33_spill] sm:$0xff]  ;;  %v9837_v61 = vld [vmem:[#allocation12_spill] sm:$0xff] }
 0x2fb   : > { %v1360_v54 = vpop.permute.xlu0 %1359  ;;  %v1615_v44 = vsel %vm1607_vm10, %v1582_v29, %v5795_v53  ;;  %v1451_v53 = vsel %vm1444_vm5, %v1420_v63, %v9817_v40  ;;  %v9839_v6 = vld [vmem:[#allocation45_spill] sm:$0xff]  ;;  %v9840_v40 = vld [vmem:[#allocation118_spill] sm:$0xff] }
 0x2fc   : > { %v1648_v15 = vsel %vm1640_vm12, %v1615_v44, %v5921_v27  ;;  %v1659_v26 = vsel %vm1640_vm12, %v1626_v36, %v1360_v54  ;;  %v1462_v27 = vsel %vm1444_vm5, %v1431_v19, %v9818_v37  ;;  %v1484_v47 = vsel %vm1475_vm7, %v1451_v53, %v9819_v21  ;;  %v1362_v56 = vpop.permute.xlu1 %1361  ;;  %v9834_v54 = vld [vmem:[#allocation81_spill] sm:$0xff]  ;;  %v9835_v44 = vld [vmem:[#allocation96_spill] sm:$0xff]  ;;  %v9841_v37 = vld [vmem:[#allocation143_spill] sm:$0xff] }
 0x2fd   : > { %4189 = vmatmul.msk.f32.gmra.mxu0 %vm1682_vm11, %v1647_v50  ;;  %v1495_v24 = vsel %vm1475_vm7, %v1462_v27, %v9820_v58  ;;  %v1517_v35 = vsel %vm1508_vm6, %v1484_v47, %v9821_v1  ;;  %v9842_v27 = vld [vmem:[#allocation162_spill] sm:$0xff]  ;;  %v9843_v47 = vld [vmem:[#allocation171_spill] sm:$0xff] }
 0x2fe   : > { %4200 = vmatmul.msk.f32.gmra.mxu2 %vm1682_vm11, %v1658_v7  ;;  %v1528_v42 = vsel %vm1508_vm6, %v1495_v24, %v9822_v31  ;;  %v1550_v5 = vsel %vm1541_vm8, %v1517_v35, %v5555_v52  ;;  %v9823_v52 = vld [vmem:[#allocation94_spill] sm:$0xff]  ;;  %v9844_v24 = vld [vmem:[#allocation189_spill] sm:$0xff] }
 0x2ff   : > { %v1561_v48 = vsel %vm1541_vm8, %v1528_v42, %v5553_v57  ;;  %v1583_v33 = vsel %vm1574_vm9, %v1550_v5, %v5637_v32  ;;  %v1421_v57 = vsel %vm1413_vm4, %v9824_v28, %v9823_v52  ;;  %v9845_v35 = vld [vmem:[#allocation90_spill] sm:$0xff]  ;;  %v9846_v42 = vld [vmem:[#allocation204_spill] sm:$0xff] }
 0x300   : > { %v1594_v50 = vsel %vm1574_vm9, %v1561_v48, %v5725_v38  ;;  %v1616_v18 = vsel %vm1607_vm10, %v1583_v33, %v5761_v55  ;;  %v1432_v38 = vsel %vm1413_vm4, %v4638_v2, %v9825_v25  ;;  %v1452_v55 = vsel %vm1444_vm5, %v1421_v57, %v9826_v12  ;;  %v9847_v48 = vld [vmem:[#allocation215_spill] sm:$0xff]  ;;  %v9850_v52 = vld [vmem:[#allocation86_spill] sm:$0xff]  ;;  %v9851_v57 = vld [vmem:[#allocation105_spill] sm:$0xff] }
 0x301   : > { %v1627_v8 = vsel %vm1607_vm10, %v1594_v50, %v5849_v43  ;;  %v1649_v7 = vsel %vm1640_vm12, %v1616_v18, %v5919_v20  ;;  %v9827_v43 = vld [vmem:[#allocation142_spill] sm:$0xff]  ;;  %v1485_v59 = vsel %vm1475_vm7, %v1452_v55, %v9828_v39  ;;  %v9853_v12 = vld [vmem:[#allocation11_spill] sm:$0xff] }
 0x302   : > { %v1660_v32 = vsel %vm1640_vm12, %v1627_v8, %v1362_v56  ;;  %v1463_v20 = vsel %vm1444_vm5, %v1432_v38, %v9827_v43  ;;  %v1518_v14 = vsel %vm1508_vm6, %v1485_v59, %v9830_v62  ;;  %v9848_v56 = vld [vmem:[#allocation32_spill] sm:$0xff]  ;;  %v9849_v8 = vld [vmem:[#allocation65_spill] sm:$0xff]  ;;  %v9852_v38 = vld [vmem:[#allocation98_spill] sm:$0xff] }
 0x303   : > { %v1496_v49 = vsel %vm1475_vm7, %v1463_v20, %v9829_v45  ;;  %v1551_v60 = vsel %vm1541_vm8, %v1518_v14, %v5557_v10  ;;  %v9836_v10 = vld [vmem:[#allocation79_spill] sm:$0xff]  ;;  %v1366_v18 = vpop.permute.xlu0 %1365  ;;  %v1423_v55 = vsel %vm1413_vm4, %v9853_v12, %v9852_v38  ;;  %v9854_v20 = vld [vmem:[#allocation97_spill] sm:$0xff]  ;;  %v9855_v39 = vld [vmem:[#allocation42_spill] sm:$0xff] }
 0x304   : > { %v1529_v2 = vsel %vm1508_vm6, %v1496_v49, %v9831_v16  ;;  %v1584_v4 = vsel %vm1574_vm9, %v1551_v60, %v9832_v9  ;;  %v1434_v59 = vsel %vm1413_vm4, %v9855_v39, %v9854_v20  ;;  %v9856_v45 = vld [vmem:[#allocation131_spill] sm:$0xff]  ;;  %v9857_v62 = vld [vmem:[#allocation130_spill] sm:$0xff]  ;;  %v9858_v14 = vld [vmem:[#allocation152_spill] sm:$0xff] }
 0x305   : > { %4190 = vmatmul.msk.f32.gmra.mxu0 %vm1682_vm11, %v1648_v15  ;;  %v1562_v0 = vsel %vm1541_vm8, %v1529_v2, %v5603_v13  ;;  %v1617_v41 = vsel %vm1607_vm10, %v1584_v4, %v9834_v54  ;;  %v1422_v13 = vsel %vm1413_vm4, %v9837_v61, %v9836_v10  ;;  %v1454_v49 = vsel %vm1444_vm5, %v1423_v55, %v9856_v45  ;;  %v9859_v2 = vld [vmem:[#allocation172_spill] sm:$0xff]  ;;  %v9861_v4 = vld [vmem:[#allocation198_spill] sm:$0xff]  ;;  %v9863_v54 = vld [vmem:[#allocation207_spill] sm:$0xff] }
 0x306   : > { %4201 = vmatmul.msk.f32.gmra.mxu2 %vm1682_vm11, %v1659_v26  ;;  %v1595_v29 = vsel %vm1574_vm9, %v1562_v0, %v9833_v17  ;;  %v1650_v15 = vsel %vm1640_vm12, %v1617_v41, %v5940_v11  ;;  %v9838_v26 = vld [vmem:[#allocation111_spill] sm:$0xff]  ;;  %v1453_v53 = vsel %vm1444_vm5, %v1422_v13, %v9840_v40  ;;  %v1487_v16 = vsel %vm1475_vm7, %v1454_v49, %v9858_v14  ;;  %v9860_v0 = vld [vmem:[#allocation190_spill] sm:$0xff]  ;;  %v9862_v17 = vld [vmem:[#allocation208_spill] sm:$0xff] }
 0x307   : > { %v1628_v36 = vsel %vm1607_vm10, %v1595_v29, %v9835_v44  ;;  %v1433_v19 = vsel %vm1413_vm4, %v9839_v6, %v9838_v26  ;;  %v1486_v21 = vsel %vm1475_vm7, %v1453_v53, %v9842_v27  ;;  %v1520_v9 = vsel %vm1508_vm6, %v1487_v16, %v9860_v0  ;;  %v9864_v44 = vld [vmem:[#allocation35_spill] sm:$0xff]  ;;  %v9865_v10 = vld [vmem:[#allocation68_spill] sm:$0xff]  ;;  %v9866_v13 = vld [vmem:[#allocation78_spill] sm:$0xff] }
 0x308   : > { %v1661_v63 = vsel %vm1640_vm12, %v1628_v36, %v1364_v46  ;;  %v1464_v11 = vsel %vm1444_vm5, %v1433_v19, %v9841_v37  ;;  %v1519_v1 = vsel %vm1508_vm6, %v1486_v21, %v9844_v24  ;;  %v1553_v29 = vsel %vm1541_vm8, %v1520_v9, %v9862_v17  ;;  %v9867_v26 = vld [vmem:[#allocation217_spill] sm:$0xff]  ;;  %v9868_v40 = vld [vmem:[#allocation99_spill] sm:$0xff]  ;;  %v9869_v53 = vld [vmem:[#allocation24_spill] sm:$0xff] }
 0x309   : > { %v1497_v58 = vsel %vm1475_vm7, %v1464_v11, %v9843_v47  ;;  %v1552_v5 = vsel %vm1541_vm8, %v1519_v1, %v9846_v42  ;;  %v1586_v36 = vsel %vm1574_vm9, %v1553_v29, %v9864_v44  ;;  %v1424_v37 = vsel %vm1413_vm4, %v9869_v53, %v9868_v40  ;;  %v9870_v27 = vld [vmem:[#allocation113_spill] sm:$0xff]  ;;  %v9887_v14 = vld [vmem:[#allocation54_spill] sm:$0xff]  ;;  %v9890_v9 = vld [vmem:[#allocation164_spill] sm:$0xff] }
 0x30a   : > { %v1530_v31 = vsel %vm1508_vm6, %v1497_v58, %v9845_v35  ;;  %v1585_v50 = vsel %vm1574_vm9, %v1552_v5, %v9848_v56  ;;  %v9871_v21 = vld [vmem:[#allocation41_spill] sm:$0xff]  ;;  %v9872_v58 = vld [vmem:[#allocation132_spill] sm:$0xff]  ;;  %v9874_v35 = vld [vmem:[#allocation163_spill] sm:$0xff] }
 0x30b   : > { %v1563_v33 = vsel %vm1541_vm8, %v1530_v31, %v9847_v48  ;;  %v1618_v28 = vsel %vm1607_vm10, %v1585_v50, %v9850_v52  ;;  %v1435_v47 = vsel %vm1413_vm4, %v9871_v21, %v9870_v27  ;;  %v1455_v24 = vsel %vm1444_vm5, %v1424_v37, %v9872_v58  ;;  %v9873_v1 = vld [vmem:[#allocation145_spill] sm:$0xff]  ;;  %v9877_v56 = vld [vmem:[#allocation199_spill] sm:$0xff]  ;;  %v9889_v0 = vld [vmem:[#allocation146_spill] sm:$0xff] }
 0x30c   : > { %v1651_v25 = vsel %vm1640_vm12, %v1618_v28, %v5942_v23  ;;  %v1465_v23 = vsel %vm1444_vm5, %v1434_v59, %v9857_v62  ;;  %v1488_v31 = vsel %vm1475_vm7, %v1455_v24, %v9874_v35  ;;  %v9875_v42 = vld [vmem:[#allocation61_spill] sm:$0xff]  ;;  %v9880_v28 = vld [vmem:[#allocation39_spill] sm:$0xff]  ;;  %v9884_v59 = vld [vmem:[#allocation82_spill] sm:$0xff] }
 0x30d   : > { %4191 = vmatmul.msk.f32.gmra.mxu0 %vm1682_vm11, %v1649_v7  ;;  %v1596_v7 = vsel %vm1574_vm9, %v1563_v33, %v9849_v8  ;;  %v1498_v60 = vsel %vm1475_vm7, %v1465_v23, %v9859_v2  ;;  %v9876_v48 = vld [vmem:[#allocation181_spill] sm:$0xff]  ;;  %v9886_v23 = vld [vmem:[#allocation114_spill] sm:$0xff]  ;;  %v9892_v29 = vld [vmem:[#allocation192_spill] sm:$0xff] }
 0x30e   : > { %4202 = vmatmul.msk.f32.gmra.mxu2 %vm1682_vm11, %v1660_v32  ;;  %v1629_v32 = vsel %vm1607_vm10, %v1596_v7, %v9851_v57  ;;  %v1531_v46 = vsel %vm1508_vm6, %v1498_v60, %v9861_v4  ;;  %v1521_v33 = vsel %vm1508_vm6, %v1488_v31, %v9876_v48  ;;  %v9879_v7 = vld [vmem:[#allocation20_spill] sm:$0xff]  ;;  %v9882_v12 = vld [vmem:[#allocation85_spill] sm:$0xff]  ;;  %v1436_v16 = vsel %vm1413_vm4, %v9887_v14, %v9886_v23  ;;  %v9898_v40 = vld [vmem:[#allocation91_spill] sm:$0xff] }
 0x30f   : > { %v1662_v43 = vsel %vm1640_vm12, %v1629_v32, %v1366_v18  ;;  %v1564_v41 = vsel %vm1541_vm8, %v1531_v46, %v9863_v54  ;;  %v9878_v18 = vld [vmem:[#allocation209_spill] sm:$0xff]  ;;  %v1370_v32 = vpop.permute.xlu2 %1369  ;;  %v9899_v37 = vld [vmem:[#allocation218_spill] sm:$0xff]  ;;  %v9900_v21 = vld [vmem:[#allocation103_spill] sm:$0xff] }
 0x310   : > { %v1597_v61 = vsel %vm1574_vm9, %v1564_v41, %v9865_v10  ;;  %v1554_v8 = vsel %vm1541_vm8, %v1521_v33, %v9878_v18  ;;  %v9885_v45 = vld [vmem:[#allocation17_spill] sm:$0xff]  ;;  %v9893_v41 = vld [vmem:[#allocation191_spill] sm:$0xff]  ;;  %v9895_v10 = vld [vmem:[#allocation10_spill] sm:$0xff] }
 0x311   : > { %v1630_v6 = vsel %vm1607_vm10, %v1597_v61, %v9867_v26  ;;  %v1587_v57 = vsel %vm1574_vm9, %v1554_v8, %v9880_v28  ;;  %v1425_v49 = vsel %vm1413_vm4, %v9885_v45, %v9884_v59  ;;  %v9888_v2 = vld [vmem:[#allocation121_spill] sm:$0xff]  ;;  %v1372_v26 = vpop.permute.xlu0 %1371  ;;  %v9904_v31 = vld [vmem:[#allocation134_spill] sm:$0xff]  ;;  %v9906_v48 = vld [vmem:[#allocation155_spill] sm:$0xff] }
 0x312   : > { %v1620_v55 = vsel %vm1607_vm10, %v1587_v57, %v9882_v12  ;;  %v1456_v60 = vsel %vm1444_vm5, %v1425_v49, %v9888_v2  ;;  %v9891_v46 = vld [vmem:[#allocation173_spill] sm:$0xff]  ;;  %v9910_v28 = vld [vmem:[#allocation211_spill] sm:$0xff]  ;;  %v9916_v23 = vld [vmem:[#allocation104_spill] sm:$0xff] }
 0x313   : > { %v1653_v39 = vsel %vm1640_vm12, %v1620_v55, %v5965_v3  ;;  %v1467_v3 = vsel %vm1444_vm5, %v1436_v16, %v9889_v0  ;;  %v1489_v4 = vsel %vm1475_vm7, %v1456_v60, %v9890_v9  ;;  %v9908_v18 = vld [vmem:[#allocation193_spill] sm:$0xff]  ;;  %v9915_v45 = vld [vmem:[#allocation219_spill] sm:$0xff]  ;;  %v9918_v60 = vld [vmem:[#allocation116_spill] sm:$0xff] }
 0x314   : > { %v1500_v17 = vsel %vm1475_vm7, %v1467_v3, %v9891_v46  ;;  %v1522_v54 = vsel %vm1508_vm6, %v1489_v4, %v9892_v29  ;;  %v9917_v14 = vld [vmem:[#allocation27_spill] sm:$0xff]  ;;  %v9919_v0 = vld [vmem:[#allocation60_spill] sm:$0xff] }
 0x315   : > { %4192 = vmatmul.msk.f32.gmra.mxu0 %vm1682_vm11, %v1650_v15  ;;  %v1368_v15 = vpop.permute.xlu1 %1367  ;;  %v1533_v44 = vsel %vm1508_vm6, %v1500_v17, %v9893_v41  ;;  %v1427_v16 = vsel %vm1413_vm4, %v9917_v14, %v9916_v23  ;;  %v1438_v3 = vsel %vm1413_vm4, %v9919_v0, %v9918_v60  ;;  %v9920_v9 = vld [vmem:[#allocation135_spill] sm:$0xff]  ;;  %v9922_v17 = vld [vmem:[#allocation166_spill] sm:$0xff] }
 0x316   : > { %4203 = vmatmul.msk.f32.gmra.mxu2 %vm1682_vm11, %v1661_v63  ;;  %v1619_v63 = vsel %vm1607_vm10, %v1586_v36, %v9866_v13  ;;  %v1663_v11 = vsel %vm1640_vm12, %v1630_v6, %v1368_v15  ;;  %v9894_v36 = vld [vmem:[#allocation206_spill] sm:$0xff]  ;;  %v1566_v61 = vsel %vm1541_vm8, %v1533_v44, %v9895_v10  ;;  %v9896_v13 = vld [vmem:[#allocation48_spill] sm:$0xff]  ;;  %v9897_v6 = vld [vmem:[#allocation71_spill] sm:$0xff]  ;;  %v1458_v4 = vsel %vm1444_vm5, %v1427_v16, %v9920_v9 }
 0x317   : > { %v1652_v19 = vsel %vm1640_vm12, %v1619_v63, %v5946_v51  ;;  %v1466_v51 = vsel %vm1444_vm5, %v1435_v47, %v9873_v1  ;;  %v1555_v15 = vsel %vm1541_vm8, %v1522_v54, %v9894_v36  ;;  %v9901_v47 = vld [vmem:[#allocation28_spill] sm:$0xff]  ;;  %v9902_v1 = vld [vmem:[#allocation102_spill] sm:$0xff]  ;;  %v9921_v46 = vld [vmem:[#allocation147_spill] sm:$0xff]  ;;  %v1491_v29 = vsel %vm1475_vm7, %v1458_v4, %v9922_v17 }
 0x318   : > { %v1499_v5 = vsel %vm1475_vm7, %v1466_v51, %v9875_v42  ;;  %v1588_v63 = vsel %vm1574_vm9, %v1555_v15, %v9896_v13  ;;  %v1426_v58 = vsel %vm1413_vm4, %v9901_v47, %v9900_v21  ;;  %v9903_v51 = vld [vmem:[#allocation49_spill] sm:$0xff]  ;;  %v9924_v44 = vld [vmem:[#allocation80_spill] sm:$0xff]  ;;  %v9946_v14 = vld [vmem:[#allocation74_spill] sm:$0xff] }
 0x319   : > { %v1532_v50 = vsel %vm1508_vm6, %v1499_v5, %v9877_v56  ;;  %v1621_v53 = vsel %vm1607_vm10, %v1588_v63, %v9898_v40  ;;  %v1437_v35 = vsel %vm1413_vm4, %v9903_v51, %v9902_v1  ;;  %v1457_v42 = vsel %vm1444_vm5, %v1426_v58, %v9904_v31  ;;  %v9905_v5 = vld [vmem:[#allocation133_spill] sm:$0xff]  ;;  %v9907_v56 = vld [vmem:[#allocation174_spill] sm:$0xff]  ;;  %v1376_v40 = vpop.permute.xlu2 %1375  ;;  %v9931_v21 = vld [vmem:[#allocation216_spill] sm:$0xff] }
 0x31a   : > { %v1565_v52 = vsel %vm1541_vm8, %v1532_v50, %v9879_v7  ;;  %v1654_v27 = vsel %vm1640_vm12, %v1621_v53, %v5958_v30  ;;  %v1468_v30 = vsel %vm1444_vm5, %v1437_v35, %v9905_v5  ;;  %v1490_v33 = vsel %vm1475_vm7, %v1457_v42, %v9906_v48  ;;  %v9909_v7 = vld [vmem:[#allocation200_spill] sm:$0xff]  ;;  %v9923_v54 = vld [vmem:[#allocation165_spill] sm:$0xff]  ;;  %v9927_v63 = vld [vmem:[#allocation18_spill] sm:$0xff] }
 0x31b   : > { %v1501_v50 = vsel %vm1475_vm7, %v1468_v30, %v9907_v56  ;;  %v1523_v8 = vsel %vm1508_vm6, %v1490_v33, %v9908_v18  ;;  %v1524_v36 = vsel %vm1508_vm6, %v1491_v29, %v9924_v44  ;;  %v9925_v15 = vld [vmem:[#allocation201_spill] sm:$0xff]  ;;  %v9929_v53 = vld [vmem:[#allocation47_spill] sm:$0xff]  ;;  %v9933_v51 = vld [vmem:[#allocation62_spill] sm:$0xff] }
 0x31c   : > { %v1556_v57 = vsel %vm1541_vm8, %v1523_v8, %v9910_v28  ;;  %v9932_v1 = vld [vmem:[#allocation117_spill] sm:$0xff]  ;;  %v9934_v31 = vld [vmem:[#allocation148_spill] sm:$0xff]  ;;  %v9938_v8 = vld [vmem:[#allocation75_spill] sm:$0xff] }
 0x31d   : > { %4193 = vmatmul.msk.f32.gmra.mxu0 %vm1682_vm11, %v1651_v25  ;;  %v9881_v25 = vld [vmem:[#allocation40_spill] sm:$0xff]  ;;  %v1374_v55 = vpop.permute.xlu1 %1373  ;;  %v1439_v35 = vsel %vm1413_vm4, %v9933_v51, %v9932_v1  ;;  %v9949_v9 = vld [vmem:[#allocation58_spill] sm:$0xff]  ;;  %v9960_v1 = vld [vmem:[#allocation195_spill] sm:$0xff] }
 0x31e   : > { %4204 = vmatmul.msk.f32.gmra.mxu2 %vm1682_vm11, %v1662_v43  ;;  %v1598_v38 = vsel %vm1574_vm9, %v1565_v52, %v9881_v25  ;;  %v9883_v43 = vld [vmem:[#allocation101_spill] sm:$0xff]  ;;  %v1534_v52 = vsel %vm1508_vm6, %v1501_v50, %v9909_v7  ;;  %v1470_v42 = vsel %vm1444_vm5, %v1439_v35, %v9934_v31  ;;  %v9935_v5 = vld [vmem:[#allocation176_spill] sm:$0xff]  ;;  %v1378_v50 = vpop.permute.xlu0 %1377  ;;  %v9961_v35 = vld [vmem:[#allocation26_spill] sm:$0xff] }
 0x31f   : > { %v1631_v20 = vsel %vm1607_vm10, %v1598_v38, %v9883_v43  ;;  %v9912_v38 = vld [vmem:[#allocation25_spill] sm:$0xff]  ;;  %v9913_v43 = vld [vmem:[#allocation72_spill] sm:$0xff]  ;;  %v1503_v30 = vsel %vm1475_vm7, %v1470_v42, %v9935_v5 }
 0x320   : > { %v1664_v62 = vsel %vm1640_vm12, %v1631_v20, %v1370_v32  ;;  %v9911_v32 = vld [vmem:[#allocation210_spill] sm:$0xff]  ;;  %v1589_v12 = vsel %vm1574_vm9, %v1556_v57, %v9912_v38  ;;  %v9936_v48 = vld [vmem:[#allocation100_spill] sm:$0xff] }
 0x321   : > { %v1567_v25 = vsel %vm1541_vm8, %v1534_v52, %v9911_v32  ;;  %v1536_v33 = vsel %vm1508_vm6, %v1503_v30, %v9936_v48  ;;  %v9939_v52 = vld [vmem:[#allocation221_spill] sm:$0xff]  ;;  %v9940_v32 = vld [vmem:[#allocation106_spill] sm:$0xff]  ;;  %v9951_v17 = vld [vmem:[#allocation168_spill] sm:$0xff] }
 0x322   : > { %v1600_v20 = vsel %vm1574_vm9, %v1567_v25, %v9913_v43  ;;  %v9941_v25 = vld [vmem:[#allocation59_spill] sm:$0xff]  ;;  %v9943_v43 = vld [vmem:[#allocation177_spill] sm:$0xff]  ;;  %v9953_v44 = vld [vmem:[#allocation16_spill] sm:$0xff] }
 0x323   : > { %v1633_v49 = vsel %vm1607_vm10, %v1600_v20, %v9915_v45  ;;  %v1440_v38 = vsel %vm1413_vm4, %v9941_v25, %v9940_v32  ;;  %v9945_v45 = vld [vmem:[#allocation213_spill] sm:$0xff] }
 0x324   : > { %v1666_v2 = vsel %vm1640_vm12, %v1633_v49, %v1374_v55  ;;  %v9966_v25 = vld [vmem:[#allocation205_spill] sm:$0xff] }
 0x325   : > { %4194 = vmatmul.msk.f32.gmra.mxu0 %vm1682_vm11, %v1652_v19  ;;  %v1599_v19 = vsel %vm1574_vm9, %v1566_v61, %v9897_v6  ;;  %v9926_v61 = vld [vmem:[#allocation212_spill] sm:$0xff]  ;;  %v9928_v6 = vld [vmem:[#allocation57_spill] sm:$0xff] }
 0x326   : > { %4205 = vmatmul.msk.f32.gmra.mxu2 %vm1682_vm11, %v1663_v11  ;;  %v1632_v11 = vsel %vm1607_vm10, %v1599_v19, %v9899_v37  ;;  %v1557_v13 = vsel %vm1541_vm8, %v1524_v36, %v9926_v61  ;;  %v9954_v61 = vld [vmem:[#allocation56_spill] sm:$0xff] }
 0x327   : > { %v1665_v24 = vsel %vm1640_vm12, %v1632_v11, %v1372_v26  ;;  %v1590_v19 = vsel %vm1574_vm9, %v1557_v13, %v9928_v6  ;;  %v9930_v11 = vld [vmem:[#allocation95_spill] sm:$0xff] }
 0x32d   : > { %4195 = vmatmul.msk.f32.gmra.mxu0 %vm1682_vm11, %v1653_v39  ;;  %v9914_v39 = vld [vmem:[#allocation77_spill] sm:$0xff] }
 0x32e   : > { %4206 = vmatmul.msk.f32.gmra.mxu2 %vm1682_vm11, %v1664_v62  ;;  %v1622_v59 = vsel %vm1607_vm10, %v1589_v12, %v9914_v39  ;;  %v9942_v12 = vld [vmem:[#allocation138_spill] sm:$0xff] }
 0x32f   : > { %v1655_v62 = vsel %vm1640_vm12, %v1622_v59, %v5975_v22  ;;  %v1469_v22 = vsel %vm1444_vm5, %v1438_v3, %v9921_v46  ;;  %v1471_v55 = vsel %vm1444_vm5, %v1440_v38, %v9942_v12  ;;  %v9944_v39 = vld [vmem:[#allocation202_spill] sm:$0xff]  ;;  %v9948_v3 = vld [vmem:[#allocation119_spill] sm:$0xff] }
 0x330   : > { %v1502_v41 = vsel %vm1475_vm7, %v1469_v22, %v9923_v54  ;;  %v1504_v20 = vsel %vm1475_vm7, %v1471_v55, %v9943_v43  ;;  %v1441_v4 = vsel %vm1413_vm4, %v9949_v9, %v9948_v3  ;;  %v9950_v46 = vld [vmem:[#allocation150_spill] sm:$0xff]  ;;  %v9952_v54 = vld [vmem:[#allocation203_spill] sm:$0xff] }
 0x331   : > { %v1535_v10 = vsel %vm1508_vm6, %v1502_v41, %v9925_v15  ;;  %v1537_v59 = vsel %vm1508_vm6, %v1504_v20, %v9944_v39  ;;  %v1472_v22 = vsel %vm1444_vm5, %v1441_v4, %v9950_v46  ;;  %v1382_v15 = vpop.permute.xlu2 %1381  ;;  %v9967_v38 = vld [vmem:[#allocation214_spill] sm:$0xff] }
 0x332   : > { %v1568_v26 = vsel %vm1541_vm8, %v1535_v10, %v9927_v63  ;;  %v1570_v49 = vsel %vm1541_vm8, %v1537_v59, %v9945_v45  ;;  %v1505_v29 = vsel %vm1475_vm7, %v1472_v22, %v9951_v17  ;;  %v9955_v63 = vld [vmem:[#allocation220_spill] sm:$0xff] }
 0x333   : > { %v1601_v37 = vsel %vm1574_vm9, %v1568_v26, %v9929_v53  ;;  %v1603_v16 = vsel %vm1574_vm9, %v1570_v49, %v9946_v14  ;;  %v1538_v41 = vsel %vm1508_vm6, %v1505_v29, %v9952_v54 }
 0x334   : > { %v1634_v47 = vsel %vm1607_vm10, %v1601_v37, %v9931_v21  ;;  %v1571_v36 = vsel %vm1541_vm8, %v1538_v41, %v9953_v44  ;;  %v9957_v37 = vld [vmem:[#allocation67_spill] sm:$0xff] }
 0x335   : > { %4196 = vmatmul.msk.f32.gmra.mxu0 %vm1682_vm11, %v1654_v27  ;;  %v1623_v27 = vsel %vm1607_vm10, %v1590_v19, %v9930_v11  ;;  %v1604_v13 = vsel %vm1574_vm9, %v1571_v36, %v9954_v61  ;;  %v9956_v19 = vld [vmem:[#allocation120_spill] sm:$0xff] }
 0x336   : > { %4207 = vmatmul.msk.f32.gmra.mxu2 %vm1682_vm11, %v1665_v24  ;;  %v1656_v58 = vsel %vm1640_vm12, %v1623_v27, %v6011_v34  ;;  %v1667_v24 = vsel %vm1640_vm12, %v1634_v47, %v1376_v40  ;;  %v9937_v34 = vld [vmem:[#allocation29_spill] sm:$0xff]  ;;  %v1637_v26 = vsel %vm1607_vm10, %v1604_v13, %v9955_v63  ;;  %v1442_v11 = vsel %vm1413_vm4, %v9957_v37, %v9956_v19  ;;  %v9958_v27 = vld [vmem:[#allocation151_spill] sm:$0xff] }
 0x337   : > { %v1569_v56 = vsel %vm1541_vm8, %v1536_v33, %v9937_v34  ;;  %v1670_v6 = vsel %vm1640_vm12, %v1637_v26, %v1382_v15  ;;  %v1473_v47 = vsel %vm1444_vm5, %v1442_v11, %v9958_v27  ;;  %v9962_v33 = vld [vmem:[#allocation109_spill] sm:$0xff]  ;;  %v9963_v34 = vld [vmem:[#allocation66_spill] sm:$0xff] }
 0x338   : > { %v1602_v7 = vsel %vm1574_vm9, %v1569_v56, %v9938_v8  ;;  %v1443_v56 = vsel %vm1413_vm4, %v9963_v34, %v9962_v33 }
 0x339   : > { %v1635_v28 = vsel %vm1607_vm10, %v1602_v7, %v9939_v52  ;;  %v9964_v7 = vld [vmem:[#allocation141_spill] sm:$0xff] }
 0x33a   : > { %v1668_v57 = vsel %vm1640_vm12, %v1635_v28, %v1378_v50  ;;  %v1474_v28 = vsel %vm1444_vm5, %v1443_v56, %v9964_v7 }
 0x33d   : > { %4197 = vmatmul.msk.f32.gmra.mxu0 %vm1682_vm11, %v1655_v62  ;;  %v1380_v62 = vpop.permute.xlu1 %1379 }
 0x33e   : > { %4208 = vmatmul.msk.f32.gmra.mxu2 %vm1682_vm11, %v1666_v2  ;;  %v9947_v2 = vld [vmem:[#allocation222_spill] sm:$0xff] }
 0x33f   : > { %v1636_v60 = vsel %vm1607_vm10, %v1603_v16, %v9947_v2 }
 0x340   : > { %v1669_v0 = vsel %vm1640_vm12, %v1636_v60, %v1380_v62 }
 0x345   : > { %4198 = vmatmul.msk.f32.gmra.mxu0 %vm1682_vm11, %v1656_v58  ;;  %v9959_v58 = vld [vmem:[#allocation179_spill] sm:$0xff] }
 0x346   : > { %4209 = vmatmul.msk.f32.gmra.mxu2 %vm1682_vm11, %v1667_v24  ;;  %v1506_v24 = vsel %vm1475_vm7, %v1473_v47, %v9959_v58 }
 0x347   : > { %v1539_v51 = vsel %vm1508_vm6, %v1506_v24, %v9960_v1 }
 0x348   : > { %v1572_v31 = vsel %vm1541_vm8, %v1539_v51, %v9961_v35 }
 0x349   : > { %v1605_v5 = vsel %vm1574_vm9, %v1572_v31, %v9929_v53 }
 0x34a   : > { %v1800_v18 = vpop.f32.mrf.mxu0  ;;  %v1638_v30 = vsel %vm1607_vm10, %v1605_v5, %v9931_v21 }
 0x34b   : > { %v1671_v48 = vsel %vm1640_vm12, %v1638_v30, %v1376_v40 }
 0x34e   : > { %4210 = vmatmul.msk.f32.gmra.mxu2 %vm1682_vm11, %v1668_v57  ;;  %v9965_v57 = vld [vmem:[#allocation180_spill] sm:$0xff] }
 0x34f   : > { %v1507_v32 = vsel %vm1475_vm7, %v1474_v28, %v9965_v57 }
 0x350   : > { %v1540_v53 = vsel %vm1508_vm6, %v1507_v32, %v9966_v25 }
 0x351   : > { %v1573_v21 = vsel %vm1541_vm8, %v1540_v53, %v9967_v38 }
 0x352   : > { %v1803_v23 = vpop.f32.mrf.mxu0  ;;  %v1606_v40 = vsel %vm1574_vm9, %v1573_v21, %v9938_v8 }
 0x353   : > { %v1639_v55 = vsel %vm1607_vm10, %v1606_v40, %v9939_v52 }
 0x354   : > { %v1672_v43 = vsel %vm1640_vm12, %v1639_v55, %v1378_v50  ;;  %v6444_v50 = vld [vmem:[%s9163_s2] ss:$0 sm:$0xff] }
 0x355   : > { %v6447_v60 = vadd.f32 %v6444_v50, %v1803_v23  ;;  %v6452_v3 = vadd.f32 %v6444_v50, %v1800_v18 }
 0x356   : > { %4211 = vmatmul.msk.f32.gmra.mxu2 %vm1682_vm11, %v1669_v0 }
 0x357   : > { %v1966_v46 = vmul.f32 %v6447_v60, %v6447_v60  ;;  %v1965_v17 = vmul.f32 %v6452_v3, %v6452_v3  ;;  %v1897_v23 = vsel %vm1413_vm4, %v6447_v60, 0.0  ;;  %v1896_v54 = vsel %vm1413_vm4, %v6452_v3, 0.0 }
 0x358   : > { %v1898_v13 = vadd.f32 %v1897_v23, %v1896_v54 }
 0x359   : > { %v1998_v41 = vsel %vm1413_vm4, %v1966_v46, 0.0  ;;  %v1997_v61 = vsel %vm1413_vm4, %v1965_v17, 0.0 }
 0x35a   : > { %v1806_v10 = vpop.f32.mrf.mxu0  ;;  %v1999_v11 = vadd.f32 %v1998_v41, %v1997_v61 }
 0x35b   : > { %v6455_v4 = vadd.f32 %v6444_v50, %v1806_v10 }
 0x35d   : > { %v1967_v18 = vmul.f32 %v6455_v4, %v6455_v4  ;;  %v1899_v44 = vsel %vm1413_vm4, %v6455_v4, 0.0 }
 0x35e   : > { %4212 = vmatmul.msk.f32.gmra.mxu2 %vm1682_vm11, %v1670_v6  ;;  %v1900_v27 = vadd.f32 %v1899_v44, %v1898_v13 }
 0x35f   : > { %v2000_v26 = vsel %vm1413_vm4, %v1967_v18, 0.0 }
 0x360   : > { %v2001_v51 = vadd.f32 %v2000_v26, %v1999_v11 }
 0x362   : > { %v1809_v42 = vpop.f32.mrf.mxu0 }
 0x363   : > { %v6460_v22 = vadd.f32 %v6444_v50, %v1809_v42 }
 0x365   : > { %v1968_v36 = vmul.f32 %v6460_v22, %v6460_v22  ;;  %v1901_v6 = vsel %vm1413_vm4, %v6460_v22, 0.0 }
 0x366   : > { %4213 = vmatmul.msk.f32.gmra.mxu2 %vm1682_vm11, %v1671_v48  ;;  %v1902_v35 = vadd.f32 %v1901_v6, %v1900_v27 }
 0x367   : > { %v2002_v47 = vsel %vm1413_vm4, %v1968_v36, 0.0 }
 0x368   : > { %v2003_v48 = vadd.f32 %v2002_v47, %v2001_v51 }
 0x36a   : > { %v1812_v12 = vpop.f32.mrf.mxu0 }
 0x36b   : > { %v6469_v29 = vadd.f32 %v6444_v50, %v1812_v12 }
 0x36d   : > { %v1969_v19 = vmul.f32 %v6469_v29, %v6469_v29  ;;  %v1903_v58 = vsel %vm1413_vm4, %v6469_v29, 0.0 }
 0x36e   : > { %4214 = vmatmul.msk.f32.gmra.mxu2 %vm1682_vm11, %v1672_v43  ;;  %v1904_v33 = vadd.f32 %v1903_v58, %v1902_v35 }
 0x36f   : > { %v2004_v31 = vsel %vm1413_vm4, %v1969_v19, 0.0 }
 0x370   : > { %v2005_v32 = vadd.f32 %v2004_v31, %v2003_v48 }
 0x372   : > { %v1815_v20 = vpop.f32.mrf.mxu0 }
 0x373   : > { %v6479_v15 = vadd.f32 %v6444_v50, %v1815_v20 }
 0x375   : > { %v1970_v24 = vmul.f32 %v6479_v15, %v6479_v15  ;;  %v1905_v42 = vsel %vm1413_vm4, %v6479_v15, 0.0 }
 0x376   : > { %v1906_v25 = vadd.f32 %v1905_v42, %v1904_v33 }
 0x377   : > { %v2006_v34 = vsel %vm1413_vm4, %v1970_v24, 0.0 }
 0x378   : > { %v2007_v55 = vadd.f32 %v2006_v34, %v2005_v32 }
 0x379   : > { %v6431_v39 = vpop.f32.mrf.mxu2 }
 0x37a   : > { %v1818_v59 = vpop.f32.mrf.mxu0  ;;  %v6572_v32 = vadd.f32 %v6444_v50, %v6431_v39 }
 0x37b   : > { %v6490_v37 = vadd.f32 %v6444_v50, %v1818_v59 }
 0x37d   : > { %v1971_v5 = vmul.f32 %v6490_v37, %v6490_v37  ;;  %v1907_v56 = vsel %vm1413_vm4, %v6490_v37, 0.0 }
 0x37e   : > { %v1908_v43 = vadd.f32 %v1907_v56, %v1906_v25 }
 0x37f   : > { %v2008_v38 = vsel %vm1413_vm4, %v1971_v5, 0.0 }
 0x381   : > { %v6433_v45 = vpop.f32.mrf.mxu2 }
 0x382   : > { %v1821_v49 = vpop.f32.mrf.mxu0 }
 0x383   : > { %v6498_v1 = vadd.f32 %v6444_v50, %v1821_v49 }
 0x385   : > { %v1972_v7 = vmul.f32 %v6498_v1, %v6498_v1  ;;  %v1909_v21 = vsel %vm1413_vm4, %v6498_v1, 0.0 }
 0x386   : > { %v1910_v46 = vadd.f32 %v1909_v21, %v1908_v43  ;;  %v6581_v43 = vadd.f32 %v6444_v50, %v6433_v45 }
 0x387   : > { %v2010_v20 = vsel %vm1413_vm4, %v1972_v7, 0.0 }
 0x389   : > { %v6435_v62 = vpop.f32.mrf.mxu2 }
 0x38a   : > { %v1824_v14 = vpop.f32.mrf.mxu0 }
 0x38b   : > { %v6506_v30 = vadd.f32 %v6444_v50, %v1824_v14 }
 0x38d   : > { %v1973_v12 = vmul.f32 %v6506_v30, %v6506_v30  ;;  %v1911_v59 = vsel %vm1413_vm4, %v6506_v30, 0.0 }
 0x38e   : > { %v1912_v41 = vadd.f32 %v1911_v59, %v1910_v46  ;;  %v6591_v46 = vadd.f32 %v6444_v50, %v6435_v62 }
 0x38f   : > { %v2012_v17 = vsel %vm1413_vm4, %v1973_v12, 0.0 }
 0x391   : > { %v6437_v16 = vpop.f32.mrf.mxu2 }
 0x392   : > { %v1827_v8 = vpop.f32.mrf.mxu0 }
 0x393   : > { %v6514_v28 = vadd.f32 %v6444_v50, %v1827_v8  ;;  %v2009_v8 = vadd.f32 %v2008_v38, %v2007_v55 }
 0x395   : > { %v1974_v49 = vmul.f32 %v6514_v28, %v6514_v28  ;;  %v2011_v54 = vadd.f32 %v2010_v20, %v2009_v8  ;;  %v1981_v8 = vmul.f32 %v6572_v32, %v6572_v32 }
 0x397   : > { %v2014_v44 = vsel %vm1413_vm4, %v1974_v49, 0.0  ;;  %v2013_v26 = vadd.f32 %v2012_v17, %v2011_v54  ;;  %v1927_v54 = vsel %vm1413_vm4, %v6572_v32, 0.0 }
 0x399   : > { %v6439_v2 = vpop.f32.mrf.mxu2  ;;  %v2015_v58 = vadd.f32 %v2014_v44, %v2013_v26  ;;  %v6603_v44 = vadd.f32 %v6444_v50, %v6437_v16  ;;  %v2028_v26 = vsel %vm1413_vm4, %v1981_v8, 0.0 }
 0x39a   : > { %v1830_v52 = vpop.f32.mrf.mxu0 }
 0x39b   : > { %v6524_v40 = vadd.f32 %v6444_v50, %v1830_v52  ;;  %v1913_v52 = vsel %vm1413_vm4, %v6514_v28, 0.0 }
 0x39c   : > { %v1914_v6 = vadd.f32 %v1913_v52, %v1912_v41  ;;  %v1982_v41 = vmul.f32 %v6581_v43, %v6581_v43 }
 0x39d   : > { %v1975_v23 = vmul.f32 %v6524_v40, %v6524_v40 }
 0x3a1   : > { %v6449_v0 = vpop.f32.mrf.mxu2 }
 0x3a2   : > { %v1833_v9 = vpop.f32.mrf.mxu0 }
 0x3a3   : > { %v6532_v14 = vadd.f32 %v6444_v50, %v1833_v9  ;;  %v1915_v9 = vsel %vm1413_vm4, %v6524_v40, 0.0 }
 0x3a4   : > { %v1916_v24 = vadd.f32 %v1915_v9, %v1914_v6  ;;  %v1929_v6 = vsel %vm1413_vm4, %v6581_v43, 0.0 }
 0x3a5   : > { %v1976_v36 = vmul.f32 %v6532_v14, %v6532_v14  ;;  %v1917_v11 = vsel %vm1413_vm4, %v6532_v14, 0.0 }
 0x3a6   : > { %v1918_v5 = vadd.f32 %v1917_v11, %v1916_v24  ;;  %v1931_v24 = vsel %vm1413_vm4, %v6591_v46, 0.0 }
 0x3a7   : > { %v2018_v51 = vsel %vm1413_vm4, %v1976_v36, 0.0 }
 0x3a9   : > { %v6481_v10 = vpop.f32.mrf.mxu2 }
 0x3aa   : > { %v1836_v63 = vpop.f32.mrf.mxu0 }
 0x3ab   : > { %v6540_v18 = vadd.f32 %v6444_v50, %v1836_v63  ;;  %v2016_v63 = vsel %vm1413_vm4, %v1975_v23, 0.0 }
 0x3ac   : > { %v2017_v42 = vadd.f32 %v2016_v63, %v2015_v58  ;;  %v6613_v63 = vadd.f32 %v6444_v50, %v6439_v2  ;;  %v2030_v58 = vsel %vm1413_vm4, %v1982_v41, 0.0 }
 0x3ad   : > { %v1977_v27 = vmul.f32 %v6540_v18, %v6540_v18  ;;  %v1919_v35 = vsel %vm1413_vm4, %v6540_v18, 0.0 }
 0x3ae   : > { %v2019_v56 = vadd.f32 %v2018_v51, %v2017_v42  ;;  %v1920_v7 = vadd.f32 %v1919_v35, %v1918_v5  ;;  %v1984_v51 = vmul.f32 %v6603_v44, %v6603_v44  ;;  %v6622_v35 = vadd.f32 %v6444_v50, %v6449_v0 }
 0x3af   : > { %v2020_v48 = vsel %vm1413_vm4, %v1977_v27, 0.0  ;;  %v1933_v5 = vsel %vm1413_vm4, %v6603_v44, 0.0 }
 0x3b0   : > { %v2021_v21 = vadd.f32 %v2020_v48, %v2019_v56  ;;  %v1985_v48 = vmul.f32 %v6613_v63, %v6613_v63  ;;  %v2034_v56 = vsel %vm1413_vm4, %v1984_v51, 0.0  ;;  %v1986_v0 = vmul.f32 %v6622_v35, %v6622_v35 }
 0x3b1   : > { %v6516_v57 = vpop.f32.mrf.mxu2 }
 0x3b2   : > { %v1839_v53 = vpop.f32.mrf.mxu0  ;;  %v2038_v8 = vsel %vm1413_vm4, %v1986_v0, 0.0 }
 0x3b3   : > { %v6548_v61 = vadd.f32 %v6444_v50, %v1839_v53 }
 0x3b5   : > { %v1978_v31 = vmul.f32 %v6548_v61, %v6548_v61  ;;  %v1921_v33 = vsel %vm1413_vm4, %v6548_v61, 0.0 }
 0x3b6   : > { %v1922_v12 = vadd.f32 %v1921_v33, %v1920_v7  ;;  %v1935_v7 = vsel %vm1413_vm4, %v6613_v63, 0.0 }
 0x3b7   : > { %v2022_v25 = vsel %vm1413_vm4, %v1978_v31, 0.0 }
 0x3b8   : > { %v2023_v39 = vadd.f32 %v2022_v25, %v2021_v21  ;;  %v6636_v25 = vadd.f32 %v6444_v50, %v6481_v10 }
 0x3b9   : > { %v6550_v13 = vpop.f32.mrf.mxu2 }
 0x3ba   : > { %v1842_v19 = vpop.f32.mrf.mxu0 }
 0x3bb   : > { %v6558_v47 = vadd.f32 %v6444_v50, %v1842_v19  ;;  %v1983_v19 = vmul.f32 %v6591_v46, %v6591_v46 }
 0x3bd   : > { %v1979_v34 = vmul.f32 %v6558_v47, %v6558_v47  ;;  %v1923_v53 = vsel %vm1413_vm4, %v6558_v47, 0.0  ;;  %v2032_v2 = vsel %vm1413_vm4, %v1983_v19, 0.0 }
 0x3be   : > { %v1924_v49 = vadd.f32 %v1923_v53, %v1922_v12  ;;  %v2036_v12 = vsel %vm1413_vm4, %v1985_v48, 0.0 }
 0x3bf   : > { %v2024_v20 = vsel %vm1413_vm4, %v1979_v34, 0.0 }
 0x3c0   : > { %v2025_v52 = vadd.f32 %v2024_v20, %v2023_v39  ;;  %v1937_v20 = vsel %vm1413_vm4, %v6622_v35, 0.0 }
 0x3c1   : > { %v6577_v38 = vpop.f32.mrf.mxu2 }
 0x3c2   : > { %v1845_v55 = vpop.f32.mrf.mxu0 }
 0x3c3   : > { %v6585_v59 = vadd.f32 %v6444_v50, %v1845_v55 }
 0x3c5   : > { %v1925_v17 = vsel %vm1413_vm4, %v6585_v59, 0.0  ;;  %v1980_v45 = vmul.f32 %v6585_v59, %v6585_v59 }
 0x3c6   : > { %v1926_v23 = vadd.f32 %v1925_v17, %v1924_v49  ;;  %v1987_v17 = vmul.f32 %v6636_v25, %v6636_v25 }
 0x3c7   : > { %v2026_v62 = vsel %vm1413_vm4, %v1980_v45, 0.0  ;;  %v6646_v45 = vadd.f32 %v6444_v50, %v6516_v57 }
 0x3c8   : > { %v1928_v9 = vadd.f32 %v1927_v54, %v1926_v23  ;;  %v2027_v36 = vadd.f32 %v2026_v62, %v2025_v52  ;;  %v1939_v52 = vsel %vm1413_vm4, %v6636_v25, 0.0  ;;  %v2040_v54 = vsel %vm1413_vm4, %v1987_v17, 0.0 }
 0x3c9   : > { %v1878_v11 = vpop.f32.mrf.mxu2  ;;  %v1988_v41 = vmul.f32 %v6646_v45, %v6646_v45  ;;  %v6655_v62 = vadd.f32 %v6444_v50, %v6550_v13  ;;  %v1941_v57 = vsel %vm1413_vm4, %v6646_v45, 0.0 }
 0x3ca   : > { %v1930_v27 = vadd.f32 %v1929_v6, %v1928_v9  ;;  %v2029_v16 = vadd.f32 %v2028_v26, %v2027_v36 }
 0x3cb   : > { %v2042_v6 = vsel %vm1413_vm4, %v1988_v41, 0.0  ;;  %v1989_v19 = vmul.f32 %v6655_v62, %v6655_v62  ;;  %v1943_v13 = vsel %vm1413_vm4, %v6655_v62, 0.0 }
 0x3cc   : > { %v1932_v31 = vadd.f32 %v1931_v24, %v1930_v27  ;;  %v2031_v42 = vadd.f32 %v2030_v58, %v2029_v16  ;;  %v6664_v27 = vadd.f32 %v6444_v50, %v6577_v38 }
 0x3cd   : > { %v2044_v24 = vsel %vm1413_vm4, %v1989_v19, 0.0 }
 0x3ce   : > { %v1934_v33 = vadd.f32 %v1933_v5, %v1932_v31  ;;  %v2033_v34 = vadd.f32 %v2032_v2, %v2031_v42  ;;  %v1990_v51 = vmul.f32 %v6664_v27, %v6664_v27  ;;  %v6672_v31 = vadd.f32 %v6444_v50, %v1878_v11 }
 0x3cf   : > { %v1945_v5 = vsel %vm1413_vm4, %v6664_v27, 0.0 }
 0x3d0   : > { %v1936_v53 = vadd.f32 %v1935_v7, %v1934_v33  ;;  %v2035_v21 = vadd.f32 %v2034_v56, %v2033_v34  ;;  %v2046_v48 = vsel %vm1413_vm4, %v1990_v51, 0.0  ;;  %v1991_v33 = vmul.f32 %v6672_v31, %v6672_v31 }
 0x3d1   : > { %v1881_v55 = vpop.f32.mrf.mxu2  ;;  %v1947_v7 = vsel %vm1413_vm4, %v6672_v31, 0.0 }
 0x3d2   : > { %v2037_v39 = vadd.f32 %v2036_v12, %v2035_v21  ;;  %v1938_v49 = vadd.f32 %v1937_v20, %v1936_v53  ;;  %v6680_v34 = vadd.f32 %v6444_v50, %v1881_v55  ;;  %v2048_v0 = vsel %vm1413_vm4, %v1991_v33, 0.0 }
 0x3d4   : > { %v2039_v10 = vadd.f32 %v2038_v8, %v2037_v39  ;;  %v1940_v23 = vadd.f32 %v1939_v52, %v1938_v49  ;;  %v1992_v53 = vmul.f32 %v6680_v34, %v6680_v34  ;;  %v1949_v55 = vsel %vm1413_vm4, %v6680_v34, 0.0 }
 0x3d6   : > { %v2041_v9 = vadd.f32 %v2040_v54, %v2039_v10  ;;  %v1942_v26 = vadd.f32 %v1941_v57, %v1940_v23  ;;  %v2050_v17 = vsel %vm1413_vm4, %v1992_v53, 0.0 }
 0x3d8   : > { %v2043_v16 = vadd.f32 %v2042_v6, %v2041_v9  ;;  %v1944_v58 = vadd.f32 %v1943_v13, %v1942_v26 }
 0x3d9   : > { %v1884_v36 = vpop.f32.mrf.mxu2 }
 0x3da   : > { %v2045_v42 = vadd.f32 %v2044_v24, %v2043_v16  ;;  %v1946_v38 = vadd.f32 %v1945_v5, %v1944_v58  ;;  %v6688_v21 = vadd.f32 %v6444_v50, %v1884_v36 }
 0x3dc   : > { %v2047_v56 = vadd.f32 %v2046_v48, %v2045_v42  ;;  %v1948_v11 = vadd.f32 %v1947_v7, %v1946_v38  ;;  %v1993_v10 = vmul.f32 %v6688_v21, %v6688_v21  ;;  %v1951_v54 = vsel %vm1413_vm4, %v6688_v21, 0.0 }
 0x3de   : > { %v2049_v20 = vadd.f32 %v2048_v0, %v2047_v56  ;;  %v1950_v8 = vadd.f32 %v1949_v55, %v1948_v11  ;;  %v2052_v57 = vsel %vm1413_vm4, %v1993_v10, 0.0 }
 0x3e0   : > { %v2051_v23 = vadd.f32 %v2050_v17, %v2049_v20  ;;  %v1952_v36 = vadd.f32 %v1951_v54, %v1950_v8 }
 0x3e1   : > { %v1887_v2 = vpop.f32.mrf.mxu2 }
 0x3e2   : > { %v6691_v12 = vadd.f32 %v6444_v50, %v1887_v2  ;;  %v2053_v19 = vadd.f32 %v2052_v57, %v2051_v23 }
 0x3e4   : > { %v1994_v52 = vmul.f32 %v6691_v12, %v6691_v12  ;;  %v1953_v41 = vsel %vm1413_vm4, %v6691_v12, 0.0 }
 0x3e5   : > { %v1954_v16 = vadd.f32 %v1953_v41, %v1952_v36 }
 0x3e6   : > { %v2054_v26 = vsel %vm1413_vm4, %v1994_v52, 0.0 }
 0x3e7   : > { %v2055_v51 = vadd.f32 %v2054_v26, %v2053_v19 }
 0x3e9   : > { %v1890_v39 = vpop.f32.mrf.mxu2 }
 0x3ea   : > { %v6696_v49 = vadd.f32 %v6444_v50, %v1890_v39 }
 0x3ec   : > { %v1995_v9 = vmul.f32 %v6696_v49, %v6696_v49  ;;  %v1955_v6 = vsel %vm1413_vm4, %v6696_v49, 0.0 }
 0x3ed   : > { %v1956_v42 = vadd.f32 %v1955_v6, %v1954_v16 }
 0x3ee   : > { %v2056_v58 = vsel %vm1413_vm4, %v1995_v9, 0.0 }
 0x3ef   : > { %v2057_v38 = vadd.f32 %v2056_v58, %v2055_v51 }
 0x3f1   : > { %v1893_v13 = vpop.f32.mrf.mxu2 }
 0x3f2   : > { %v1894_v24 = vadd.f32 %v6444_v50, %v1893_v13 }
 0x3f4   : > { %v1957_v2 = vsel %vm1413_vm4, %v1894_v24, 0.0  ;;  %v1996_v5 = vmul.f32 %v1894_v24, %v1894_v24 }
 0x3f5   : > { %v1958_v48 = vadd.f32 %v1957_v2, %v1956_v42 }
 0x3f6   : > { %v2058_v33 = vsel %vm1413_vm4, %v1996_v5, 0.0 }
 0x3f7   : > { %v1959_v56 = vrot.slane %v1958_v48, 4  ;;  %v2059_v7 = vadd.f32 %v2058_v33, %v2057_v38 }
 0x3f9   : > { %v1960_v11 = vadd.f32 %v1959_v56, %v1958_v48  ;;  %v2060_v0 = vrot.slane %v2059_v7, 4 }
 0x3fb   : > { %v1961_v53 = vrot.slane %v1960_v11, 2  ;;  %v2061_v20 = vadd.f32 %v2060_v0, %v2059_v7 }
 0x3fd   : > { %v1962_v39 = vadd.f32 %v1961_v53, %v1960_v11  ;;  %v2062_v55 = vrot.slane %v2061_v20, 2 }
 0x3ff   : > { %v1963_v8 = vrot.slane %v1962_v39, 1  ;;  %v2063_v17 = vadd.f32 %v2062_v55, %v2061_v20 }
 0x401   : > { %v1964_v50 = vadd.f32 %v1963_v8, %v1962_v39  ;;  %v2064_v10 = vrot.slane %v2063_v17, 1 }
 0x403   : > { %v2065_v52 = vadd.f32 %v2064_v10, %v2063_v17  ;;  %v6717_v23 = vmul.f32 0.00390625, %v1964_v50 }
 0x405   : > { %v2067_v54 = vmul.f32 0.00390625, %v2065_v52  ;;  %v2068_v41 = vmul.f32 %v6717_v23, %v6717_v23  ;;  %v2102_v9 = vsub.f32 %v1894_v24, %v6717_v23  ;;  %v2098_v6 = vsub.f32 %v6680_v34, %v6717_v23 }
 0x406   : > { %v2099_v19 = vsub.f32 %v6688_v21, %v6717_v23  ;;  %v2100_v16 = vsub.f32 %v6691_v12, %v6717_v23  ;;  %v2101_v13 = vsub.f32 %v6696_v49, %v6717_v23  ;;  %v2073_v34 = vsub.f32 %v6455_v4, %v6717_v23 }
 0x407   : > { %v2069_v36 = vsub.f32 %v2067_v54, %v2068_v41  ;;  %v2074_v21 = vsub.f32 %v6460_v22, %v6717_v23  ;;  %v2071_v7 = vsub.f32 %v6452_v3, %v6717_v23  ;;  %v2072_v4 = vsub.f32 %v6447_v60, %v6717_v23 }
 0x408   : > { %v2089_v22 = vsub.f32 %v6591_v46, %v6717_v23  ;;  %v2090_v11 = vsub.f32 %v6603_v44, %v6717_v23  ;;  %v2091_v0 = vsub.f32 %v6613_v63, %v6717_v23  ;;  %v2092_v55 = vsub.f32 %v6622_v35, %v6717_v23 }
 0x409   : > { %v2070_v57 = vmax.f32 %v2069_v36, 0.0  ;;  %v2093_v3 = vsub.f32 %v6636_v25, %v6717_v23  ;;  %v2094_v60 = vsub.f32 %v6646_v45, %v6717_v23  ;;  %v2095_v46 = vsub.f32 %v6655_v62, %v6717_v23 }
 0x40a   : > { %v2096_v44 = vsub.f32 %v6664_v27, %v6717_v23  ;;  %v2097_v63 = vsub.f32 %v6672_v31, %v6717_v23 }
 0x40b   : > { %v2103_v26 = vadd.f32 1e-05, %v2070_v57 }
 0x40d   : > { %4280 = vrsqrt.f32 %v2103_v26  ;;  %vm2110_vm14 = vweird.f32 %v2103_v26 }
 0x413   : > { %v4281_v58 = vpop.eup %4280 }
 0x414   : > { %v2105_v51 = vmul.f32 %v4281_v58, %v2103_v26  ;;  %vm2111_vm13 = vweird.f32 %v4281_v58 }
 0x415   : > { %vm2112_vm15 = vmor %vm2110_vm14, %vm2111_vm13 }
 0x416   : > { %v2106_v42 = vmul.f32 %v4281_v58, %v2105_v51 }
 0x418   : > { %v2107_v24 = vmul.f32 0.5, %v2106_v42 }
 0x41a   : > { %v2108_v2 = vsub.f32 1.5, %v2107_v24 }
 0x41c   : > { %v2109_v5 = vmul.f32 %v4281_v58, %v2108_v2 }
 0x41e   : > { %v6734_v38 = vsel %vm2112_vm15, %v4281_v58, %v2109_v5 }
 0x41f   : > { %v6737_v12 = vmul.f32 %v6734_v38, %v2102_v9  ;;  %v2116_v49 = vmul.f32 %v6734_v38, %v2073_v34  ;;  %v2117_v48 = vmul.f32 %v6734_v38, %v2074_v21  ;;  %v6772_v45 = vmul.f32 %v6734_v38, %v2089_v22 }
 0x420   : > { %v6775_v62 = vmul.f32 %v6734_v38, %v2090_v11  ;;  %v6778_v27 = vmul.f32 %v6734_v38, %v2091_v0  ;;  %v6781_v31 = vmul.f32 %v6734_v38, %v2092_v55  ;;  %v6784_v50 = vmul.f32 %v6734_v38, %v2093_v3 }
 0x421   : > { %v2148_v33 = vmax.f32 %v2116_v49, 0.0  ;;  %v2149_v56 = vmax.f32 %v2117_v48, 0.0  ;;  %v6787_v10 = vmul.f32 %v6734_v38, %v2094_v60  ;;  %v6793_v54 = vmul.f32 %v6734_v38, %v2095_v46 }
 0x422   : > { %v6796_v41 = vmul.f32 %v6734_v38, %v2096_v44  ;;  %v6799_v9 = vmul.f32 %v6734_v38, %v2097_v63  ;;  %v6804_v36 = vmul.f32 %v6734_v38, %v2098_v6  ;;  %v6807_v57 = vmul.f32 %v6734_v38, %v2099_v19 }
 0x423   : > { %v2242_v53 = vrot.slane %v2148_v33, 7  ;;  %v2243_v20 = vrot.slane %v2149_v56, 7  ;;  %v2337_v39 = vrot.slane %v2149_v56, 5  ;;  %v6810_v26 = vmul.f32 %v6734_v38, %v2100_v16 }
 0x424   : > { %v6813_v58 = vmul.f32 %v6734_v38, %v2101_v13  ;;  %v2114_v51 = vmul.f32 %v6734_v38, %v2071_v7  ;;  %v6817_v42 = vmul.f32 %v6734_v38, %v2072_v4  ;;  %v2194_v24 = vrot.slane %v2148_v33, 1 }
 0x425   : > { %v6764_v8 = vsel %vm321_vm0, %v2242_v53, %v2243_v20  ;;  %v6767_v35 = vsel %vm321_vm0, %v2243_v20, %v2337_v39  ;;  %9971 = vst [vmem:[#allocation69_spill] sm:$0xff] %v6810_v26  ;;  %v2075_v13 = vsub.f32 %v6469_v29, %v6717_v23  ;;  %v2076_v48 = vsub.f32 %v6479_v15, %v6717_v23 }
 0x426   : > { %9968 = vst [vmem:[#allocation83_spill] sm:$0xff] %v6764_v8  ;;  %v2432_v25 = vrot.slane %v6764_v8, 1  ;;  %v2434_v17 = vrot.slane %v6767_v35, 1  ;;  %v6820_v2 = vsel %vm321_vm0, %v2194_v24, %v2242_v53  ;;  %v2146_v5 = vmax.f32 %v2114_v51, 0.0 }
 0x427   : > { %9969 = vst [vmem:[#allocation122_spill] sm:$0xff] %v6767_v35  ;;  %v2431_v6 = vrot.slane %v6820_v2, 1  ;;  %v2147_v19 = vmax.f32 %v6817_v42, 0.0  ;;  %v2077_v33 = vsub.f32 %v6490_v37, %v6717_v23  ;;  %v2078_v56 = vsub.f32 %v6498_v1, %v6717_v23 }
 0x428   : > { %v6790_v52 = vsel %vm511_vm1, %v2432_v25, %v2434_v17  ;;  %9972 = vst [vmem:[#allocation88_spill] sm:$0xff] %v6820_v2  ;;  %v2195_v34 = vrot.slane %v2146_v5, 1  ;;  %v2245_v21 = vrot.slane %v2146_v5, 7  ;;  %v2118_v7 = vmul.f32 %v6734_v38, %v2075_v13 }
 0x429   : > { %9970 = vst [vmem:[#allocation153_spill] sm:$0xff] %v6790_v52  ;;  %2595 = vrot.lane.b32.xlu1 %v6790_v52, %s4297_s24  ;;  %v6825_v16 = vsel %vm511_vm1, %v2431_v6, %v2432_v25  ;;  %v6833_v49 = vrot.slane %v2147_v19, 7  ;;  %v2119_v22 = vmul.f32 %v6734_v38, %v2076_v48  ;;  %v6851_v11 = vmul.f32 %v6734_v38, %v2077_v33 }
 0x42a   : > { %9973 = vst [vmem:[#allocation123_spill] sm:$0xff] %v6825_v16  ;;  %2593 = vrot.lane.b32.xlu0 %v6825_v16, %s4297_s24  ;;  %v6847_v4 = vsel %vm321_vm0, %v2195_v34, %v2245_v21  ;;  %v2079_v1 = vsub.f32 %v6506_v30, %v6717_v23  ;;  %v2080_v0 = vsub.f32 %v6514_v28, %v6717_v23  ;;  %v9299_v63 = vmax.f32 %v6772_v45, 0.0 }
 0x42b   : > { %v6844_v29 = vsel %vm321_vm0, %v2245_v21, %v6833_v49  ;;  %9974 = vst [vmem:[#allocation154_spill] sm:$0xff] %v6847_v4  ;;  %v2436_v15 = vrot.slane %v6847_v4, 1  ;;  %v2081_v53 = vsub.f32 %v6524_v40, %v6717_v23  ;;  %v2121_v20 = vmul.f32 %v6734_v38, %v2078_v56 }
 0x42c   : > { %v9303_v37 = vrot.slane %v6844_v29, 1  ;;  %v2082_v39 = vsub.f32 %v6532_v14, %v6717_v23  ;;  %v2083_v55 = vsub.f32 %v6540_v18, %v6717_v23  ;;  %v2084_v30 = vsub.f32 %v6548_v61, %v6717_v23 }
 0x42d   : > { %v6874_v28 = vmul.f32 %v6734_v38, %v2079_v1  ;;  %v6877_v40 = vmul.f32 %v6734_v38, %v2080_v0  ;;  %v6880_v60 = vmul.f32 %v6734_v38, %v2081_v53  ;;  %v2150_v18 = vmax.f32 %v2118_v7, 0.0 }
 0x42e   : > { %v6869_v3 = vsel %vm511_vm1, %v2436_v15, %v9303_v37  ;;  %v6885_v14 = vmul.f32 %v6734_v38, %v2082_v39  ;;  %v2151_v46 = vmax.f32 %v2119_v22, 0.0  ;;  %v2152_v44 = vmax.f32 %v6851_v11, 0.0 }
 0x42f   : > { %9975 = vst [vmem:[#allocation182_spill] sm:$0xff] %v6869_v3  ;;  %2597 = vrot.lane.b32.xlu2 %v6869_v3, %s4297_s24  ;;  %v2153_v61 = vmax.f32 %v2121_v20, 0.0  ;;  %v9302_v25 = vmax.f32 %v6775_v62, 0.0  ;;  %v9294_v17 = vmax.f32 %v6778_v27, 0.0  ;;  %v9295_v51 = vmax.f32 %v6781_v31, 0.0 }
 0x430   : > { %v9296_v24 = vmax.f32 %v6784_v50, 0.0  ;;  %v9297_v6 = vmax.f32 %v6787_v10, 0.0  ;;  %v9298_v5 = vmax.f32 %v6793_v54, 0.0  ;;  %v9300_v13 = vmax.f32 %v6796_v41, 0.0 }
 0x431   : > { %v9301_v34 = vmax.f32 %v6799_v9, 0.0  ;;  %v9304_v21 = vmax.f32 %v6804_v36, 0.0  ;;  %v9305_v48 = vmax.f32 %v6807_v57, 0.0  ;;  %v9306_v33 = vmax.f32 %v6810_v26, 0.0 }
 0x432   : > { %v2196_v56 = vrot.slane %v2150_v18, 1  ;;  %v2248_v7 = vrot.slane %v2150_v18, 7  ;;  %v2249_v22 = vrot.slane %v2151_v46, 7  ;;  %v2154_v11 = vmax.f32 %v6874_v28, 0.0 }
 0x433   : > { %v6904_v1 = vrot.slane %v9299_v63, 7  ;;  %v6908_v0 = vrot.slane %v9302_v25, 7  ;;  %v6912_v53 = vrot.slane %v9294_v17, 7  ;;  %v6916_v20 = vrot.slane %v9295_v51, 7 }
 0x434   : > { %v6920_v39 = vrot.slane %v9296_v24, 7  ;;  %v6924_v28 = vrot.slane %v9297_v6, 7  ;;  %v6928_v18 = vrot.slane %v9298_v5, 7  ;;  %v6932_v17 = vrot.slane %v9300_v13, 7 }
 0x435   : > { %v6936_v51 = vrot.slane %v9301_v34, 7  ;;  %v6940_v24 = vrot.slane %v9304_v21, 7  ;;  %v6944_v6 = vrot.slane %v9305_v48, 7  ;;  %v6948_v5 = vrot.slane %v9306_v33, 7 }
 0x436   : > { %v6951_v63 = vsel %vm321_vm0, %v2248_v7, %v2249_v22  ;;  %v6954_v13 = vsel %vm321_vm0, %v2196_v56, %v2248_v7  ;;  %v2251_v34 = vrot.slane %v2152_v44, 7  ;;  %v2252_v25 = vrot.slane %v2153_v61, 7 }
 0x437   : > { %9976 = vst [vmem:[#allocation84_spill] sm:$0xff] %v6940_v24  ;;  %v2441_v37 = vrot.slane %v6954_v13, 1  ;;  %v2442_v21 = vrot.slane %v6951_v63, 1  ;;  %v2156_v15 = vmax.f32 %v6880_v60, 0.0  ;;  %v2157_v48 = vmax.f32 %v6885_v14, 0.0 }
 0x438   : > { %9977 = vst [vmem:[#allocation4_spill] sm:$0xff] %v6948_v5  ;;  %v2338_v33 = vrot.slane %v2147_v19, 5  ;;  %v2339_v52 = vrot.slane %v2151_v46, 5  ;;  %v6968_v56 = vsel %vm321_vm0, %v6904_v1, %v6908_v0  ;;  %v6973_v7 = vsel %vm321_vm0, %v6912_v53, %v6916_v20 }
 0x439   : > { %9978 = vst [vmem:[#allocation112_spill] sm:$0xff] %v6951_v63  ;;  %v6963_v16 = vsel %vm511_vm1, %v2441_v37, %v2442_v21  ;;  %v6978_v60 = vsel %vm321_vm0, %v6920_v39, %v6924_v28  ;;  %v2340_v42 = vrot.slane %v2153_v61, 5  ;;  %v6985_v19 = vsel %vm321_vm0, %v6928_v18, %v6932_v17 }
 0x43a   : > { %9979 = vst [vmem:[#allocation144_spill] sm:$0xff] %v6954_v13  ;;  %2601 = vrot.lane.b32.xlu1 %v6963_v16, %s4297_s24  ;;  %v6990_v37 = vsel %vm321_vm0, %v6936_v51, %v6940_v24  ;;  %v6995_v14 = vsel %vm321_vm0, %v6944_v6, %v6948_v5  ;;  %v6998_v46 = vmul.f32 %v6734_v38, %v2083_v55  ;;  %v2197_v3 = vrot.slane %v2152_v44, 1 }
 0x43b   : > { %9980 = vst [vmem:[#allocation183_spill] sm:$0xff] %v6963_v16  ;;  %v2127_v61 = vmul.f32 %v6734_v38, %v2084_v30  ;;  %v7002_v16 = vsel %vm321_vm0, %v2251_v34, %v2252_v25  ;;  %v2198_v63 = vrot.slane %v2154_v11, 1  ;;  %v2199_v13 = vrot.slane %v2156_v15, 1 }
 0x43c   : > { %9981 = vst [vmem:[#allocation89_spill] sm:$0xff] %v6973_v7  ;;  %v2254_v4 = vrot.slane %v2154_v11, 7  ;;  %v9985_v2 = vmax.f32 %v6877_v40, 0.0  ;;  %v2257_v8 = vrot.slane %v2156_v15, 7  ;;  %v2258_v24 = vrot.slane %v2157_v48, 7 }
 0x43d   : > { %9982 = vst [vmem:[#allocation3_spill] sm:$0xff] %v6985_v19  ;;  %v7008_v5 = vsel %vm321_vm0, %v6833_v49, %v2338_v33  ;;  %v7012_v30 = vsel %vm321_vm0, %v2249_v22, %v2339_v52  ;;  %v7015_v26 = vsel %vm321_vm0, %v2252_v25, %v2340_v42  ;;  %v2447_v44 = vrot.slane %v7002_v16, 1 }
 0x43e   : > { %9983 = vst [vmem:[#allocation125_spill] sm:$0xff] %v6990_v37  ;;  %v2255_v35 = vrot.slane %v9985_v2, 7  ;;  %v2439_v55 = vrot.slane %v7008_v5, 1  ;;  %v2085_v11 = vsub.f32 %v6558_v47, %v6717_v23  ;;  %v2086_v2 = vsub.f32 %v6585_v59, %v6717_v23 }
 0x43f   : > { %9984 = vst [vmem:[#allocation156_spill] sm:$0xff] %v6995_v14  ;;  %v2444_v15 = vrot.slane %v7012_v30, 1  ;;  %v2449_v49 = vrot.slane %v7015_v26, 1  ;;  %v2087_v33 = vsub.f32 %v6572_v32, %v6717_v23  ;;  %v2088_v52 = vsub.f32 %v6581_v43, %v6717_v23 }
 0x440   : > { %9986 = vst [vmem:[#allocation70_spill] sm:$0xff] %v7015_v26  ;;  %v2158_v25 = vmax.f32 %v6998_v46, 0.0  ;;  %v9987_v22 = vrot.slane %v6844_v29, 1  ;;  %v7035_v47 = vsel %vm321_vm0, %v2254_v4, %v2255_v35  ;;  %v7038_v59 = vsel %vm321_vm0, %v2197_v3, %v2251_v34 }
 0x441   : > { %v7043_v32 = vsel %vm511_vm1, %v2442_v21, %v2444_v15  ;;  %v7046_v43 = vsel %vm511_vm1, %v2447_v44, %v2449_v49  ;;  %v2159_v23 = vmax.f32 %v2127_v61, 0.0  ;;  %v7049_v46 = vsel %vm321_vm0, %v2257_v8, %v2258_v24 }
 0x442   : > { %v7032_v42 = vsel %vm511_vm1, %v9987_v22, %v2439_v55  ;;  %9989 = vst [vmem:[#allocation184_spill] sm:$0xff] %v7043_v32  ;;  %v7052_v55 = vsel %vm321_vm0, %v2198_v63, %v2254_v4  ;;  %v7055_v22 = vsel %vm321_vm0, %v2199_v13, %v2257_v8  ;;  %2603 = vrot.lane.b32.xlu2 %v7043_v32, %s4297_s24  ;;  %v9993_v4 = vmax.f32 %v6877_v40, 0.0 }
 0x443   : > { %9988 = vst [vmem:[#allocation157_spill] sm:$0xff] %v7032_v42  ;;  %2599 = vrot.lane.b32.xlu0 %v7032_v42, %s4297_s24  ;;  %2607 = vrot.lane.b32.xlu1 %v7046_v43, %s4297_s24  ;;  %v2128_v3 = vmul.f32 %v6734_v38, %v2085_v11  ;;  %v2129_v34 = vmul.f32 %v6734_v38, %v2086_v2  ;;  %v2446_v8 = vrot.slane %v7038_v59, 1  ;;  %v2451_v13 = vrot.slane %v7052_v55, 1 }
 0x444   : > { %9990 = vst [vmem:[#allocation87_spill] sm:$0xff] %v7046_v43  ;;  %v2130_v21 = vmul.f32 %v6734_v38, %v2087_v33  ;;  %v2131_v61 = vmul.f32 %v6734_v38, %v2088_v52  ;;  %v2341_v63 = vrot.slane %v9993_v4, 5  ;;  %v2452_v15 = vrot.slane %v7035_v47, 1 }
 0x445   : > { %9991 = vst [vmem:[#allocation124_spill] sm:$0xff] %v7049_v46  ;;  %v2456_v49 = vrot.slane %v7055_v22, 1  ;;  %v2457_v43 = vrot.slane %v7049_v46, 1  ;;  %v2260_v11 = vrot.slane %v2158_v25, 7  ;;  %v2261_v32 = vrot.slane %v2159_v23, 7 }
 0x446   : > { %9992 = vst [vmem:[#allocation6_spill] sm:$0xff] %v7052_v55  ;;  %v2342_v2 = vrot.slane %v2157_v48, 5  ;;  %v2343_v42 = vrot.slane %v2159_v23, 5  ;;  %v2160_v33 = vmax.f32 %v2128_v3, 0.0  ;;  %v2161_v26 = vmax.f32 %v2129_v34, 0.0 }
 0x447   : > { %v7073_v38 = vsel %vm511_vm1, %v2446_v8, %v2447_v44  ;;  %v2162_v40 = vmax.f32 %v2130_v21, 0.0  ;;  %v7078_v52 = vsel %vm511_vm1, %v2451_v13, %v2452_v15  ;;  %v7081_v4 = vsel %vm511_vm1, %v2456_v49, %v2457_v43 }
 0x448   : > { %9994 = vst [vmem:[#allocation167_spill] sm:$0xff] %v7073_v38  ;;  %v7084_v46 = vsel %vm321_vm0, %v2255_v35, %v2341_v63  ;;  %v2163_v48 = vmax.f32 %v2131_v61, 0.0  ;;  %v7087_v23 = vsel %vm321_vm0, %v2260_v11, %v2261_v32  ;;  %v7094_v44 = vsel %vm321_vm0, %v2258_v24, %v2342_v2 }
 0x449   : > { %9995 = vst [vmem:[#allocation185_spill] sm:$0xff] %v7078_v52  ;;  %v7097_v3 = vsel %vm321_vm0, %v2261_v32, %v2343_v42  ;;  %v2200_v34 = vrot.slane %v2158_v25, 1  ;;  %v2263_v21 = vrot.slane %v2160_v33, 7  ;;  %v2454_v35 = vrot.slane %v7084_v46, 1 }
 0x44a   : > { %9996 = vst [vmem:[#allocation73_spill] sm:$0xff] %v7081_v4  ;;  %2609 = vrot.lane.b32.xlu2 %v7078_v52, %s4297_s24  ;;  %v2264_v61 = vrot.slane %v2161_v26, 7  ;;  %v2459_v63 = vrot.slane %v7094_v44, 1  ;;  %v2462_v8 = vrot.slane %v7087_v23, 1  ;;  %v2464_v13 = vrot.slane %v7097_v3, 1 }
 0x44b   : > { %2605 = vrot.lane.b32.xlu0 %v7073_v38, %s4297_s24  ;;  %9997 = vst [vmem:[#allocation107_spill] sm:$0xff] %v7087_v23  ;;  %2613 = vrot.lane.b32.xlu1 %v7081_v4, %s4297_s24  ;;  %v2201_v49 = vrot.slane %v2160_v33, 1  ;;  %v2202_v52 = vrot.slane %v2162_v40, 1  ;;  %v2266_v4 = vrot.slane %v2162_v40, 7  ;;  %v2267_v38 = vrot.slane %v2163_v48, 7 }
 0x44c   : > { %v7104_v24 = vsel %vm511_vm1, %v2452_v15, %v2454_v35  ;;  %v7107_v42 = vsel %vm321_vm0, %v2263_v21, %v2264_v61  ;;  %v7110_v25 = vsel %vm321_vm0, %v2200_v34, %v2260_v11  ;;  %v7115_v32 = vsel %vm511_vm1, %v2457_v43, %v2459_v63 }
 0x44d   : > { %9998 = vst [vmem:[#allocation126_spill] sm:$0xff] %v7107_v42  ;;  %v7118_v2 = vsel %vm511_vm1, %v2462_v8, %v2464_v13  ;;  %v7121_v33 = vsel %vm321_vm0, %v2266_v4, %v2267_v38  ;;  %v7124_v15 = vsel %vm321_vm0, %v2201_v49, %v2263_v21  ;;  %v7127_v40 = vsel %vm321_vm0, %v2202_v52, %v2266_v4 }
 0x44e   : > { %9999 = vst [vmem:[#allocation139_spill] sm:$0xff] %v7110_v25  ;;  %v2344_v43 = vrot.slane %v2161_v26, 5  ;;  %v2461_v11 = vrot.slane %v7110_v25, 1  ;;  %v2466_v34 = vrot.slane %v7124_v15, 1  ;;  %v2467_v35 = vrot.slane %v7107_v42, 1 }
 0x44f   : > { %10000 = vst [vmem:[#allocation159_spill] sm:$0xff] %v7115_v32  ;;  %v2471_v63 = vrot.slane %v7127_v40, 1  ;;  %v2472_v21 = vrot.slane %v7121_v33, 1  ;;  %v2345_v13 = vrot.slane %v2163_v48, 5  ;;  %v10004_v52 = vmax.f32 %v6775_v62, 0.0 }
 0x450   : > { %10001 = vst [vmem:[#allocation158_spill] sm:$0xff] %v7118_v2  ;;  %v7141_v49 = vsel %vm511_vm1, %v2461_v11, %v2462_v8  ;;  %v7146_v26 = vsel %vm511_vm1, %v2466_v34, %v2467_v35  ;;  %v2177_v8 = vmax.f32 %v6737_v12, 0.0  ;;  %v10008_v11 = vmax.f32 %v6772_v45, 0.0 }
 0x451   : > { %10002 = vst [vmem:[#allocation175_spill] sm:$0xff] %v7121_v33  ;;  %v2346_v4 = vrot.slane %v10004_v52, 5  ;;  %v7159_v62 = vsel %vm321_vm0, %v2267_v38, %v2345_v13  ;;  %v10010_v13 = vmax.f32 %v6784_v50, 0.0 }
 0x452   : > { %10003 = vst [vmem:[#allocation194_spill] sm:$0xff] %v7127_v40  ;;  %2615 = vrot.lane.b32.xlu2 %v7115_v32, %s4297_s24  ;;  %v7152_v32 = vsel %vm321_vm0, %v2264_v61, %v2344_v43  ;;  %v2203_v34 = vrot.slane %v10008_v11, 1  ;;  %v10009_v43 = vmax.f32 %v6778_v27, 0.0  ;;  %v2474_v52 = vrot.slane %v7159_v62, 1 }
 0x453   : > { %2611 = vrot.lane.b32.xlu0 %v7104_v24, %s4297_s24  ;;  %2619 = vrot.lane.b32.xlu1 %v7118_v2, %s4297_s24  ;;  %10005 = vst [vmem:[#allocation76_spill] sm:$0xff] %v7141_v49  ;;  %v7149_v2 = vsel %vm511_vm1, %v2471_v63, %v2472_v21  ;;  %v7163_v48 = vsel %vm321_vm0, %v6908_v0, %v2346_v4  ;;  %v2469_v61 = vrot.slane %v7152_v32, 1  ;;  %v2205_v0 = vrot.slane %v10010_v13, 1 }
 0x454   : > { %10006 = vst [vmem:[#allocation108_spill] sm:$0xff] %v7146_v26  ;;  %v2204_v63 = vrot.slane %v10009_v43, 1  ;;  %v2479_v38 = vrot.slane %v7163_v48, 1  ;;  %v9348_v4 = vmax.f32 %v6813_v58, 0.0  ;;  %v2352_v12 = vrot.slane %v2177_v8, 5 }
 0x455   : > { %10007 = vst [vmem:[#allocation115_spill] sm:$0xff] %v7149_v2  ;;  %v7178_v45 = vsel %vm511_vm1, %v2467_v35, %v2469_v61  ;;  %v7182_v11 = vsel %vm321_vm0, %v2203_v34, %v6904_v1  ;;  %v7191_v50 = vsel %vm511_vm1, %v2472_v21, %v2474_v52  ;;  %v7198_v35 = vsel %vm321_vm0, %v2205_v0, %v6920_v39 }
 0x456   : > { %10011 = vst [vmem:[#allocation140_spill] sm:$0xff] %v7178_v45  ;;  %v7186_v27 = vsel %vm321_vm0, %v2204_v63, %v6912_v53  ;;  %v7206_v1 = vrot.slane %v9348_v4, 7  ;;  %v2288_v53 = vrot.slane %v2177_v8, 7  ;;  %v10015_v21 = vmax.f32 %v6781_v31, 0.0 }
 0x457   : > { %10012 = vst [vmem:[#allocation160_spill] sm:$0xff] %v7186_v27  ;;  %v2476_v61 = vrot.slane %v7182_v11, 1  ;;  %v2481_v63 = vrot.slane %v7186_v27, 1  ;;  %v2482_v39 = vrot.slane %v6973_v7, 1  ;;  %v2486_v52 = vrot.slane %v7198_v35, 1 }
 0x458   : > { %10013 = vst [vmem:[#allocation169_spill] sm:$0xff] %v7191_v50  ;;  %v2347_v34 = vrot.slane %v10015_v21, 5  ;;  %v7217_v13 = vsel %vm321_vm0, %v7206_v1, %v2288_v53  ;;  %v7220_v0 = vsel %vm321_vm0, %v2288_v53, %v2352_v12  ;;  %v10018_v31 = vmax.f32 %v6787_v10, 0.0 }
 0x459   : > { %10016 = vst [vmem:[#allocation186_spill] sm:$0xff] %v7217_v13  ;;  %v10019_v21 = vmax.f32 %v6796_v41, 0.0 }
 0x45a   : > { %2621 = vrot.lane.b32.xlu2 %v7146_v26, %s4297_s24  ;;  %10017 = vst [vmem:[#allocation93_spill] sm:$0xff] %v7220_v0  ;;  %v2348_v8 = vrot.slane %v10018_v31, 5  ;;  %v7234_v26 = vsel %vm511_vm1, %v2481_v63, %v2482_v39  ;;  %v7241_v10 = vsel %vm321_vm0, %v6916_v20, %v2347_v34  ;;  %v10021_v34 = vmax.f32 %v6793_v54, 0.0 }
 0x45b   : > { %2617 = vrot.lane.b32.xlu0 %v7141_v49, %s4297_s24  ;;  %2625 = vrot.lane.b32.xlu1 %v7149_v2, %s4297_s24  ;;  %v2477_v2 = vrot.slane %v6968_v56, 1  ;;  %v2349_v4 = vrot.slane %v10019_v21, 5  ;;  %v2484_v20 = vrot.slane %v7241_v10, 1  ;;  %v2492_v63 = vrot.slane %v6985_v19, 1 }
 0x45c   : > { %v10022_v31 = vmax.f32 %v6799_v9, 0.0 }
 0x45d   : > { %v7194_v43 = vsel %vm511_vm1, %v2477_v2, %v2479_v38  ;;  %v2487_v38 = vrot.slane %v6978_v60, 1  ;;  %v7258_v53 = vsel %vm321_vm0, %v6932_v17, %v2349_v4  ;;  %v7271_v17 = vsel %vm511_vm1, %v2482_v39, %v2484_v20 }
 0x45e   : > { %10014 = vst [vmem:[#allocation187_spill] sm:$0xff] %v7194_v43  ;;  %v2207_v21 = vrot.slane %v10022_v31, 1 }
 0x45f   : > { %v7237_v12 = vsel %vm511_vm1, %v2486_v52, %v2487_v38  ;;  %v2494_v52 = vrot.slane %v7258_v53, 1 }
 0x460   : > { %v7287_v9 = vsel %vm321_vm0, %v2207_v21, %v6936_v51  ;;  %v2497_v51 = vrot.slane %v6990_v37, 1 }
 0x461   : > { %10026 = vst [vmem:[#allocation149_spill] sm:$0xff] %v7287_v9  ;;  %v2496_v20 = vrot.slane %v7287_v9, 1 }
 0x462   : > { %2627 = vrot.lane.b32.xlu2 %v7191_v50, %s4297_s24  ;;  %v2586_v50 = vrot.slane %v7220_v0, 1 }
 0x463   : > { %2623 = vrot.lane.b32.xlu0 %v7178_v45, %s4297_s24  ;;  %2631 = vrot.lane.b32.xlu1 %v7194_v43, %s4297_s24  ;;  %v9357_v43 = vrot.slane %v7217_v13, 1  ;;  %v7229_v45 = vsel %vm511_vm1, %v2476_v61, %v2477_v2  ;;  %v7254_v2 = vsel %vm321_vm0, %v6924_v28, %v2348_v8  ;;  %v10023_v28 = vmax.f32 %v6807_v57, 0.0 }
 0x464   : > { %v2489_v61 = vrot.slane %v7254_v2, 1 }
 0x465   : > { %v7246_v41 = vsel %vm511_vm1, %v9357_v43, %v2586_v50  ;;  %v2206_v50 = vrot.slane %v10021_v34, 1  ;;  %v2208_v8 = vrot.slane %v10023_v28, 1  ;;  %v7283_v34 = vsel %vm511_vm1, %v2492_v63, %v2494_v52  ;;  %v10037_v43 = vld [vmem:[#allocation122_spill] sm:$0xff] }
 0x466   : > { %10020 = vst [vmem:[#allocation92_spill] sm:$0xff] %v7246_v41  ;;  %v7280_v54 = vsel %vm511_vm1, %v2487_v38, %v2489_v61  ;;  %v10029_v61 = vld [vmem:[#allocation69_spill] sm:$0xff]  ;;  %v2509_v0 = vrot.slane %v10037_v43, 2  ;;  %v10042_v41 = vld [vmem:[#allocation154_spill] sm:$0xff] }
 0x467   : > { %v7275_v4 = vsel %vm321_vm0, %v2206_v50, %v6928_v18  ;;  %10025 = vst [vmem:[#allocation127_spill] sm:$0xff] %v7283_v34  ;;  %v7291_v57 = vsel %vm321_vm0, %v2208_v8, %v6944_v6  ;;  %v10028_v18 = vmax.f32 %v6804_v36, 0.0  ;;  %v2502_v6 = vrot.slane %v6995_v14, 1  ;;  %v10034_v8 = vld [vmem:[#allocation84_spill] sm:$0xff] }
 0x468   : > { %10024 = vst [vmem:[#allocation128_spill] sm:$0xff] %v7275_v4  ;;  %v2491_v38 = vrot.slane %v7275_v4, 1  ;;  %v2501_v50 = vrot.slane %v7291_v57, 1  ;;  %v10030_v52 = vmax.f32 %v10029_v61, 0.0  ;;  %v7312_v36 = vsel %vm511_vm1, %v2496_v20, %v2497_v51 }
 0x469   : > { %10027 = vst [vmem:[#allocation170_spill] sm:$0xff] %v7291_v57  ;;  %v2350_v39 = vrot.slane %v10028_v18, 5 }
 0x46a   : > { %2633 = vrot.lane.b32.xlu2 %v7234_v26, %s4297_s24  ;;  %v2351_v31 = vrot.slane %v10030_v52, 5  ;;  %v7307_v21 = vsel %vm511_vm1, %v2491_v38, %v2492_v63  ;;  %10032 = vst [vmem:[#allocation196_spill] sm:$0xff] %v7312_v36  ;;  %v7315_v28 = vsel %vm511_vm1, %v2501_v50, %v2502_v6  ;;  %v10035_v63 = vld [vmem:[#allocation4_spill] sm:$0xff]  ;;  %v10036_v50 = vld [vmem:[#allocation83_spill] sm:$0xff] }
 0x46b   : > { %2629 = vrot.lane.b32.xlu0 %v7229_v45, %s4297_s24  ;;  %2637 = vrot.lane.b32.xlu1 %v7237_v12, %s4297_s24  ;;  %10031 = vst [vmem:[#allocation188_spill] sm:$0xff] %v7307_v21  ;;  %v7319_v18 = vsel %vm321_vm0, %v10034_v8, %v2350_v39  ;;  %v2507_v52 = vrot.slane %v10036_v50, 2 }
 0x46c   : > { %10033 = vst [vmem:[#allocation94_spill] sm:$0xff] %v7315_v28  ;;  %v7327_v38 = vsel %vm321_vm0, %v10035_v63, %v2351_v31  ;;  %v2499_v20 = vrot.slane %v7319_v18, 1  ;;  %v10041_v63 = vld [vmem:[#allocation88_spill] sm:$0xff] }
 0x46d   : > { %v2504_v61 = vrot.slane %v7327_v38, 1  ;;  %v7342_v31 = vsel %vm587_vm2, %v2507_v52, %v2509_v0  ;;  %v2506_v43 = vrot.slane %v10041_v63, 2 }
 0x46e   : > { %v7334_v39 = vsel %vm511_vm1, %v2497_v51, %v2499_v20  ;;  %10040 = vst [vmem:[#allocation129_spill] sm:$0xff] %v7342_v31  ;;  %v2511_v51 = vrot.slane %v10042_v41, 2  ;;  %v2512_v20 = vrot.slane %v6844_v29, 2 }
 0x46f   : > { %10038 = vst [vmem:[#allocation15_spill] sm:$0xff] %v7334_v39  ;;  %v7339_v8 = vsel %vm511_vm1, %v2502_v6, %v2504_v61  ;;  %v7354_v61 = vsel %vm587_vm2, %v2506_v43, %v2507_v52  ;;  %v2519_v52 = vrot.slane %v7012_v30, 2  ;;  %v2522_v43 = vrot.slane %v7002_v16, 2 }
 0x470   : > { %10039 = vst [vmem:[#allocation110_spill] sm:$0xff] %v7339_v8  ;;  %v7359_v0 = vsel %vm587_vm2, %v2511_v51, %v2512_v20  ;;  %v2521_v30 = vrot.slane %v7038_v59, 2 }
 0x471   : > { %10045 = vst [vmem:[#allocation142_spill] sm:$0xff] %v7354_v61 }
 0x472   : > { %2639 = vrot.lane.b32.xlu2 %v7280_v54, %s4297_s24  ;;  %10046 = vst [vmem:[#allocation161_spill] sm:$0xff] %v7359_v0 }
 0x473   : > { %2635 = vrot.lane.b32.xlu0 %v7271_v17, %s4297_s24  ;;  %2643 = vrot.lane.b32.xlu1 %v7283_v34, %s4297_s24  ;;  %v10044_v34 = vld [vmem:[#allocation112_spill] sm:$0xff] }
 0x474   : > { %v2517_v6 = vrot.slane %v10044_v34, 2 }
 0x47a   : > { %2645 = vrot.lane.b32.xlu2 %v7312_v36, %s4297_s24  ;;  %v10048_v36 = vld [vmem:[#allocation70_spill] sm:$0xff] }
 0x47b   : > { %2641 = vrot.lane.b32.xlu0 %v7307_v21, %s4297_s24  ;;  %2649 = vrot.lane.b32.xlu1 %v7315_v28, %s4297_s24  ;;  %v10043_v28 = vld [vmem:[#allocation144_spill] sm:$0xff] }
 0x482   : > { %2651 = vrot.lane.b32.xlu2 %v7339_v8, %s4297_s24  ;;  %v2514_v8 = vrot.slane %v7008_v5, 2 }
 0x483   : > { %2647 = vrot.lane.b32.xlu0 %v7334_v39, %s4297_s24  ;;  %2685 = vrot.lane.b32.xlu1 %v7342_v31, %s4298_s25  ;;  %v2516_v39 = vrot.slane %v10043_v28, 2 }
 0x484   : > { %v7373_v51 = vsel %vm587_vm2, %v2512_v20, %v2514_v8  ;;  %v2527_v8 = vrot.slane %v7035_v47, 2  ;;  %v2531_v20 = vrot.slane %v7055_v22, 2 }
 0x485   : > { %v7362_v31 = vsel %vm587_vm2, %v2516_v39, %v2517_v6  ;;  %v7378_v39 = vsel %vm587_vm2, %v2517_v6, %v2519_v52  ;;  %v10052_v6 = vld [vmem:[#allocation124_spill] sm:$0xff] }
 0x486   : > { %10047 = vst [vmem:[#allocation51_spill] sm:$0xff] %v7362_v31  ;;  %v2532_v52 = vrot.slane %v10052_v6, 2 }
 0x487   : > { %10049 = vst [vmem:[#allocation178_spill] sm:$0xff] %v7378_v39 }
 0x489   : > { %v7385_v5 = vpop.permute.xlu2 %2597 }
 0x48a   : > { %2687 = vrot.lane.b32.xlu2 %v7359_v0, %s4298_s25  ;;  %10051 = vst [vmem:[#allocation44_spill] sm:$0xff] %v7385_v5 }
 0x48b   : > { %2683 = vrot.lane.b32.xlu0 %v7354_v61, %s4298_s25  ;;  %2691 = vrot.lane.b32.xlu1 %v7362_v31, %s4298_s25  ;;  %v2524_v61 = vrot.slane %v10048_v36, 2  ;;  %v2526_v36 = vrot.slane %v7052_v55, 2 }
 0x48d   : > { %v7381_v0 = vsel %vm587_vm2, %v2522_v43, %v2524_v61  ;;  %v7395_v61 = vsel %vm587_vm2, %v2521_v30, %v2522_v43  ;;  %v7400_v5 = vsel %vm587_vm2, %v2526_v36, %v2527_v8  ;;  %v2529_v43 = vrot.slane %v7084_v46, 2 }
 0x48e   : > { %10050 = vst [vmem:[#allocation197_spill] sm:$0xff] %v7381_v0  ;;  %v2534_v30 = vrot.slane %v7094_v44, 2  ;;  %v2539_v36 = vrot.slane %v7097_v3, 2  ;;  %v2536_v3 = vrot.slane %v7110_v25, 2 }
 0x48f   : > { %10053 = vst [vmem:[#allocation33_spill] sm:$0xff] %v7395_v61  ;;  %v7416_v31 = vsel %vm587_vm2, %v2527_v8, %v2529_v43  ;;  %v2541_v8 = vrot.slane %v7124_v15, 2  ;;  %v2546_v43 = vrot.slane %v7127_v40, 2 }
 0x490   : > { %10056 = vst [vmem:[#allocation79_spill] sm:$0xff] %v7416_v31 }
 0x492   : > { %2693 = vrot.lane.b32.xlu2 %v7378_v39, %s4298_s25 }
 0x493   : > { %2689 = vrot.lane.b32.xlu0 %v7373_v51, %s4298_s25  ;;  %2697 = vrot.lane.b32.xlu1 %v7381_v0, %s4298_s25  ;;  %v7403_v0 = vsel %vm587_vm2, %v2531_v20, %v2532_v52  ;;  %v7421_v20 = vsel %vm587_vm2, %v2532_v52, %v2534_v30  ;;  %v2542_v52 = vrot.slane %v7107_v42, 2  ;;  %v2547_v30 = vrot.slane %v7121_v33, 2 }
 0x494   : > { %10054 = vst [vmem:[#allocation81_spill] sm:$0xff] %v7403_v0 }
 0x495   : > { %10057 = vst [vmem:[#allocation12_spill] sm:$0xff] %v7421_v20 }
 0x49a   : > { %2699 = vrot.lane.b32.xlu2 %v7400_v5, %s4298_s25 }
 0x49b   : > { %2695 = vrot.lane.b32.xlu0 %v7395_v61, %s4298_s25  ;;  %2703 = vrot.lane.b32.xlu1 %v7403_v0, %s4298_s25  ;;  %v2537_v61 = vrot.slane %v7087_v23, 2  ;;  %v7430_v46 = vpop.permute.xlu1 %2595 }
 0x49c   : > { %v7409_v39 = vpop.permute.xlu2 %2603  ;;  %10059 = vst [vmem:[#allocation45_spill] sm:$0xff] %v7430_v46  ;;  %v2554_v46 = vrot.slane %v7163_v48, 2  ;;  %v2551_v48 = vrot.slane %v7182_v11, 2 }
 0x49d   : > { %10055 = vst [vmem:[#allocation96_spill] sm:$0xff] %v7409_v39  ;;  %v7424_v0 = vsel %vm587_vm2, %v2537_v61, %v2539_v36  ;;  %v7440_v36 = vsel %vm587_vm2, %v2536_v3, %v2537_v61  ;;  %v7445_v39 = vsel %vm587_vm2, %v2541_v8, %v2542_v52  ;;  %v2544_v61 = vrot.slane %v7152_v32, 2 }
 0x49e   : > { %10058 = vst [vmem:[#allocation111_spill] sm:$0xff] %v7424_v0  ;;  %v2549_v8 = vrot.slane %v7159_v62, 2 }
 0x49f   : > { %10061 = vst [vmem:[#allocation143_spill] sm:$0xff] %v7440_v36 }
 0x4a0   : > { %10062 = vst [vmem:[#allocation162_spill] sm:$0xff] %v7445_v39 }
 0x4a2   : > { %2705 = vrot.lane.b32.xlu2 %v7421_v20, %s4298_s25 }
 0x4a3   : > { %2701 = vrot.lane.b32.xlu0 %v7416_v31, %s4298_s25  ;;  %2709 = vrot.lane.b32.xlu1 %v7424_v0, %s4298_s25  ;;  %v7450_v0 = vsel %vm587_vm2, %v2546_v43, %v2547_v30  ;;  %v7465_v43 = vsel %vm587_vm2, %v2542_v52, %v2544_v61  ;;  %v2557_v61 = vrot.slane %v6973_v7, 2  ;;  %v2567_v31 = vrot.slane %v6985_v19, 2 }
 0x4a4   : > { %v7432_v44 = vpop.permute.xlu2 %2609  ;;  %10064 = vst [vmem:[#allocation189_spill] sm:$0xff] %v7450_v0 }
 0x4a5   : > { %10060 = vst [vmem:[#allocation118_spill] sm:$0xff] %v7432_v44  ;;  %v7447_v44 = vpop.permute.xlu0 %2593 }
 0x4a6   : > { %10063 = vst [vmem:[#allocation171_spill] sm:$0xff] %v7447_v44 }
 0x4a7   : > { %10067 = vst [vmem:[#allocation215_spill] sm:$0xff] %v7465_v43 }
 0x4aa   : > { %2711 = vrot.lane.b32.xlu2 %v7445_v39, %s4298_s25  ;;  %v7470_v39 = vsel %vm587_vm2, %v2547_v30, %v2549_v8  ;;  %v2556_v30 = vrot.slane %v7186_v27, 2  ;;  %v2562_v8 = vrot.slane %v6978_v60, 2 }
 0x4ab   : > { %2707 = vrot.lane.b32.xlu0 %v7440_v36, %s4298_s25  ;;  %2715 = vrot.lane.b32.xlu1 %v7450_v0, %s4298_s25  ;;  %v2552_v36 = vrot.slane %v6968_v56, 2  ;;  %10068 = vst [vmem:[#allocation32_spill] sm:$0xff] %v7470_v39 }
 0x4ac   : > { %v7456_v20 = vpop.permute.xlu2 %2615  ;;  %v7459_v3 = vpop.permute.xlu1 %2601 }
 0x4ad   : > { %10065 = vst [vmem:[#allocation90_spill] sm:$0xff] %v7456_v20  ;;  %v7473_v20 = vsel %vm587_vm2, %v2552_v36, %v2554_v46  ;;  %v2561_v46 = vrot.slane %v7198_v35, 2 }
 0x4ae   : > { %10066 = vst [vmem:[#allocation204_spill] sm:$0xff] %v7459_v3  ;;  %v7496_v3 = vsel %vm587_vm2, %v2556_v30, %v2557_v61  ;;  %v2564_v30 = vrot.slane %v7254_v2, 2 }
 0x4b2   : > { %2717 = vrot.lane.b32.xlu2 %v7470_v39, %s4298_s25 }
 0x4b3   : > { %2713 = vrot.lane.b32.xlu0 %v7465_v43, %s4298_s25  ;;  %2721 = vrot.lane.b32.xlu1 %v7473_v20, %s4298_s25  ;;  %v7491_v43 = vsel %vm587_vm2, %v2551_v48, %v2552_v36  ;;  %v2559_v36 = vrot.slane %v7241_v10, 2 }
 0x4b4   : > { %v7481_v62 = vpop.permute.xlu2 %2621 }
 0x4b5   : > { %v7479_v32 = vpop.permute.xlu0 %2599  ;;  %10070 = vst [vmem:[#allocation86_spill] sm:$0xff] %v7481_v62  ;;  %v7484_v52 = vpop.permute.xlu1 %2607  ;;  %v7499_v62 = vsel %vm587_vm2, %v2561_v46, %v2562_v8  ;;  %v2569_v46 = vrot.slane %v7258_v53, 2  ;;  %v7516_v44 = vsel %vm587_vm2, %v2557_v61, %v2559_v36  ;;  %v2566_v53 = vrot.slane %v7275_v4, 2 }
 0x4b6   : > { %10069 = vst [vmem:[#allocation65_spill] sm:$0xff] %v7479_v32  ;;  %v2572_v36 = vrot.slane %v6990_v37, 2 }
 0x4b7   : > { %10071 = vst [vmem:[#allocation105_spill] sm:$0xff] %v7484_v52 }
 0x4ba   : > { %2723 = vrot.lane.b32.xlu2 %v7496_v3, %s4298_s25 }
 0x4bb   : > { %2719 = vrot.lane.b32.xlu0 %v7491_v43, %s4298_s25  ;;  %2727 = vrot.lane.b32.xlu1 %v7499_v62, %s4298_s25 }
 0x4bc   : > { %v7507_v32 = vpop.permute.xlu2 %2627 }
 0x4bd   : > { %v7505_v52 = vpop.permute.xlu0 %2605  ;;  %10073 = vst [vmem:[#allocation11_spill] sm:$0xff] %v7507_v32  ;;  %v7510_v48 = vpop.permute.xlu1 %2613  ;;  %v7524_v32 = vsel %vm587_vm2, %v2567_v31, %v2569_v46  ;;  %v2577_v46 = vrot.slane %v6995_v14, 2 }
 0x4be   : > { %10072 = vst [vmem:[#allocation98_spill] sm:$0xff] %v7505_v52  ;;  %v7521_v52 = vsel %vm587_vm2, %v2562_v8, %v2564_v30  ;;  %v2571_v8 = vrot.slane %v7287_v9, 2  ;;  %v2576_v30 = vrot.slane %v7291_v57, 2 }
 0x4bf   : > { %10074 = vst [vmem:[#allocation97_spill] sm:$0xff] %v7510_v48  ;;  %v7542_v48 = vsel %vm587_vm2, %v2566_v53, %v2567_v31  ;;  %v2574_v31 = vrot.slane %v7319_v18, 2 }
 0x4c0   : > { %10075 = vst [vmem:[#allocation42_spill] sm:$0xff] %v7524_v32 }
 0x4c1   : > { %10079 = vst [vmem:[#allocation172_spill] sm:$0xff] %v7542_v48 }
 0x4c2   : > { %2729 = vrot.lane.b32.xlu2 %v7521_v52, %s4298_s25 }
 0x4c3   : > { %2725 = vrot.lane.b32.xlu0 %v7516_v44, %s4298_s25  ;;  %2733 = vrot.lane.b32.xlu1 %v7524_v32, %s4298_s25 }
 0x4c4   : > { %v7532_v2 = vpop.permute.xlu2 %2633 }
 0x4c5   : > { %v7530_v10 = vpop.permute.xlu0 %2611  ;;  %10077 = vst [vmem:[#allocation130_spill] sm:$0xff] %v7532_v2  ;;  %v7535_v61 = vpop.permute.xlu1 %2619  ;;  %v7550_v2 = vsel %vm587_vm2, %v2576_v30, %v2577_v46 }
 0x4c6   : > { %10076 = vst [vmem:[#allocation131_spill] sm:$0xff] %v7530_v10  ;;  %v7547_v10 = vsel %vm587_vm2, %v2571_v8, %v2572_v36  ;;  %v2579_v8 = vrot.slane %v7327_v38, 2 }
 0x4c7   : > { %10078 = vst [vmem:[#allocation152_spill] sm:$0xff] %v7535_v61 }
 0x4c8   : > { %10080 = vst [vmem:[#allocation190_spill] sm:$0xff] %v7547_v10  ;;  %v7570_v30 = vsel %vm587_vm2, %v2577_v46, %v2579_v8 }
 0x4c9   : > { %10081 = vst [vmem:[#allocation198_spill] sm:$0xff] %v7550_v2 }
 0x4ca   : > { %2735 = vrot.lane.b32.xlu2 %v7547_v10, %s4298_s25  ;;  %10086 = vst [vmem:[#allocation78_spill] sm:$0xff] %v7570_v30 }
 0x4cb   : > { %2731 = vrot.lane.b32.xlu0 %v7542_v48, %s4298_s25  ;;  %2739 = vrot.lane.b32.xlu1 %v7550_v2, %s4298_s25  ;;  %v7565_v48 = vsel %vm587_vm2, %v2572_v36, %v2574_v31 }
 0x4cc   : > { %v7558_v32 = vpop.permute.xlu2 %2639  ;;  %10085 = vst [vmem:[#allocation68_spill] sm:$0xff] %v7565_v48 }
 0x4cd   : > { %v7556_v61 = vpop.permute.xlu0 %2617  ;;  %10083 = vst [vmem:[#allocation207_spill] sm:$0xff] %v7558_v32  ;;  %v7561_v53 = vpop.permute.xlu1 %2625 }
 0x4ce   : > { %10082 = vst [vmem:[#allocation208_spill] sm:$0xff] %v7556_v61 }
 0x4cf   : > { %10084 = vst [vmem:[#allocation35_spill] sm:$0xff] %v7561_v53 }
 0x4d2   : > { %2741 = vrot.lane.b32.xlu2 %v7570_v30, %s4298_s25 }
 0x4d3   : > { %2737 = vrot.lane.b32.xlu0 %v7565_v48, %s4298_s25  ;;  %2775 = vrot.lane.b32.xlu1 %v6844_v29, %s4299_s26 }
 0x4d4   : > { %v7578_v61 = vpop.permute.xlu2 %2645 }
 0x4d5   : > { %v7576_v18 = vpop.permute.xlu0 %2623  ;;  %10088 = vst [vmem:[#allocation99_spill] sm:$0xff] %v7578_v61  ;;  %v7580_v38 = vpop.permute.xlu1 %2631 }
 0x4d6   : > { %10087 = vst [vmem:[#allocation217_spill] sm:$0xff] %v7576_v18 }
 0x4d7   : > { %10089 = vst [vmem:[#allocation24_spill] sm:$0xff] %v7580_v38 }
 0x4da   : > { %2777 = vrot.lane.b32.xlu2 %v10041_v63, %s4299_s26 }
 0x4db   : > { %2773 = vrot.lane.b32.xlu0 %v10042_v41, %s4299_s26  ;;  %2781 = vrot.lane.b32.xlu1 %v10043_v28, %s4299_s26 }
 0x4dc   : > { %v7590_v46 = vpop.permute.xlu2 %2651 }
 0x4dd   : > { %v7588_v36 = vpop.permute.xlu0 %2629  ;;  %10091 = vst [vmem:[#allocation41_spill] sm:$0xff] %v7590_v46  ;;  %v7592_v31 = vpop.permute.xlu1 %2637 }
 0x4de   : > { %10090 = vst [vmem:[#allocation113_spill] sm:$0xff] %v7588_v36 }
 0x4df   : > { %10092 = vst [vmem:[#allocation132_spill] sm:$0xff] %v7592_v31 }
 0x4e2   : > { %2783 = vrot.lane.b32.xlu2 %v10044_v34, %s4299_s26 }
 0x4e3   : > { %2779 = vrot.lane.b32.xlu0 %v10036_v50, %s4299_s26  ;;  %2787 = vrot.lane.b32.xlu1 %v7002_v16, %s4299_s26 }
 0x4e4   : > { %v7602_v61 = vpop.permute.xlu2 %2687 }
 0x4e5   : > { %v7600_v8 = vpop.permute.xlu0 %2635  ;;  %v7604_v32 = vpop.permute.xlu1 %2643 }
 0x4e6   : > { %10093 = vst [vmem:[#allocation145_spill] sm:$0xff] %v7600_v8 }
 0x4e7   : > { %10094 = vst [vmem:[#allocation163_spill] sm:$0xff] %v7604_v32 }
 0x4ea   : > { %2789 = vrot.lane.b32.xlu2 %v7052_v55, %s4299_s26 }
 0x4eb   : > { %2785 = vrot.lane.b32.xlu0 %v7038_v59, %s4299_s26  ;;  %2793 = vrot.lane.b32.xlu1 %v7055_v22, %s4299_s26 }
 0x4ec   : > { %v7614_v31 = vpop.permute.xlu2 %2693 }
 0x4ed   : > { %v7612_v46 = vpop.permute.xlu0 %2641  ;;  %10096 = vst [vmem:[#allocation181_spill] sm:$0xff] %v7614_v31  ;;  %v7616_v30 = vpop.permute.xlu1 %2649 }
 0x4ee   : > { %10095 = vst [vmem:[#allocation61_spill] sm:$0xff] %v7612_v46 }
 0x4ef   : > { %10097 = vst [vmem:[#allocation199_spill] sm:$0xff] %v7616_v30 }
 0x4f2   : > { %2795 = vrot.lane.b32.xlu2 %v10052_v6, %s4299_s26 }
 0x4f3   : > { %2791 = vrot.lane.b32.xlu0 %v7035_v47, %s4299_s26  ;;  %2799 = vrot.lane.b32.xlu1 %v7087_v23, %s4299_s26 }
 0x4f4   : > { %v7626_v8 = vpop.permute.xlu2 %2699 }
 0x4f5   : > { %v7624_v32 = vpop.permute.xlu0 %2647  ;;  %10099 = vst [vmem:[#allocation20_spill] sm:$0xff] %v7626_v8  ;;  %v7628_v2 = vpop.permute.xlu1 %2685 }
 0x4f6   : > { %10098 = vst [vmem:[#allocation209_spill] sm:$0xff] %v7624_v32 }
 0x4fa   : > { %2801 = vrot.lane.b32.xlu2 %v7124_v15, %s4299_s26 }
 0x4fb   : > { %2797 = vrot.lane.b32.xlu0 %v7110_v25, %s4299_s26  ;;  %2805 = vrot.lane.b32.xlu1 %v7127_v40, %s4299_s26 }
 0x4fc   : > { %v7638_v46 = vpop.permute.xlu2 %2705 }
 0x4fd   : > { %v7636_v30 = vpop.permute.xlu0 %2683  ;;  %10100 = vst [vmem:[#allocation39_spill] sm:$0xff] %v7638_v46  ;;  %v7640_v38 = vpop.permute.xlu1 %2691 }
 0x4fe   : > { %10101 = vst [vmem:[#allocation40_spill] sm:$0xff] %v7640_v38 }
 0x502   : > { %2807 = vrot.lane.b32.xlu2 %v7121_v33, %s4299_s26 }
 0x503   : > { %2803 = vrot.lane.b32.xlu0 %v7107_v42, %s4299_s26  ;;  %2811 = vrot.lane.b32.xlu1 %v6968_v56, %s4299_s26  ;;  %v10143_v42 = vld [vmem:[#allocation169_spill] sm:$0xff] }
 0x504   : > { %v7650_v8 = vpop.permute.xlu2 %2711 }
 0x505   : > { %v7648_v32 = vpop.permute.xlu0 %2689  ;;  %v7652_v36 = vpop.permute.xlu1 %2697 }
 0x506   : > { %10102 = vst [vmem:[#allocation85_spill] sm:$0xff] %v7652_v36 }
 0x50a   : > { %2813 = vrot.lane.b32.xlu2 %v7186_v27, %s4299_s26 }
 0x50b   : > { %2809 = vrot.lane.b32.xlu0 %v7182_v11, %s4299_s26  ;;  %2817 = vrot.lane.b32.xlu1 %v7198_v35, %s4299_s26 }
 0x50c   : > { %v7662_v48 = vpop.permute.xlu2 %2717 }
 0x50d   : > { %v7660_v46 = vpop.permute.xlu0 %2695  ;;  %10104 = vst [vmem:[#allocation82_spill] sm:$0xff] %v7662_v48  ;;  %v7664_v31 = vpop.permute.xlu1 %2703 }
 0x50e   : > { %10103 = vst [vmem:[#allocation101_spill] sm:$0xff] %v7660_v46 }
 0x50f   : > { %10105 = vst [vmem:[#allocation17_spill] sm:$0xff] %v7664_v31 }
 0x512   : > { %2819 = vrot.lane.b32.xlu2 %v6978_v60, %s4299_s26 }
 0x513   : > { %2815 = vrot.lane.b32.xlu0 %v6973_v7, %s4299_s26  ;;  %2823 = vrot.lane.b32.xlu1 %v6985_v19, %s4299_s26 }
 0x514   : > { %v7674_v33 = vpop.permute.xlu2 %2723 }
 0x515   : > { %v7672_v36 = vpop.permute.xlu0 %2701  ;;  %10107 = vst [vmem:[#allocation54_spill] sm:$0xff] %v7674_v33  ;;  %v7676_v10 = vpop.permute.xlu1 %2709  ;;  %v10114_v33 = vmax.f32 %v6813_v58, 0.0 }
 0x516   : > { %10106 = vst [vmem:[#allocation114_spill] sm:$0xff] %v7672_v36 }
 0x517   : > { %10108 = vst [vmem:[#allocation121_spill] sm:$0xff] %v7676_v10 }
 0x51a   : > { %2825 = vrot.lane.b32.xlu2 %v7287_v9, %s4299_s26 }
 0x51b   : > { %2821 = vrot.lane.b32.xlu0 %v7275_v4, %s4299_s26  ;;  %2829 = vrot.lane.b32.xlu1 %v7291_v57, %s4299_s26 }
 0x51c   : > { %v7686_v46 = vpop.permute.xlu2 %2729 }
 0x51d   : > { %v7684_v31 = vpop.permute.xlu0 %2707  ;;  %10110 = vst [vmem:[#allocation164_spill] sm:$0xff] %v7686_v46  ;;  %v7688_v48 = vpop.permute.xlu1 %2715 }
 0x51e   : > { %10109 = vst [vmem:[#allocation146_spill] sm:$0xff] %v7684_v31  ;;  %v2209_v31 = vrot.slane %v10114_v33, 1  ;;  %v10122_v33 = vld [vmem:[#allocation157_spill] sm:$0xff] }
 0x51f   : > { %10111 = vst [vmem:[#allocation173_spill] sm:$0xff] %v7688_v48 }
 0x520   : > { %v7706_v46 = vsel %vm321_vm0, %v2209_v31, %v7206_v1  ;;  %v10123_v1 = vld [vmem:[#allocation153_spill] sm:$0xff]  ;;  %v10124_v31 = vld [vmem:[#allocation184_spill] sm:$0xff] }
 0x521   : > { %10116 = vst [vmem:[#allocation10_spill] sm:$0xff] %v7706_v46 }
 0x522   : > { %2831 = vrot.lane.b32.xlu2 %v6995_v14, %s4299_s26  ;;  %v10117_v14 = vld [vmem:[#allocation182_spill] sm:$0xff] }
 0x523   : > { %2827 = vrot.lane.b32.xlu0 %v6990_v37, %s4299_s26  ;;  %2835 = vrot.lane.b32.xlu1 %v7217_v13, %s4299_s26  ;;  %v10118_v37 = vld [vmem:[#allocation123_spill] sm:$0xff] }
 0x524   : > { %v7698_v36 = vpop.permute.xlu2 %2735 }
 0x525   : > { %v7696_v10 = vpop.permute.xlu0 %2713  ;;  %10113 = vst [vmem:[#allocation191_spill] sm:$0xff] %v7698_v36  ;;  %v7702_v57 = vpop.permute.xlu1 %2721 }
 0x526   : > { %10112 = vst [vmem:[#allocation192_spill] sm:$0xff] %v7696_v10 }
 0x527   : > { %10115 = vst [vmem:[#allocation206_spill] sm:$0xff] %v7702_v57 }
 0x52a   : > { %2869 = vrot.lane.b32.xlu2 %v10117_v14, %s4300_s27 }
 0x52b   : > { %2833 = vrot.lane.b32.xlu0 %v7706_v46, %s4299_s26  ;;  %2873 = vrot.lane.b32.xlu1 %v10118_v37, %s4300_s27 }
 0x52c   : > { %v7716_v36 = vpop.permute.xlu2 %2741 }
 0x52d   : > { %v7714_v38 = vpop.permute.xlu0 %2719  ;;  %10120 = vst [vmem:[#allocation71_spill] sm:$0xff] %v7716_v36  ;;  %v7718_v58 = vpop.permute.xlu1 %2727  ;;  %v10128_v36 = vld [vmem:[#allocation167_spill] sm:$0xff] }
 0x52e   : > { %10119 = vst [vmem:[#allocation48_spill] sm:$0xff] %v7714_v38  ;;  %v10127_v38 = vld [vmem:[#allocation183_spill] sm:$0xff] }
 0x52f   : > { %10121 = vst [vmem:[#allocation91_spill] sm:$0xff] %v7718_v58 }
 0x532   : > { %2875 = vrot.lane.b32.xlu2 %v10123_v1, %s4300_s27 }
 0x533   : > { %2871 = vrot.lane.b32.xlu0 %v10122_v33, %s4300_s27  ;;  %2879 = vrot.lane.b32.xlu1 %v10124_v31, %s4300_s27  ;;  %v10129_v33 = vld [vmem:[#allocation185_spill] sm:$0xff] }
 0x534   : > { %v7728_v14 = vpop.permute.xlu2 %2777 }
 0x535   : > { %v7726_v57 = vpop.permute.xlu0 %2725  ;;  %v7730_v9 = vpop.permute.xlu1 %2733 }
 0x536   : > { %10125 = vst [vmem:[#allocation218_spill] sm:$0xff] %v7726_v57  ;;  %v10133_v57 = vld [vmem:[#allocation87_spill] sm:$0xff] }
 0x537   : > { %10126 = vst [vmem:[#allocation103_spill] sm:$0xff] %v7730_v9  ;;  %v10134_v9 = vld [vmem:[#allocation159_spill] sm:$0xff] }
 0x53a   : > { %2881 = vrot.lane.b32.xlu2 %v10128_v36, %s4300_s27 }
 0x53b   : > { %2877 = vrot.lane.b32.xlu0 %v10127_v38, %s4300_s27  ;;  %2885 = vrot.lane.b32.xlu1 %v10129_v33, %s4300_s27 }
 0x53c   : > { %v7740_v23 = vpop.permute.xlu2 %2783 }
 0x53d   : > { %v7738_v58 = vpop.permute.xlu0 %2731  ;;  %10131 = vst [vmem:[#allocation102_spill] sm:$0xff] %v7740_v23  ;;  %v7742_v19 = vpop.permute.xlu1 %2739 }
 0x53e   : > { %10130 = vst [vmem:[#allocation28_spill] sm:$0xff] %v7738_v58  ;;  %v10137_v58 = vld [vmem:[#allocation73_spill] sm:$0xff] }
 0x53f   : > { %10132 = vst [vmem:[#allocation49_spill] sm:$0xff] %v7742_v19  ;;  %v10138_v19 = vld [vmem:[#allocation108_spill] sm:$0xff] }
 0x542   : > { %2887 = vrot.lane.b32.xlu2 %v7104_v24, %s4300_s27 }
 0x543   : > { %2883 = vrot.lane.b32.xlu0 %v10133_v57, %s4300_s27  ;;  %2891 = vrot.lane.b32.xlu1 %v10134_v9, %s4300_s27  ;;  %v10146_v9 = vld [vmem:[#allocation115_spill] sm:$0xff] }
 0x544   : > { %v7752_v40 = vpop.permute.xlu2 %2789 }
 0x545   : > { %v7750_v48 = vpop.permute.xlu0 %2737  ;;  %10136 = vst [vmem:[#allocation133_spill] sm:$0xff] %v7752_v40  ;;  %v7754_v53 = vpop.permute.xlu1 %2775  ;;  %v10142_v40 = vld [vmem:[#allocation140_spill] sm:$0xff] }
 0x546   : > { %10135 = vst [vmem:[#allocation134_spill] sm:$0xff] %v7750_v48  ;;  %v10141_v48 = vld [vmem:[#allocation158_spill] sm:$0xff] }
 0x54a   : > { %2893 = vrot.lane.b32.xlu2 %v7141_v49, %s4300_s27 }
 0x54b   : > { %2889 = vrot.lane.b32.xlu0 %v10137_v58, %s4300_s27  ;;  %2897 = vrot.lane.b32.xlu1 %v10138_v19, %s4300_s27 }
 0x54c   : > { %v7764_v25 = vpop.permute.xlu2 %2795 }
 0x54d   : > { %v7762_v23 = vpop.permute.xlu0 %2773  ;;  %10139 = vst [vmem:[#allocation155_spill] sm:$0xff] %v7764_v25  ;;  %v7766_v10 = vpop.permute.xlu1 %2781 }
 0x54e   : > { %10140 = vst [vmem:[#allocation174_spill] sm:$0xff] %v7766_v10 }
 0x552   : > { %2899 = vrot.lane.b32.xlu2 %v10142_v40, %s4300_s27 }
 0x553   : > { %2895 = vrot.lane.b32.xlu0 %v10141_v48, %s4300_s27  ;;  %2903 = vrot.lane.b32.xlu1 %v10143_v42, %s4300_s27  ;;  %v10150_v48 = vld [vmem:[#allocation187_spill] sm:$0xff] }
 0x554   : > { %v7776_v49 = vpop.permute.xlu2 %2801 }
 0x555   : > { %v7774_v18 = vpop.permute.xlu0 %2779  ;;  %10144 = vst [vmem:[#allocation193_spill] sm:$0xff] %v7776_v49  ;;  %v7778_v19 = vpop.permute.xlu1 %2787 }
 0x556   : > { %10145 = vst [vmem:[#allocation200_spill] sm:$0xff] %v7778_v19 }
 0x55a   : > { %2905 = vrot.lane.b32.xlu2 %v7229_v45, %s4300_s27 }
 0x55b   : > { %2901 = vrot.lane.b32.xlu0 %v10146_v9, %s4300_s27  ;;  %2909 = vrot.lane.b32.xlu1 %v7234_v26, %s4300_s27 }
 0x55c   : > { %v7788_v40 = vpop.permute.xlu2 %2807 }
 0x55d   : > { %v7786_v25 = vpop.permute.xlu0 %2785  ;;  %10148 = vst [vmem:[#allocation210_spill] sm:$0xff] %v7788_v40  ;;  %v7790_v42 = vpop.permute.xlu1 %2793 }
 0x55e   : > { %10147 = vst [vmem:[#allocation211_spill] sm:$0xff] %v7786_v25 }
 0x55f   : > { %10149 = vst [vmem:[#allocation25_spill] sm:$0xff] %v7790_v42  ;;  %v10154_v42 = vld [vmem:[#allocation196_spill] sm:$0xff] }
 0x562   : > { %2911 = vrot.lane.b32.xlu2 %v7271_v17, %s4300_s27 }
 0x563   : > { %2907 = vrot.lane.b32.xlu0 %v10150_v48, %s4300_s27  ;;  %2915 = vrot.lane.b32.xlu1 %v7280_v54, %s4300_s27 }
 0x564   : > { %v7800_v9 = vpop.permute.xlu2 %2813 }
 0x565   : > { %v7798_v49 = vpop.permute.xlu0 %2791  ;;  %10152 = vst [vmem:[#allocation77_spill] sm:$0xff] %v7800_v9  ;;  %v7802_v19 = vpop.permute.xlu1 %2799  ;;  %v10160_v9 = vld [vmem:[#allocation110_spill] sm:$0xff] }
 0x566   : > { %10151 = vst [vmem:[#allocation72_spill] sm:$0xff] %v7798_v49  ;;  %v10158_v49 = vld [vmem:[#allocation127_spill] sm:$0xff] }
 0x567   : > { %10153 = vst [vmem:[#allocation219_spill] sm:$0xff] %v7802_v19  ;;  %v10159_v19 = vld [vmem:[#allocation15_spill] sm:$0xff] }
 0x56a   : > { %2917 = vrot.lane.b32.xlu2 %v7307_v21, %s4300_s27 }
 0x56b   : > { %2913 = vrot.lane.b32.xlu0 %v7237_v12, %s4300_s27  ;;  %2921 = vrot.lane.b32.xlu1 %v10154_v42, %s4300_s27 }
 0x56c   : > { %v7812_v40 = vpop.permute.xlu2 %2819 }
 0x56d   : > { %v7810_v25 = vpop.permute.xlu0 %2797  ;;  %10156 = vst [vmem:[#allocation27_spill] sm:$0xff] %v7812_v40  ;;  %v7814_v10 = vpop.permute.xlu1 %2805  ;;  %v10163_v40 = vld [vmem:[#allocation94_spill] sm:$0xff] }
 0x56e   : > { %10155 = vst [vmem:[#allocation104_spill] sm:$0xff] %v7810_v25  ;;  %v2583_v25 = vrot.slane %v7706_v46, 1  ;;  %v10168_v46 = vld [vmem:[#allocation161_spill] sm:$0xff] }
 0x56f   : > { %10157 = vst [vmem:[#allocation116_spill] sm:$0xff] %v7814_v10  ;;  %v10164_v10 = vrot.slane %v7217_v13, 1  ;;  %v10171_v13 = vld [vmem:[#allocation142_spill] sm:$0xff] }
 0x572   : > { %2923 = vrot.lane.b32.xlu2 %v10159_v19, %s4300_s27 }
 0x573   : > { %2919 = vrot.lane.b32.xlu0 %v10158_v49, %s4300_s27  ;;  %2927 = vrot.lane.b32.xlu1 %v10160_v9, %s4300_s27  ;;  %v7834_v49 = vsel %vm511_vm1, %v2583_v25, %v10164_v10 }
 0x574   : > { %v7824_v21 = vpop.permute.xlu2 %2825  ;;  %10165 = vst [vmem:[#allocation147_spill] sm:$0xff] %v7834_v49 }
 0x575   : > { %v7822_v4 = vpop.permute.xlu0 %2803  ;;  %10162 = vst [vmem:[#allocation135_spill] sm:$0xff] %v7824_v21  ;;  %v7826_v42 = vpop.permute.xlu1 %2811 }
 0x576   : > { %10161 = vst [vmem:[#allocation60_spill] sm:$0xff] %v7822_v4 }
 0x57a   : > { %2929 = vrot.lane.b32.xlu2 %v7834_v49, %s4300_s27 }
 0x57b   : > { %2925 = vrot.lane.b32.xlu0 %v10163_v40, %s4300_s27  ;;  %3061 = vrot.lane.b32.xlu1 %v10041_v63, %s4302_s29 }
 0x57c   : > { %v7842_v21 = vpop.permute.xlu2 %2831 }
 0x57d   : > { %v7840_v4 = vpop.permute.xlu0 %2809  ;;  %10166 = vst [vmem:[#allocation166_spill] sm:$0xff] %v7842_v21  ;;  %v7844_v9 = vpop.permute.xlu1 %2817 }
 0x57e   : > { %10167 = vst [vmem:[#allocation165_spill] sm:$0xff] %v7844_v9 }
 0x582   : > { %3151 = vrot.lane.b32.xlu2 %v10118_v37, %s4303_s30 }
 0x583   : > { %2965 = vrot.lane.b32.xlu0 %v10168_v46, %s4301_s28  ;;  %2967 = vrot.lane.b32.xlu1 %v7373_v51, %s4301_s28  ;;  %v10172_v46 = vld [vmem:[#allocation129_spill] sm:$0xff] }
 0x584   : > { %v7854_v10 = vpop.permute.xlu2 %2869 }
 0x585   : > { %v7852_v25 = vpop.permute.xlu0 %2815  ;;  %v7856_v49 = vpop.permute.xlu1 %2823 }
 0x586   : > { %10169 = vst [vmem:[#allocation80_spill] sm:$0xff] %v7852_v25 }
 0x587   : > { %10170 = vst [vmem:[#allocation201_spill] sm:$0xff] %v7856_v49 }
 0x58a   : > { %3063 = vrot.lane.b32.xlu2 %v10036_v50, %s4302_s29 }
 0x58b   : > { %3241 = vrot.lane.b32.xlu0 %v10171_v13, %s4304_s6  ;;  %3243 = vrot.lane.b32.xlu1 %v10172_v46, %s4304_s6 }
 0x58c   : > { %v7866_v37 = vpop.permute.xlu2 %2875 }
 0x58d   : > { %v7864_v21 = vpop.permute.xlu0 %2821  ;;  %v7868_v51 = vpop.permute.xlu1 %2829 }
 0x58e   : > { %10173 = vst [vmem:[#allocation212_spill] sm:$0xff] %v7864_v21 }
 0x58f   : > { %10174 = vst [vmem:[#allocation18_spill] sm:$0xff] %v7868_v51  ;;  %v10177_v51 = vld [vmem:[#allocation51_spill] sm:$0xff] }
 0x592   : > { %2969 = vrot.lane.b32.xlu2 %v10171_v13, %s4301_s28 }
 0x593   : > { %3153 = vrot.lane.b32.xlu0 %v10123_v1, %s4303_s30  ;;  %3155 = vrot.lane.b32.xlu1 %v10127_v38, %s4303_s30 }
 0x594   : > { %v7878_v9 = vpop.permute.xlu2 %2881 }
 0x595   : > { %v7876_v49 = vpop.permute.xlu0 %2827  ;;  %v7880_v40 = vpop.permute.xlu1 %2835 }
 0x596   : > { %10175 = vst [vmem:[#allocation57_spill] sm:$0xff] %v7876_v49 }
 0x597   : > { %10176 = vst [vmem:[#allocation47_spill] sm:$0xff] %v7880_v40 }
 0x59a   : > { %3245 = vrot.lane.b32.xlu2 %v10177_v51, %s4304_s6 }
 0x59b   : > { %3065 = vrot.lane.b32.xlu0 %v10043_v28, %s4302_s29  ;;  %3067 = vrot.lane.b32.xlu1 %v10044_v34, %s4302_s29 }
 0x59c   : > { %v7890_v13 = vpop.permute.xlu2 %2887 }
 0x59d   : > { %v7888_v1 = vpop.permute.xlu0 %2833  ;;  %10179 = vst [vmem:[#allocation216_spill] sm:$0xff] %v7890_v13  ;;  %v7892_v38 = vpop.permute.xlu1 %2873 }
 0x59e   : > { %10178 = vst [vmem:[#allocation95_spill] sm:$0xff] %v7888_v1  ;;  %v10181_v1 = vld [vmem:[#allocation178_spill] sm:$0xff] }
 0x5a2   : > { %2997 = vrot.lane.b32.xlu2 %v7450_v0, %s4301_s28 }
 0x5a3   : > { %2971 = vrot.lane.b32.xlu0 %v10172_v46, %s4301_s28  ;;  %3093 = vrot.lane.b32.xlu1 %v7182_v11, %s4302_s29 }
 0x5a4   : > { %v7902_v49 = vpop.permute.xlu2 %2893 }
 0x5a5   : > { %v7900_v40 = vpop.permute.xlu0 %2871  ;;  %10180 = vst [vmem:[#allocation117_spill] sm:$0xff] %v7902_v49  ;;  %v7904_v21 = vpop.permute.xlu1 %2879 }
 0x5aa   : > { %3247 = vrot.lane.b32.xlu2 %v10181_v1, %s4304_s6 }
 0x5ab   : > { %3157 = vrot.lane.b32.xlu0 %v10124_v31, %s4303_s30  ;;  %3273 = vrot.lane.b32.xlu1 %v7491_v43, %s4304_s6 }
 0x5ac   : > { %v7914_v0 = vpop.permute.xlu2 %2899 }
 0x5ad   : > { %v7912_v46 = vpop.permute.xlu0 %2877  ;;  %10182 = vst [vmem:[#allocation62_spill] sm:$0xff] %v7914_v0  ;;  %v7916_v13 = vpop.permute.xlu1 %2885 }
 0x5ae   : > { %10183 = vst [vmem:[#allocation148_spill] sm:$0xff] %v7916_v13 }
 0x5b2   : > { %2973 = vrot.lane.b32.xlu2 %v10177_v51, %s4301_s28 }
 0x5b3   : > { %3183 = vrot.lane.b32.xlu0 %v7229_v45, %s4303_s30  ;;  %2999 = vrot.lane.b32.xlu1 %v7470_v39, %s4301_s28  ;;  %v10185_v45 = vld [vmem:[#allocation33_spill] sm:$0xff] }
 0x5b4   : > { %v7926_v49 = vpop.permute.xlu2 %2905 }
 0x5b5   : > { %v7924_v31 = vpop.permute.xlu0 %2883  ;;  %v7928_v25 = vpop.permute.xlu1 %2891 }
 0x5b6   : > { %10184 = vst [vmem:[#allocation176_spill] sm:$0xff] %v7928_v25 }
 0x5ba   : > { %3159 = vrot.lane.b32.xlu2 %v10128_v36, %s4303_s30 }
 0x5bb   : > { %3069 = vrot.lane.b32.xlu0 %v7038_v59, %s4302_s29  ;;  %3249 = vrot.lane.b32.xlu1 %v10185_v45, %s4304_s6 }
 0x5bc   : > { %v7938_v51 = vpop.permute.xlu2 %2911 }
 0x5bd   : > { %v7936_v0 = vpop.permute.xlu0 %2889  ;;  %v7940_v39 = vpop.permute.xlu1 %2897 }
 0x5be   : > { %10186 = vst [vmem:[#allocation100_spill] sm:$0xff] %v7936_v0 }
 0x5bf   : > { %10187 = vst [vmem:[#allocation29_spill] sm:$0xff] %v7940_v39 }
 0x5c2   : > { %3185 = vrot.lane.b32.xlu2 %v10150_v48, %s4303_s30 }
 0x5c3   : > { %3095 = vrot.lane.b32.xlu0 %v6968_v56, %s4302_s29  ;;  %2975 = vrot.lane.b32.xlu1 %v10181_v1, %s4301_s28 }
 0x5c4   : > { %v7950_v36 = vpop.permute.xlu2 %2917 }
 0x5c5   : > { %v7948_v25 = vpop.permute.xlu0 %2895  ;;  %10189 = vst [vmem:[#allocation221_spill] sm:$0xff] %v7950_v36  ;;  %v7952_v13 = vpop.permute.xlu1 %2903 }
 0x5c6   : > { %10188 = vst [vmem:[#allocation75_spill] sm:$0xff] %v7948_v25 }
 0x5ca   : > { %3071 = vrot.lane.b32.xlu2 %v7002_v16, %s4302_s29 }
 0x5cb   : > { %3275 = vrot.lane.b32.xlu0 %v7473_v20, %s4304_s6  ;;  %3161 = vrot.lane.b32.xlu1 %v10133_v57, %s4303_s30 }
 0x5cc   : > { %v7962_v48 = vpop.permute.xlu2 %2923 }
 0x5cd   : > { %v7960_v39 = vpop.permute.xlu0 %2901  ;;  %10190 = vst [vmem:[#allocation106_spill] sm:$0xff] %v7962_v48  ;;  %v7964_v1 = vpop.permute.xlu1 %2909  ;;  %v3587_v48 = vld [vmem:[%s9164_s3 + $0x20] sm:$0xf] }
 0x5ce   : > { %4215 = vmatpush.msk.msra.mxu1 %vm1779_vm3, %v3587_v48  ;;  %4257 = vmatpush.msk.msra.mxu3 %vm1779_vm3, %v3587_v48 }
 0x5d2   : > { %3097 = vrot.lane.b32.xlu2 %v7186_v27, %s4302_s29 }
 0x5d3   : > { %3001 = vrot.lane.b32.xlu0 %v7491_v43, %s4301_s28  ;;  %3187 = vrot.lane.b32.xlu1 %v7234_v26, %s4303_s30  ;;  %v3586_v43 = vld [vmem:[%s9164_s3 + $0x18] sm:$0xff]  ;;  %v3585_v26 = vld [vmem:[%s9164_s3 + $0x10] sm:$0xff] }
 0x5d4   : > { %v7974_v36 = vpop.permute.xlu2 %2929  ;;  %3703 = vmatpush.msra.mxu1 %v3586_v43  ;;  %4258 = vmatpush.msra.mxu3 %v3586_v43  ;;  %v3583_v43 = vld [vmem:[%s9164_s3] sm:$0xff] }
 0x5d5   : > { %v7972_v25 = vpop.permute.xlu0 %2907  ;;  %10191 = vst [vmem:[#allocation59_spill] sm:$0xff] %v7974_v36  ;;  %v7976_v57 = vpop.permute.xlu1 %2915  ;;  %v10193_v36 = vld [vmem:[#allocation197_spill] sm:$0xff] }
 0x5d6   : > { %10192 = vst [vmem:[#allocation138_spill] sm:$0xff] %v7976_v57  ;;  %v3584_v57 = vld [vmem:[%s9164_s3 + $0x8] sm:$0xff]  ;;  %3704 = vmatpush.msra.mxu1 %v3585_v26  ;;  %4259 = vmatpush.msra.mxu3 %v3585_v26 }
 0x5d8   : > { %3705 = vmatpush.msra.mxu1 %v3584_v57  ;;  %4260 = vmatpush.msra.mxu3 %v3584_v57 }
 0x5da   : > { %3277 = vrot.lane.b32.xlu2 %v7496_v3, %s4304_s6  ;;  %3706 = vmatpush.msra.mxu1 %v3583_v43 }
 0x5db   : > { %3251 = vrot.lane.b32.xlu0 %v10193_v36, %s4304_s6  ;;  %3073 = vrot.lane.b32.xlu1 %v7052_v55, %s4302_s29 }
 0x5dc   : > { %v3152_v0 = vpop.permute.xlu2 %3151  ;;  %4261 = vmatpush.msra.mxu3 %v3583_v43  ;;  %v10198_v43 = vld [vmem:[#allocation171_spill] sm:$0xff] }
 0x5dd   : > { %v7998_v48 = vpop.permute.xlu0 %2913  ;;  %v8000_v27 = vpop.permute.xlu1 %2921 }
 0x5de   : > { %10194 = vst [vmem:[#allocation177_spill] sm:$0xff] %v8000_v27 }
 0x5e2   : > { %3003 = vrot.lane.b32.xlu2 %v7473_v20, %s4301_s28 }
 0x5e3   : > { %2977 = vrot.lane.b32.xlu0 %v10185_v45, %s4301_s28  ;;  %3099 = vrot.lane.b32.xlu1 %v6973_v7, %s4302_s29 }
 0x5e4   : > { %v3064_v27 = vpop.permute.xlu2 %3063 }
 0x5e5   : > { %v8011_v26 = vpop.permute.xlu0 %2919  ;;  %v8013_v55 = vpop.permute.xlu1 %2927 }
 0x5e6   : > { %10195 = vst [vmem:[#allocation202_spill] sm:$0xff] %v8011_v26  ;;  %v3331_v26 = vsel %vm1413_vm4, %v10041_v63, %v10198_v43 }
 0x5e7   : > { %10196 = vst [vmem:[#allocation213_spill] sm:$0xff] %v8013_v55 }
 0x5ea   : > { %3253 = vrot.lane.b32.xlu2 %v7400_v5, %s4304_s6 }
 0x5eb   : > { %3163 = vrot.lane.b32.xlu0 %v10129_v33, %s4303_s30  ;;  %3279 = vrot.lane.b32.xlu1 %v7516_v44, %s4304_s6  ;;  %v8030_v33 = vsel %vm1444_vm5, %v3331_v26, %v7636_v30  ;;  %v10200_v26 = vld [vmem:[#allocation45_spill] sm:$0xff] }
 0x5ec   : > { %v2970_v20 = vpop.permute.xlu2 %2969  ;;  %v3391_v55 = vsel %vm1475_vm7, %v8030_v33, %v7762_v23 }
 0x5ed   : > { %v8021_v45 = vpop.permute.xlu0 %2925  ;;  %v3062_v57 = vpop.permute.xlu1 %3061  ;;  %v3423_v63 = vsel %vm1508_vm6, %v3391_v55, %v7854_v10  ;;  %v3332_v55 = vsel %vm1413_vm4, %v10036_v50, %v10200_v26 }
 0x5ee   : > { %10197 = vst [vmem:[#allocation74_spill] sm:$0xff] %v8021_v45 }
 0x5f2   : > { %2979 = vrot.lane.b32.xlu2 %v10193_v36, %s4301_s28 }
 0x5f3   : > { %3189 = vrot.lane.b32.xlu0 %v7271_v17, %s4303_s30  ;;  %3005 = vrot.lane.b32.xlu1 %v7496_v3, %s4301_s28  ;;  %v10199_v3 = vld [vmem:[#allocation79_spill] sm:$0xff] }
 0x5f4   : > { %v3246_v43 = vpop.permute.xlu2 %3245 }
 0x5f5   : > { %v2966_v45 = vpop.permute.xlu0 %2965  ;;  %v2968_v17 = vpop.permute.xlu1 %2967 }
 0x5f6   : > { %v3455_v7 = vsel %vm1541_vm8, %v3423_v63, %v2966_v45 }
 0x5f7   : > { %v3487_v30 = vsel %vm1574_vm9, %v3455_v7, %v3062_v57  ;;  %v8056_v57 = vsel %vm1444_vm5, %v3332_v55, %v7628_v2 }
 0x5f8   : > { %v3519_v36 = vsel %vm1607_vm10, %v3487_v30, %v3152_v0 }
 0x5fa   : > { %3165 = vrot.lane.b32.xlu2 %v7104_v24, %s4303_s30  ;;  %v3392_v24 = vsel %vm1475_vm7, %v8056_v57, %v7754_v53 }
 0x5fb   : > { %3075 = vrot.lane.b32.xlu0 %v7035_v47, %s4302_s29  ;;  %3255 = vrot.lane.b32.xlu1 %v10199_v3, %s4304_s6  ;;  %v3424_v0 = vsel %vm1508_vm6, %v3392_v24, %v7900_v40 }
 0x5fc   : > { %v2998_v10 = vpop.permute.xlu2 %2997  ;;  %v3456_v63 = vsel %vm1541_vm8, %v3424_v0, %v2968_v17  ;;  %v10201_v17 = vld [vmem:[#allocation44_spill] sm:$0xff] }
 0x5fd   : > { %v3242_v23 = vpop.permute.xlu0 %3241  ;;  %v3244_v7 = vpop.permute.xlu1 %3243  ;;  %v3488_v2 = vsel %vm1574_vm9, %v3456_v63, %v3064_v27 }
 0x5fe   : > { %v3551_v45 = vsel %vm1640_vm12, %v3519_v36, %v3242_v23  ;;  %v3333_v36 = vsel %vm1413_vm4, %v10042_v41, %v10201_v17 }
 0x5ff   : > { %4216 = vmatmul.msk.f32.vlgmr.msra.gmra.mxu1 %vm1682_vm11, %v3551_v45 }
 0x602   : > { %3191 = vrot.lane.b32.xlu2 %v7237_v12, %s4303_s30  ;;  %v3363_v12 = vsel %vm1444_vm5, %v3333_v36, %v7602_v61  ;;  %v10205_v36 = vld [vmem:[#allocation116_spill] sm:$0xff] }
 0x603   : > { %3101 = vrot.lane.b32.xlu0 %v7198_v35, %s4302_s29  ;;  %2981 = vrot.lane.b32.xlu1 %v7400_v5, %s4301_s28  ;;  %v3393_v5 = vsel %vm1475_vm7, %v3363_v12, %v7728_v14 }
 0x604   : > { %v3248_v53 = vpop.permute.xlu2 %3247  ;;  %v3425_v27 = vsel %vm1508_vm6, %v3393_v5, %v7892_v38  ;;  %v10202_v38 = vld [vmem:[#allocation65_spill] sm:$0xff] }
 0x605   : > { %v3154_v50 = vpop.permute.xlu0 %3153  ;;  %v3156_v23 = vpop.permute.xlu1 %3155  ;;  %v3457_v41 = vsel %vm1541_vm8, %v3425_v27, %v2970_v20  ;;  %v3334_v20 = vsel %vm1413_vm4, %v6844_v29, %v10202_v38  ;;  %v10206_v27 = vld [vmem:[#allocation128_spill] sm:$0xff] }
 0x606   : > { %v3520_v30 = vsel %vm1607_vm10, %v3488_v2, %v3154_v50 }
 0x607   : > { %v3552_v40 = vsel %vm1640_vm12, %v3520_v30, %v3244_v7 }
 0x608   : > { %4217 = vmatmul.msk.f32.gmra.mxu1 %vm1682_vm11, %v3552_v40 }
 0x60a   : > { %3077 = vrot.lane.b32.xlu2 %v7055_v22, %s4302_s29 }
 0x60b   : > { %3281 = vrot.lane.b32.xlu0 %v7499_v62, %s4304_s6  ;;  %3167 = vrot.lane.b32.xlu1 %v10137_v58, %s4303_s30 }
 0x60c   : > { %v2974_v55 = vpop.permute.xlu2 %2973 }
 0x60d   : > { %v3066_v26 = vpop.permute.xlu0 %3065  ;;  %v3068_v45 = vpop.permute.xlu1 %3067 }
 0x60e   : > { %v3489_v61 = vsel %vm1574_vm9, %v3457_v41, %v3066_v26 }
 0x60f   : > { %v3521_v14 = vsel %vm1607_vm10, %v3489_v61, %v3156_v23  ;;  %v10204_v23 = vld [vmem:[#allocation86_spill] sm:$0xff] }
 0x610   : > { %v3553_v7 = vsel %vm1640_vm12, %v3521_v14, %v3246_v43  ;;  %v3364_v43 = vsel %vm1444_vm5, %v3334_v20, %v7648_v32  ;;  %v3345_v40 = vsel %vm1413_vm4, %v7124_v15, %v10204_v23  ;;  %v10215_v23 = vld [vmem:[#allocation210_spill] sm:$0xff] }
 0x611   : > { %4218 = vmatmul.msk.f32.gmra.mxu1 %vm1682_vm11, %v3553_v7  ;;  %v3394_v63 = vsel %vm1475_vm7, %v3364_v43, %v7774_v18  ;;  %v3375_v17 = vsel %vm1444_vm5, %v3345_v40, %v7650_v8  ;;  %v10209_v7 = vld [vmem:[#allocation12_spill] sm:$0xff] }
 0x612   : > { %3103 = vrot.lane.b32.xlu2 %v6978_v60, %s4302_s29  ;;  %v3407_v12 = vsel %vm1475_vm7, %v3375_v17, %v10205_v36  ;;  %v10216_v36 = vld [vmem:[#allocation139_spill] sm:$0xff] }
 0x613   : > { %3007 = vrot.lane.b32.xlu0 %v7516_v44, %s4301_s28  ;;  %3193 = vrot.lane.b32.xlu1 %v7280_v54, %s4303_s30  ;;  %v3426_v44 = vsel %vm1508_vm6, %v3394_v63, %v7866_v37  ;;  %v10203_v54 = vld [vmem:[#allocation81_spill] sm:$0xff]  ;;  %v3439_v5 = vsel %vm1508_vm6, %v3407_v12, %v7960_v39  ;;  %v10217_v12 = vld [vmem:[#allocation76_spill] sm:$0xff] }
 0x614   : > { %v3160_v24 = vpop.permute.xlu2 %3159 }
 0x615   : > { %v2972_v58 = vpop.permute.xlu0 %2971  ;;  %v3094_v0 = vpop.permute.xlu1 %3093 }
 0x616   : > { %v3458_v50 = vsel %vm1541_vm8, %v3426_v44, %v2972_v58  ;;  %v10210_v58 = vld [vmem:[#allocation172_spill] sm:$0xff] }
 0x617   : > { %v3490_v32 = vsel %vm1574_vm9, %v3458_v50, %v3068_v45  ;;  %v10213_v50 = vld [vmem:[#allocation126_spill] sm:$0xff] }
 0x61a   : > { %3283 = vrot.lane.b32.xlu2 %v7521_v52, %s4304_s6 }
 0x61b   : > { %3257 = vrot.lane.b32.xlu0 %v10203_v54, %s4304_s6  ;;  %3079 = vrot.lane.b32.xlu1 %v10052_v6, %s4302_s29 }
 0x61c   : > { %v3186_v18 = vpop.permute.xlu2 %3185 }
 0x61d   : > { %v3158_v29 = vpop.permute.xlu0 %3157  ;;  %v3274_v30 = vpop.permute.xlu1 %3273 }
 0x61e   : > { %v3522_v2 = vsel %vm1607_vm10, %v3490_v32, %v3158_v29 }
 0x61f   : > { %v3554_v37 = vsel %vm1640_vm12, %v3522_v2, %v3248_v53  ;;  %v3471_v53 = vsel %vm1541_vm8, %v3439_v5, %v2998_v10  ;;  %v10214_v2 = vld [vmem:[#allocation192_spill] sm:$0xff]  ;;  %v10218_v5 = vld [vmem:[#allocation143_spill] sm:$0xff] }
 0x620   : > { %4219 = vmatmul.msk.f32.gmra.mxu1 %vm1682_vm11, %v3554_v37  ;;  %v3503_v41 = vsel %vm1574_vm9, %v3471_v53, %v3094_v0 }
 0x622   : > { %3009 = vrot.lane.b32.xlu2 %v7499_v62, %s4301_s28  ;;  %v10208_v62 = vld [vmem:[#allocation159_spill] sm:$0xff] }
 0x623   : > { %2983 = vrot.lane.b32.xlu0 %v10199_v3, %s4301_s28  ;;  %3105 = vrot.lane.b32.xlu1 %v10206_v27, %s4302_s29  ;;  %v10207_v3 = vld [vmem:[#allocation174_spill] sm:$0xff] }
 0x624   : > { %v3072_v61 = vpop.permute.xlu2 %3071  ;;  %v3395_v10 = vsel %vm1475_vm7, %v8030_v33, %v10207_v3 }
 0x625   : > { %v3184_v8 = vpop.permute.xlu0 %3183  ;;  %v3000_v45 = vpop.permute.xlu1 %2999  ;;  %v3427_v14 = vsel %vm1508_vm6, %v3395_v10, %v7912_v46  ;;  %v10211_v46 = vld [vmem:[#allocation188_spill] sm:$0xff]  ;;  %v10221_v10 = vld [vmem:[#allocation173_spill] sm:$0xff] }
 0x626   : > { %v3535_v26 = vsel %vm1607_vm10, %v3503_v41, %v3184_v8  ;;  %v3459_v38 = vsel %vm1541_vm8, %v3427_v14, %v2974_v55  ;;  %v10212_v55 = vld [vmem:[#allocation217_spill] sm:$0xff]  ;;  %v10222_v14 = vld [vmem:[#allocation3_spill] sm:$0xff] }
 0x627   : > { %v3567_v39 = vsel %vm1640_vm12, %v3535_v26, %v3274_v30  ;;  %v3346_v29 = vsel %vm1413_vm4, %v10213_v50, %v10212_v55 }
 0x628   : > { %4232 = vmatmul.msk.f32.vlgmr.msra.gmra.mxu3 %vm1682_vm11, %v3567_v39  ;;  %v10220_v39 = vld [vmem:[#allocation194_spill] sm:$0xff] }
 0x62a   : > { %3259 = vrot.lane.b32.xlu2 %v10209_v7, %s4304_s6 }
 0x62b   : > { %3169 = vrot.lane.b32.xlu0 %v10208_v62, %s4303_s30  ;;  %3285 = vrot.lane.b32.xlu1 %v10210_v58, %s4304_s6 }
 0x62c   : > { %v3098_v43 = vpop.permute.xlu2 %3097 }
 0x62d   : > { %v3070_v20 = vpop.permute.xlu0 %3069  ;;  %v3250_v63 = vpop.permute.xlu1 %3249 }
 0x62e   : > { %v3491_v0 = vsel %vm1574_vm9, %v3459_v38, %v3070_v20 }
 0x62f   : > { %v3523_v33 = vsel %vm1607_vm10, %v3491_v0, %v3160_v24  ;;  %v3376_v24 = vsel %vm1444_vm5, %v3346_v29, %v10214_v2  ;;  %v10225_v2 = vld [vmem:[#allocation42_spill] sm:$0xff] }
 0x630   : > { %v3555_v44 = vsel %vm1640_vm12, %v3523_v33, %v3250_v63  ;;  %v3408_v40 = vsel %vm1475_vm7, %v3376_v24, %v10215_v23 }
 0x631   : > { %4220 = vmatmul.msk.f32.gmra.mxu1 %vm1682_vm11, %v3555_v44  ;;  %v3440_v17 = vsel %vm1508_vm6, %v3408_v40, %v7952_v13 }
 0x632   : > { %2985 = vrot.lane.b32.xlu2 %v10203_v54, %s4301_s28  ;;  %v3472_v54 = vsel %vm1541_vm8, %v3440_v17, %v3000_v45  ;;  %v10219_v45 = vld [vmem:[#allocation35_spill] sm:$0xff]  ;;  %v10229_v17 = vld [vmem:[#allocation196_spill] sm:$0xff] }
 0x633   : > { %3195 = vrot.lane.b32.xlu0 %v10211_v46, %s4303_s30  ;;  %3011 = vrot.lane.b32.xlu1 %v7521_v52, %s4301_s28  ;;  %v3347_v3 = vsel %vm1413_vm4, %v10220_v39, %v10219_v45  ;;  %v10224_v46 = vld [vmem:[#allocation102_spill] sm:$0xff]  ;;  %v10232_v45 = vld [vmem:[#allocation211_spill] sm:$0xff] }
 0x634   : > { %v3278_v30 = vpop.permute.xlu2 %3277  ;;  %v3377_v62 = vsel %vm1444_vm5, %v3347_v3, %v10221_v10  ;;  %v3396_v55 = vsel %vm1475_vm7, %v8056_v57, %v10224_v46  ;;  %v10226_v57 = vld [vmem:[#allocation107_spill] sm:$0xff] }
 0x635   : > { %v3096_v32 = vpop.permute.xlu0 %3095  ;;  %v2976_v37 = vpop.permute.xlu1 %2975  ;;  %v3409_v38 = vsel %vm1475_vm7, %v3377_v62, %v7840_v4  ;;  %v3428_v29 = vsel %vm1508_vm6, %v3396_v55, %v7904_v21  ;;  %v10233_v62 = vld [vmem:[#allocation111_spill] sm:$0xff] }
 0x636   : > { %v3504_v52 = vsel %vm1574_vm9, %v3472_v54, %v3096_v32  ;;  %v3441_v20 = vsel %vm1508_vm6, %v3409_v38, %v7926_v49  ;;  %v10234_v38 = vld [vmem:[#allocation190_spill] sm:$0xff]  ;;  %v10236_v46 = vld [vmem:[#allocation175_spill] sm:$0xff] }
 0x637   : > { %v3536_v41 = vsel %vm1607_vm10, %v3504_v52, %v3186_v18  ;;  %v10223_v18 = vld [vmem:[#allocation127_spill] sm:$0xff]  ;;  %v10230_v52 = vld [vmem:[#allocation204_spill] sm:$0xff] }
 0x63a   : > { %3171 = vrot.lane.b32.xlu2 %v10217_v12, %s4303_s30  ;;  %v3335_v12 = vsel %vm1413_vm4, %v10043_v28, %v10230_v52  ;;  %v10243_v52 = vld [vmem:[#allocation162_spill] sm:$0xff] }
 0x63b   : > { %3081 = vrot.lane.b32.xlu0 %v10216_v36, %s4302_s29  ;;  %3261 = vrot.lane.b32.xlu1 %v10218_v5, %s4304_s6 }
 0x63c   : > { %v3004_v8 = vpop.permute.xlu2 %3003 }
 0x63d   : > { %v3276_v53 = vpop.permute.xlu0 %3275  ;;  %v3162_v13 = vpop.permute.xlu1 %3161 }
 0x63e   : > { %v3568_v26 = vsel %vm1640_vm12, %v3536_v41, %v3276_v53 }
 0x63f   : > { %4233 = vmatmul.msk.f32.gmra.mxu3 %vm1682_vm11, %v3568_v26  ;;  %v10231_v26 = vld [vmem:[#allocation40_spill] sm:$0xff] }
 0x642   : > { %3197 = vrot.lane.b32.xlu2 %v10223_v18, %s4303_s30 }
 0x643   : > { %3107 = vrot.lane.b32.xlu0 %v10222_v14, %s4302_s29  ;;  %2987 = vrot.lane.b32.xlu1 %v10209_v7, %s4301_s28  ;;  %v3460_v7 = vsel %vm1541_vm8, %v3428_v29, %v2976_v37 }
 0x644   : > { %v3254_v33 = vpop.permute.xlu2 %3253  ;;  %v3492_v24 = vsel %vm1574_vm9, %v3460_v7, %v3072_v61  ;;  %v10228_v61 = vld [vmem:[#allocation149_spill] sm:$0xff] }
 0x645   : > { %v3002_v0 = vpop.permute.xlu0 %3001  ;;  %v3188_v44 = vpop.permute.xlu1 %3187  ;;  %v3524_v21 = vsel %vm1607_vm10, %v3492_v24, %v3162_v13  ;;  %v3365_v13 = vsel %vm1444_vm5, %v3335_v12, %v10231_v26  ;;  %v10238_v7 = vld [vmem:[#allocation125_spill] sm:$0xff]  ;;  %v10244_v12 = vld [vmem:[#allocation68_spill] sm:$0xff] }
 0x646   : > { %v3473_v63 = vsel %vm1541_vm8, %v3441_v20, %v3002_v0  ;;  %v3397_v3 = vsel %vm1475_vm7, %v3365_v13, %v10232_v45 }
 0x647   : > { %v3505_v4 = vsel %vm1574_vm9, %v3473_v63, %v3098_v43  ;;  %v10227_v43 = vld [vmem:[#allocation158_spill] sm:$0xff] }
 0x648   : > { %v3537_v32 = vsel %vm1607_vm10, %v3505_v4, %v3188_v44  ;;  %v10235_v44 = vld [vmem:[#allocation11_spill] sm:$0xff]  ;;  %v10237_v4 = vld [vmem:[#allocation82_spill] sm:$0xff] }
 0x649   : > { %v3569_v49 = vsel %vm1640_vm12, %v3537_v32, %v3278_v30  ;;  %v3348_v55 = vsel %vm1413_vm4, %v10236_v46, %v10235_v44  ;;  %v10249_v44 = vld [vmem:[#allocation215_spill] sm:$0xff] }
 0x64a   : > { %4234 = vmatmul.msk.f32.gmra.mxu3 %vm1682_vm11, %v3569_v49  ;;  %3083 = vrot.lane.b32.xlu2 %v10226_v57, %s4302_s29  ;;  %v3378_v29 = vsel %vm1444_vm5, %v3348_v55, %v10237_v4 }
 0x64b   : > { %3287 = vrot.lane.b32.xlu0 %v10225_v2, %s4304_s6  ;;  %3173 = vrot.lane.b32.xlu1 %v10227_v43, %s4303_s30 }
 0x64c   : > { %v2980_v40 = vpop.permute.xlu2 %2979 }
 0x64d   : > { %v3252_v23 = vpop.permute.xlu0 %3251  ;;  %v3074_v30 = vpop.permute.xlu1 %3073 }
 0x64e   : > { %v3556_v37 = vsel %vm1640_vm12, %v3524_v21, %v3252_v23  ;;  %v10240_v23 = vld [vmem:[#allocation181_spill] sm:$0xff] }
 0x64f   : > { %4221 = vmatmul.msk.f32.gmra.mxu1 %vm1682_vm11, %v3556_v37  ;;  %v10241_v37 = vld [vmem:[#allocation200_spill] sm:$0xff] }
 0x652   : > { %3109 = vrot.lane.b32.xlu2 %v10228_v61, %s4302_s29 }
 0x653   : > { %3013 = vrot.lane.b32.xlu0 %v10210_v58, %s4301_s28  ;;  %3199 = vrot.lane.b32.xlu1 %v10229_v17, %s4303_s30  ;;  %v3429_v58 = vsel %vm1508_vm6, %v3397_v3, %v7878_v9  ;;  %v10242_v17 = vld [vmem:[#allocation108_spill] sm:$0xff] }
 0x654   : > { %v3166_v53 = vpop.permute.xlu2 %3165 }
 0x655   : > { %v2978_v54 = vpop.permute.xlu0 %2977  ;;  %v3100_v41 = vpop.permute.xlu1 %3099 }
 0x656   : > { %v3461_v10 = vsel %vm1541_vm8, %v3429_v58, %v2978_v54 }
 0x657   : > { %v3493_v18 = vsel %vm1574_vm9, %v3461_v10, %v3074_v30 }
 0x65a   : > { %3289 = vrot.lane.b32.xlu2 %v10234_v38, %s4304_s6 }
 0x65b   : > { %3263 = vrot.lane.b32.xlu0 %v10233_v62, %s4304_s6  ;;  %3085 = vrot.lane.b32.xlu1 %v7124_v15, %s4302_s29  ;;  %v3410_v15 = vsel %vm1475_vm7, %v3378_v29, %v7826_v42 }
 0x65c   : > { %v3192_v0 = vpop.permute.xlu2 %3191  ;;  %v3442_v32 = vsel %vm1508_vm6, %v3410_v15, %v7972_v25 }
 0x65d   : > { %v3164_v28 = vpop.permute.xlu0 %3163  ;;  %v3280_v63 = vpop.permute.xlu1 %3279 }
 0x65e   : > { %v3525_v20 = vsel %vm1607_vm10, %v3493_v18, %v3164_v28  ;;  %v10246_v28 = vld [vmem:[#allocation48_spill] sm:$0xff] }
 0x65f   : > { %v3557_v9 = vsel %vm1640_vm12, %v3525_v20, %v3254_v33  ;;  %v3474_v33 = vsel %vm1541_vm8, %v3442_v32, %v3004_v8  ;;  %v10250_v32 = vld [vmem:[#allocation24_spill] sm:$0xff] }
 0x660   : > { %4222 = vmatmul.msk.f32.gmra.mxu1 %vm1682_vm11, %v3557_v9  ;;  %v3506_v49 = vsel %vm1574_vm9, %v3474_v33, %v3100_v41  ;;  %v3350_v33 = vsel %vm1413_vm4, %v6968_v56, %v10250_v32  ;;  %v10268_v32 = vld [vmem:[#allocation78_spill] sm:$0xff] }
 0x662   : > { %3015 = vrot.lane.b32.xlu2 %v10225_v2, %s4301_s28 }
 0x663   : > { %2989 = vrot.lane.b32.xlu0 %v10218_v5, %s4301_s28  ;;  %3111 = vrot.lane.b32.xlu1 %v10238_v7, %s4302_s29  ;;  %v10239_v5 = vld [vmem:[#allocation96_spill] sm:$0xff] }
 0x664   : > { %v3078_v42 = vpop.permute.xlu2 %3077  ;;  %v3336_v8 = vsel %vm1413_vm4, %v10044_v34, %v10239_v5 }
 0x665   : > { %v3190_v24 = vpop.permute.xlu0 %3189  ;;  %v3006_v21 = vpop.permute.xlu1 %3005  ;;  %v3366_v2 = vsel %vm1444_vm5, %v3336_v8, %v10240_v23  ;;  %v10256_v23 = vld [vmem:[#allocation101_spill] sm:$0xff] }
 0x666   : > { %v3538_v43 = vsel %vm1607_vm10, %v3506_v49, %v3190_v24  ;;  %v3398_v30 = vsel %vm1475_vm7, %v3366_v2, %v10241_v37  ;;  %v10252_v24 = vld [vmem:[#allocation170_spill] sm:$0xff] }
 0x667   : > { %v3570_v25 = vsel %vm1640_vm12, %v3538_v43, %v3280_v63  ;;  %v3430_v54 = vsel %vm1508_vm6, %v3398_v30, %v7924_v31  ;;  %v10245_v31 = vld [vmem:[#allocation113_spill] sm:$0xff]  ;;  %v10253_v43 = vld [vmem:[#allocation80_spill] sm:$0xff] }
 0x668   : > { %4235 = vmatmul.msk.f32.gmra.mxu3 %vm1682_vm11, %v3570_v25  ;;  %v3462_v34 = vsel %vm1541_vm8, %v3430_v54, %v2980_v40  ;;  %v3349_v40 = vsel %vm1413_vm4, %v7182_v11, %v10245_v31  ;;  %v10247_v63 = vld [vmem:[#allocation77_spill] sm:$0xff]  ;;  %v10248_v11 = vld [vmem:[#allocation140_spill] sm:$0xff]  ;;  %v10255_v25 = vld [vmem:[#allocation98_spill] sm:$0xff] }
 0x669   : > { %v3337_v5 = vsel %vm1413_vm4, %v7038_v59, %v10255_v25  ;;  %v10257_v54 = vld [vmem:[#allocation133_spill] sm:$0xff]  ;;  %v10270_v25 = vld [vmem:[#allocation160_spill] sm:$0xff] }
 0x66a   : > { %3265 = vrot.lane.b32.xlu2 %v10243_v52, %s4304_s6  ;;  %v3367_v2 = vsel %vm1444_vm5, %v3337_v5, %v10256_v23  ;;  %v10272_v23 = vld [vmem:[#allocation165_spill] sm:$0xff] }
 0x66b   : > { %3175 = vrot.lane.b32.xlu0 %v10242_v17, %s4303_s30  ;;  %3291 = vrot.lane.b32.xlu1 %v10244_v12, %s4304_s6 }
 0x66c   : > { %v3104_v13 = vpop.permute.xlu2 %3103 }
 0x66d   : > { %v3076_v41 = vpop.permute.xlu0 %3075  ;;  %v3256_v45 = vpop.permute.xlu1 %3255 }
 0x66e   : > { %v3494_v26 = vsel %vm1574_vm9, %v3462_v34, %v3076_v41  ;;  %v3399_v34 = vsel %vm1475_vm7, %v3367_v2, %v10257_v54  ;;  %v10258_v41 = vld [vmem:[#allocation148_spill] sm:$0xff] }
 0x66f   : > { %v3526_v3 = vsel %vm1607_vm10, %v3494_v26, %v3166_v53  ;;  %v3379_v53 = vsel %vm1444_vm5, %v3349_v40, %v10246_v28  ;;  %v3431_v26 = vsel %vm1508_vm6, %v3399_v34, %v10258_v41  ;;  %v10274_v41 = vld [vmem:[#allocation186_spill] sm:$0xff] }
 0x670   : > { %v3558_v58 = vsel %vm1640_vm12, %v3526_v3, %v3256_v45  ;;  %v3411_v9 = vsel %vm1475_vm7, %v3379_v53, %v10247_v63  ;;  %v10259_v3 = vld [vmem:[#allocation198_spill] sm:$0xff] }
 0x671   : > { %4223 = vmatmul.msk.f32.gmra.mxu1 %vm1682_vm11, %v3558_v58 }
 0x672   : > { %2991 = vrot.lane.b32.xlu2 %v10233_v62, %s4301_s28 }
 0x673   : > { %3201 = vrot.lane.b32.xlu0 %v10159_v19, %s4303_s30  ;;  %3017 = vrot.lane.b32.xlu1 %v10234_v38, %s4301_s28  ;;  %v3443_v19 = vsel %vm1508_vm6, %v3411_v9, %v7964_v1 }
 0x674   : > { %v3284_v18 = vpop.permute.xlu2 %3283  ;;  %v3475_v62 = vsel %vm1541_vm8, %v3443_v19, %v3006_v21  ;;  %v10264_v19 = vld [vmem:[#allocation85_spill] sm:$0xff] }
 0x675   : > { %v3102_v10 = vpop.permute.xlu0 %3101  ;;  %v2982_v20 = vpop.permute.xlu1 %2981 }
 0x676   : > { %v3507_v38 = vsel %vm1574_vm9, %v3475_v62, %v3102_v10 }
 0x677   : > { %v3539_v4 = vsel %vm1607_vm10, %v3507_v38, %v3192_v0  ;;  %v10254_v0 = vld [vmem:[#allocation94_spill] sm:$0xff] }
 0x67a   : > { %3177 = vrot.lane.b32.xlu2 %v10248_v11, %s4303_s30  ;;  %v10265_v11 = vld [vmem:[#allocation72_spill] sm:$0xff] }
 0x67b   : > { %3087 = vrot.lane.b32.xlu0 %v10213_v50, %s4302_s29  ;;  %3267 = vrot.lane.b32.xlu1 %v10249_v44, %s4304_s6  ;;  %v10251_v50 = vld [vmem:[#allocation206_spill] sm:$0xff] }
 0x67c   : > { %v3010_v29 = vpop.permute.xlu2 %3009  ;;  %v3380_v49 = vsel %vm1444_vm5, %v3350_v33, %v10251_v50 }
 0x67d   : > { %v3282_v55 = vpop.permute.xlu0 %3281  ;;  %v3168_v1 = vpop.permute.xlu1 %3167  ;;  %v3412_v21 = vsel %vm1475_vm7, %v3380_v49, %v10253_v43 }
 0x67e   : > { %v3571_v15 = vsel %vm1640_vm12, %v3539_v4, %v3282_v55  ;;  %v3444_v56 = vsel %vm1508_vm6, %v3412_v21, %v7938_v51  ;;  %v3463_v51 = vsel %vm1541_vm8, %v3431_v26, %v2982_v20  ;;  %v10263_v20 = vld [vmem:[#allocation105_spill] sm:$0xff] }
 0x67f   : > { %4236 = vmatmul.msk.f32.gmra.mxu3 %vm1682_vm11, %v3571_v15  ;;  %v3495_v58 = vsel %vm1574_vm9, %v3463_v51, %v3078_v42  ;;  %v10261_v42 = vld [vmem:[#allocation156_spill] sm:$0xff]  ;;  %v3338_v63 = vsel %vm1413_vm4, %v7002_v16, %v10263_v20  ;;  %v10276_v51 = vld [vmem:[#allocation6_spill] sm:$0xff] }
 0x680   : > { %v3527_v31 = vsel %vm1607_vm10, %v3495_v58, %v3168_v1  ;;  %v3368_v62 = vsel %vm1444_vm5, %v3338_v63, %v10264_v19  ;;  %v10267_v1 = vld [vmem:[#allocation189_spill] sm:$0xff] }
 0x681   : > { %v3400_v55 = vsel %vm1475_vm7, %v3368_v62, %v10265_v11 }
 0x682   : > { %3203 = vrot.lane.b32.xlu2 %v10254_v0, %s4303_s30  ;;  %v10269_v0 = vld [vmem:[#allocation130_spill] sm:$0xff] }
 0x683   : > { %3113 = vrot.lane.b32.xlu0 %v10252_v24, %s4302_s29  ;;  %2993 = vrot.lane.b32.xlu1 %v10243_v52, %s4301_s28  ;;  %v3351_v5 = vsel %vm1413_vm4, %v10270_v25, %v10269_v0  ;;  %v10288_v0 = vld [vmem:[#allocation93_spill] sm:$0xff] }
 0x684   : > { %v3260_v30 = vpop.permute.xlu2 %3259  ;;  %v2591_v25 = vrot.slane %v10288_v0, 2 }
 0x685   : > { %v3008_v8 = vpop.permute.xlu0 %3007  ;;  %v3194_v17 = vpop.permute.xlu1 %3193 }
 0x686   : > { %v3476_v37 = vsel %vm1541_vm8, %v3444_v56, %v3008_v8  ;;  %v10271_v56 = vld [vmem:[#allocation54_spill] sm:$0xff] }
 0x687   : > { %v3508_v52 = vsel %vm1574_vm9, %v3476_v37, %v3104_v13  ;;  %v10260_v13 = vld [vmem:[#allocation115_spill] sm:$0xff]  ;;  %v3381_v8 = vsel %vm1444_vm5, %v3351_v5, %v10271_v56  ;;  %v10289_v56 = vld [vmem:[#allocation138_spill] sm:$0xff] }
 0x688   : > { %v3540_v59 = vsel %vm1607_vm10, %v3508_v52, %v3194_v17 }
 0x689   : > { %v3572_v45 = vsel %vm1640_vm12, %v3540_v59, %v3284_v18  ;;  %v10275_v59 = vld [vmem:[#allocation118_spill] sm:$0xff] }
 0x68a   : > { %4237 = vmatmul.msk.f32.gmra.mxu3 %vm1682_vm11, %v3572_v45  ;;  %3089 = vrot.lane.b32.xlu2 %v10220_v39, %s4302_s29  ;;  %v10262_v39 = vld [vmem:[#allocation110_spill] sm:$0xff]  ;;  %v3339_v45 = vsel %vm1413_vm4, %v10276_v51, %v10275_v59  ;;  %v10294_v51 = vld [vmem:[#allocation221_spill] sm:$0xff] }
 0x68b   : > { %3293 = vrot.lane.b32.xlu0 %v10259_v3, %s4304_s6  ;;  %3179 = vrot.lane.b32.xlu1 %v10260_v13, %s4303_s30  ;;  %v10278_v13 = vld [vmem:[#allocation25_spill] sm:$0xff] }
 0x68c   : > { %v2986_v10 = vpop.permute.xlu2 %2985 }
 0x68d   : > { %v3258_v40 = vpop.permute.xlu0 %3257  ;;  %v3080_v53 = vpop.permute.xlu1 %3079 }
 0x68e   : > { %v3559_v28 = vsel %vm1640_vm12, %v3527_v31, %v3258_v40  ;;  %v10279_v40 = vld [vmem:[#allocation169_spill] sm:$0xff] }
 0x68f   : > { %4224 = vmatmul.msk.f32.gmra.mxu1 %vm1682_vm11, %v3559_v28 }
 0x692   : > { %3115 = vrot.lane.b32.xlu2 %v10261_v42, %s4302_s29 }
 0x693   : > { %3019 = vrot.lane.b32.xlu0 %v10244_v12, %s4301_s28  ;;  %3205 = vrot.lane.b32.xlu1 %v10262_v39, %s4303_s30  ;;  %v10266_v12 = vld [vmem:[#allocation216_spill] sm:$0xff] }
 0x694   : > { %v3172_v9 = vpop.permute.xlu2 %3171  ;;  %v3432_v4 = vsel %vm1508_vm6, %v3400_v55, %v10266_v12  ;;  %v10282_v12 = vld [vmem:[#allocation147_spill] sm:$0xff] }
 0x695   : > { %v2984_v18 = vpop.permute.xlu0 %2983  ;;  %v3106_v38 = vpop.permute.xlu1 %3105 }
 0x696   : > { %v3464_v15 = vsel %vm1541_vm8, %v3432_v4, %v2984_v18  ;;  %v10281_v18 = vld [vmem:[#allocation32_spill] sm:$0xff] }
 0x697   : > { %v3496_v33 = vsel %vm1574_vm9, %v3464_v15, %v3080_v53  ;;  %v10280_v53 = vld [vmem:[#allocation100_spill] sm:$0xff]  ;;  %v10285_v15 = vld [vmem:[#allocation89_spill] sm:$0xff] }
 0x698   : > { %v10283_v4 = vld [vmem:[#allocation92_spill] sm:$0xff] }
 0x69a   : > { %3295 = vrot.lane.b32.xlu2 %v10268_v32, %s4304_s6 }
 0x69b   : > { %3269 = vrot.lane.b32.xlu0 %v10267_v1, %s4304_s6  ;;  %3091 = vrot.lane.b32.xlu1 %v10236_v46, %s4302_s29  ;;  %v3413_v46 = vsel %vm1475_vm7, %v3381_v8, %v10272_v23 }
 0x69c   : > { %v3198_v49 = vpop.permute.xlu2 %3197  ;;  %v3445_v2 = vsel %vm1508_vm6, %v3413_v46, %v7998_v48  ;;  %v2589_v48 = vrot.slane %v10274_v41, 2 }
 0x69d   : > { %v3170_v16 = vpop.permute.xlu0 %3169  ;;  %v3286_v21 = vpop.permute.xlu1 %3285  ;;  %v3477_v37 = vsel %vm1541_vm8, %v3445_v2, %v3010_v29 }
 0x69e   : > { %v3528_v50 = vsel %vm1607_vm10, %v3496_v33, %v3170_v16  ;;  %v3509_v17 = vsel %vm1574_vm9, %v3477_v37, %v3106_v38  ;;  %v10286_v33 = vld [vmem:[#allocation218_spill] sm:$0xff]  ;;  %v2592_v46 = vsel %vm587_vm2, %v2589_v48, %v2591_v25 }
 0x69f   : > { %v3560_v43 = vsel %vm1640_vm12, %v3528_v50, %v3260_v30  ;;  %v10273_v30 = vld [vmem:[#allocation10_spill] sm:$0xff] }
 0x6a0   : > { %4225 = vmatmul.msk.f32.gmra.mxu1 %vm1682_vm11, %v3560_v43  ;;  %v2588_v26 = vrot.slane %v10273_v30, 2  ;;  %v10287_v43 = vld [vmem:[#allocation27_spill] sm:$0xff] }
 0x6a2   : > { %3021 = vrot.lane.b32.xlu2 %v10259_v3, %s4301_s28  ;;  %v10277_v3 = vld [vmem:[#allocation20_spill] sm:$0xff]  ;;  %v2590_v28 = vsel %vm587_vm2, %v2588_v26, %v2589_v48  ;;  %v10291_v26 = vld [vmem:[#allocation91_spill] sm:$0xff] }
 0x6a3   : > { %2995 = vrot.lane.b32.xlu0 %v10249_v44, %s4301_s28  ;;  %3117 = vrot.lane.b32.xlu1 %v10273_v30, %s4302_s29  ;;  %v3369_v58 = vsel %vm1444_vm5, %v3339_v45, %v10277_v3 }
 0x6a4   : > { %v8395_v52 = vpop.permute.xlu2 %3083  ;;  %v3401_v31 = vsel %vm1475_vm7, %v3369_v58, %v10278_v13  ;;  %v10295_v58 = vld [vmem:[#allocation114_spill] sm:$0xff] }
 0x6a5   : > { %v3196_v54 = vpop.permute.xlu0 %3195  ;;  %v3012_v29 = vpop.permute.xlu1 %3011  ;;  %v3433_v39 = vsel %vm1508_vm6, %v3401_v31, %v10280_v53  ;;  %v10296_v31 = vld [vmem:[#allocation155_spill] sm:$0xff] }
 0x6a6   : > { %v3541_v34 = vsel %vm1607_vm10, %v3509_v17, %v3196_v54  ;;  %v3465_v20 = vsel %vm1541_vm8, %v3433_v39, %v2986_v10  ;;  %v10284_v10 = vld [vmem:[#allocation145_spill] sm:$0xff]  ;;  %v10297_v39 = vld [vmem:[#allocation176_spill] sm:$0xff] }
 0x6a7   : > { %v3573_v44 = vsel %vm1640_vm12, %v3541_v34, %v3286_v21  ;;  %v3352_v1 = vsel %vm1413_vm4, %v10285_v15, %v10284_v10  ;;  %v10290_v34 = vld [vmem:[#allocation132_spill] sm:$0xff]  ;;  %v10298_v15 = vld [vmem:[#allocation97_spill] sm:$0xff] }
 0x6a8   : > { %4238 = vmatmul.msk.f32.gmra.mxu3 %vm1682_vm11, %v3573_v44  ;;  %v10292_v44 = vld [vmem:[#allocation212_spill] sm:$0xff] }
 0x6aa   : > { %3271 = vrot.lane.b32.xlu2 %v10281_v18, %s4304_s6 }
 0x6ab   : > { %3181 = vrot.lane.b32.xlu0 %v10279_v40, %s4303_s30  ;;  %3297 = vrot.lane.b32.xlu1 %v2590_v28, %s4304_s6 }
 0x6ac   : > { %v3110_v62 = vpop.permute.xlu2 %3109 }
 0x6ad   : > { %v3082_v63 = vpop.permute.xlu0 %3081  ;;  %v3262_v38 = vpop.permute.xlu1 %3261 }
 0x6ae   : > { %v3497_v19 = vsel %vm1574_vm9, %v3465_v20, %v3082_v63 }
 0x6af   : > { %v3529_v11 = vsel %vm1607_vm10, %v3497_v19, %v3172_v9  ;;  %v3382_v9 = vsel %vm1444_vm5, %v3352_v1, %v10286_v33  ;;  %v3341_v1 = vsel %vm1413_vm4, %v7055_v22, %v10298_v15 }
 0x6b0   : > { %v3561_v55 = vsel %vm1640_vm12, %v3529_v11, %v3262_v38  ;;  %v3414_v21 = vsel %vm1475_vm7, %v3382_v9, %v10287_v43  ;;  %v10301_v43 = vld [vmem:[#allocation117_spill] sm:$0xff] }
 0x6b1   : > { %4226 = vmatmul.msk.f32.gmra.mxu1 %vm1682_vm11, %v3561_v55 }
 0x6b2   : > { %3023 = vrot.lane.b32.xlu2 %v10268_v32, %s4301_s28  ;;  %v3446_v32 = vsel %vm1508_vm6, %v3414_v21, %v10289_v56 }
 0x6b3   : > { %3207 = vrot.lane.b32.xlu0 %v10282_v12, %s4303_s30  ;;  %3209 = vrot.lane.b32.xlu1 %v10283_v4, %s4303_s30  ;;  %v3478_v8 = vsel %vm1541_vm8, %v3446_v32, %v3012_v29 }
 0x6b4   : > { %v3290_v50 = vpop.permute.xlu2 %3289 }
 0x6b5   : > { %v3108_v16 = vpop.permute.xlu0 %3107  ;;  %v2988_v5 = vpop.permute.xlu1 %2987 }
 0x6b6   : > { %v3510_v23 = vsel %vm1574_vm9, %v3478_v8, %v3108_v16  ;;  %v10299_v16 = vld [vmem:[#allocation17_spill] sm:$0xff] }
 0x6b7   : > { %v3542_v37 = vsel %vm1607_vm10, %v3510_v23, %v3198_v49  ;;  %v10293_v49 = vld [vmem:[#allocation131_spill] sm:$0xff]  ;;  %v3371_v33 = vsel %vm1444_vm5, %v3341_v1, %v10299_v16 }
 0x6b8   : > { %v3340_v59 = vsel %vm1413_vm4, %v7035_v47, %v10293_v49  ;;  %v10302_v23 = vld [vmem:[#allocation207_spill] sm:$0xff] }
 0x6ba   : > { %3299 = vrot.lane.b32.xlu2 %v2592_v46, %s4304_s6  ;;  %s8983_s6 = scalar_lea.vmem %s9166_s5, %s4250_s20 }
 0x6bb   : > { %3119 = vrot.lane.b32.xlu0 %v10274_v41, %s4302_s29  ;;  %2931 = vrot.lane.b32.xlu1 %v10283_v4, %s4300_s27  ;;  %v3353_v41 = vsel %vm1413_vm4, %v7198_v35, %v10290_v34  ;;  %v3370_v35 = vsel %vm1444_vm5, %v3340_v59, %v10295_v58  ;;  %v10305_v34 = vld [vmem:[#allocation202_spill] sm:$0xff] }
 0x6bc   : > { %v3016_v17 = vpop.permute.xlu2 %3015  ;;  %v3383_v48 = vsel %vm1444_vm5, %v3353_v41, %v10291_v26  ;;  %v3402_v40 = vsel %vm1475_vm7, %v3370_v35, %v10296_v31 }
 0x6bd   : > { %v3288_v2 = vpop.permute.xlu0 %3287  ;;  %v3174_v54 = vpop.permute.xlu1 %3173  ;;  %v3415_v29 = vsel %vm1475_vm7, %v3383_v48, %v10292_v44  ;;  %v3434_v18 = vsel %vm1508_vm6, %v3402_v40, %v10297_v39 }
 0x6be   : > { %v3574_v30 = vsel %vm1640_vm12, %v3542_v37, %v3288_v2  ;;  %v3447_v45 = vsel %vm1508_vm6, %v3415_v29, %v10294_v51  ;;  %v3466_v20 = vsel %vm1541_vm8, %v3434_v18, %v2988_v5  ;;  %v10303_v2 = vld [vmem:[#allocation164_spill] sm:$0xff]  ;;  %v10306_v51 = vld [vmem:[#allocation90_spill] sm:$0xff] }
 0x6bf   : > { %4239 = vmatmul.msk.f32.gmra.mxu3 %vm1682_vm11, %v3574_v30  ;;  %v3498_v38 = vsel %vm1574_vm9, %v3466_v20, %v8395_v52  ;;  %v10304_v30 = vld [vmem:[#allocation201_spill] sm:$0xff] }
 0x6c0   : > { %v3530_v11 = vsel %vm1607_vm10, %v3498_v38, %v3174_v54  ;;  %v10310_v20 = vld [vmem:[#allocation61_spill] sm:$0xff]  ;;  %v10311_v38 = vld [vmem:[#allocation28_spill] sm:$0xff] }
 0x6c2   : > { %3027 = vrot.lane.b32.xlu2 %v2592_v46, %s4301_s28  ;;  %v3354_v46 = vsel %vm1413_vm4, %v6978_v60, %v10302_v23 }
 0x6c3   : > { %3025 = vrot.lane.b32.xlu0 %v2590_v28, %s4301_s28  ;;  %v3384_v37 = vsel %vm1444_vm5, %v3354_v46, %v10303_v2  ;;  %v10319_v2 = vld [vmem:[#allocation146_spill] sm:$0xff] }
 0x6c4   : > { %v3266_v63 = vpop.permute.xlu2 %3265  ;;  %v3416_v54 = vsel %vm1475_vm7, %v3384_v37, %v10304_v30  ;;  %v10320_v30 = vld [vmem:[#allocation193_spill] sm:$0xff] }
 0x6c5   : > { %v3014_v3 = vpop.permute.xlu0 %3013  ;;  %v3200_v28 = vpop.permute.xlu1 %3199  ;;  %v3448_v41 = vsel %vm1508_vm6, %v3416_v54, %v10305_v34 }
 0x6c6   : > { %v3479_v13 = vsel %vm1541_vm8, %v3447_v45, %v3014_v3  ;;  %v3480_v26 = vsel %vm1541_vm8, %v3448_v41, %v3016_v17  ;;  %v3342_v45 = vsel %vm1413_vm4, %v10052_v6, %v10306_v51  ;;  %v10307_v3 = vld [vmem:[#allocation39_spill] sm:$0xff] }
 0x6c7   : > { %v3511_v53 = vsel %vm1574_vm9, %v3479_v13, %v3110_v62  ;;  %v3372_v58 = vsel %vm1444_vm5, %v3342_v45, %v10307_v3  ;;  %v10308_v17 = vld [vmem:[#allocation219_spill] sm:$0xff] }
 0x6c8   : > { %v3543_v47 = vsel %vm1607_vm10, %v3511_v53, %v3200_v28  ;;  %v3404_v35 = vsel %vm1475_vm7, %v3372_v58, %v10308_v17  ;;  %v10309_v13 = vld [vmem:[#allocation75_spill] sm:$0xff] }
 0x6c9   : > { %v3575_v19 = vsel %vm1640_vm12, %v3543_v47, %v3290_v50  ;;  %v10300_v50 = vld [vmem:[#allocation104_spill] sm:$0xff]  ;;  %v3436_v31 = vsel %vm1508_vm6, %v3404_v35, %v10309_v13 }
 0x6ca   : > { %4240 = vmatmul.msk.f32.gmra.mxu3 %vm1682_vm11, %v3575_v19  ;;  %v3403_v52 = vsel %vm1475_vm7, %v3371_v33, %v10300_v50  ;;  %v10322_v35 = vld [vmem:[#allocation152_spill] sm:$0xff] }
 0x6cb   : > { %v3435_v21 = vsel %vm1508_vm6, %v3403_v52, %v10301_v43  ;;  %v10314_v52 = vld [vmem:[#allocation163_spill] sm:$0xff]  ;;  %v3344_v13 = vsel %vm1413_vm4, %v10226_v57, %v10322_v35 }
 0x6cc   : > { %v2992_v4 = vpop.permute.xlu2 %2991  ;;  %v3356_v43 = vsel %vm1413_vm4, %v10222_v14, %v10314_v52 }
 0x6cd   : > { %v3264_v55 = vpop.permute.xlu0 %3263  ;;  %v3086_v12 = vpop.permute.xlu1 %3085  ;;  %v3468_v40 = vsel %vm1541_vm8, %v3436_v31, %v2992_v4  ;;  %v10313_v4 = vld [vmem:[#allocation177_spill] sm:$0xff] }
 0x6ce   : > { %v3562_v62 = vsel %vm1640_vm12, %v3530_v11, %v3264_v55  ;;  %v10312_v55 = vld [vmem:[#allocation135_spill] sm:$0xff]  ;;  %v10323_v31 = vld [vmem:[#allocation121_spill] sm:$0xff] }
 0x6cf   : > { %4227 = vmatmul.msk.f32.gmra.mxu1 %vm1682_vm11, %v3562_v62 }
 0x6d4   : > { %v3178_v25 = vpop.permute.xlu2 %3177 }
 0x6d5   : > { %v2990_v10 = vpop.permute.xlu0 %2989  ;;  %v3112_v9 = vpop.permute.xlu1 %3111 }
 0x6d6   : > { %v3467_v0 = vsel %vm1541_vm8, %v3435_v21, %v2990_v10  ;;  %v3512_v48 = vsel %vm1574_vm9, %v3480_v26, %v3112_v9  ;;  %v10315_v21 = vld [vmem:[#allocation103_spill] sm:$0xff] }
 0x6d7   : > { %v3499_v56 = vsel %vm1574_vm9, %v3467_v0, %v3086_v12  ;;  %v3386_v0 = vsel %vm1444_vm5, %v3356_v43, %v10315_v21 }
 0x6dc   : > { %v8505_v49 = vpop.permute.xlu2 %3203 }
 0x6dd   : > { %v3176_v5 = vpop.permute.xlu0 %3175  ;;  %v3292_v8 = vpop.permute.xlu1 %3291 }
 0x6de   : > { %v3531_v32 = vsel %vm1607_vm10, %v3499_v56, %v3176_v5  ;;  %v10317_v56 = vld [vmem:[#allocation208_spill] sm:$0xff] }
 0x6df   : > { %v3563_v22 = vsel %vm1640_vm12, %v3531_v32, %v3266_v63  ;;  %v3355_v63 = vsel %vm1413_vm4, %v10206_v27, %v10310_v20  ;;  %v3343_v32 = vsel %vm1413_vm4, %v10216_v36, %v10317_v56  ;;  %v10321_v36 = vld [vmem:[#allocation29_spill] sm:$0xff] }
 0x6e0   : > { %4228 = vmatmul.msk.f32.gmra.mxu1 %vm1682_vm11, %v3563_v22  ;;  %v3385_v11 = vsel %vm1444_vm5, %v3355_v63, %v10311_v38  ;;  %v10318_v22 = vld [vmem:[#allocation106_spill] sm:$0xff]  ;;  %v3373_v37 = vsel %vm1444_vm5, %v3343_v32, %v10319_v2  ;;  %v10330_v56 = vld [vmem:[#allocation209_spill] sm:$0xff] }
 0x6e1   : > { %v3417_v62 = vsel %vm1475_vm7, %v3385_v11, %v10312_v55  ;;  %v3405_v54 = vsel %vm1475_vm7, %v3373_v37, %v10320_v30  ;;  %v8593_v55 = vpop.f32.mrf.mxu1  ;;  %v3358_v32 = vsel %vm1413_vm4, %v10238_v7, %v10330_v56  ;;  %v10332_v2 = vld [vmem:[#allocation166_spill] sm:$0xff] }
 0x6e2   : > { %v3449_v10 = vsel %vm1508_vm6, %v3417_v62, %v10313_v4  ;;  %v3437_v26 = vsel %vm1508_vm6, %v3405_v54, %v10321_v36 }
 0x6e4   : > { %v3090_v6 = vpop.permute.xlu2 %3089 }
 0x6e5   : > { %v3202_v44 = vpop.permute.xlu0 %3201  ;;  %v3018_v59 = vpop.permute.xlu1 %3017 }
 0x6e6   : > { %v3544_v29 = vsel %vm1607_vm10, %v3512_v48, %v3202_v44  ;;  %v3481_v15 = vsel %vm1541_vm8, %v3449_v10, %v3018_v59  ;;  %v10327_v10 = vld [vmem:[#allocation191_spill] sm:$0xff] }
 0x6e7   : > { %v3576_v60 = vsel %vm1640_vm12, %v3544_v29, %v3292_v8 }
 0x6e8   : > { %4241 = vmatmul.msk.f32.gmra.mxu3 %vm1682_vm11, %v3576_v60 }
 0x6ec   : > { %v8537_v16 = vpop.permute.xlu2 %3115 }
 0x6ed   : > { %v3088_v28 = vpop.permute.xlu0 %3087  ;;  %v3268_v39 = vpop.permute.xlu1 %3267 }
 0x6ee   : > { %v3500_v53 = vsel %vm1574_vm9, %v3468_v40, %v3088_v28  ;;  %v3374_v40 = vsel %vm1444_vm5, %v3344_v13, %v10323_v31  ;;  %v10338_v13 = vld [vmem:[#allocation47_spill] sm:$0xff] }
 0x6ef   : > { %v3532_v18 = vsel %vm1607_vm10, %v3500_v53, %v3178_v25  ;;  %v10316_v25 = vld [vmem:[#allocation57_spill] sm:$0xff]  ;;  %v10324_v53 = vld [vmem:[#allocation60_spill] sm:$0xff] }
 0x6f0   : > { %v3564_v47 = vsel %vm1640_vm12, %v3532_v18, %v3268_v39  ;;  %v3418_v5 = vsel %vm1475_vm7, %v3386_v0, %v10316_v25  ;;  %v3406_v39 = vsel %vm1475_vm7, %v3374_v40, %v10324_v53  ;;  %v10325_v18 = vld [vmem:[#allocation62_spill] sm:$0xff]  ;;  %v10339_v40 = vld [vmem:[#allocation95_spill] sm:$0xff] }
 0x6f1   : > { %4229 = vmatmul.msk.f32.gmra.mxu1 %vm1682_vm11, %v3564_v47  ;;  %v3450_v8 = vsel %vm1508_vm6, %v3418_v5, %v10318_v22  ;;  %v3438_v47 = vsel %vm1508_vm6, %v3406_v39, %v10325_v18  ;;  %v3711_v22 = vpop.f32.mrf.mxu1  ;;  %v10340_v53 = vld [vmem:[#allocation59_spill] sm:$0xff] }
 0x6f4   : > { %v8558_v23 = vpop.permute.xlu2 %3295 }
 0x6f5   : > { %v8526_v19 = vpop.permute.xlu0 %3113  ;;  %v2994_v12 = vpop.permute.xlu1 %2993 }
 0x6f6   : > { %v3513_v1 = vsel %vm1574_vm9, %v3481_v15, %v8526_v19  ;;  %v3469_v44 = vsel %vm1541_vm8, %v3437_v26, %v2994_v12  ;;  %v10326_v12 = vld [vmem:[#allocation99_spill] sm:$0xff] }
 0x6f7   : > { %v3545_v33 = vsel %vm1607_vm10, %v3513_v1, %v8505_v49  ;;  %v3501_v60 = vsel %vm1574_vm9, %v3469_v44, %v3090_v6  ;;  %v3357_v4 = vsel %vm1413_vm4, %v10228_v61, %v10326_v12  ;;  %v10328_v1 = vld [vmem:[#allocation18_spill] sm:$0xff]  ;;  %v10334_v44 = vld [vmem:[#allocation41_spill] sm:$0xff] }
 0x6f8   : > { %v3387_v15 = vsel %vm1444_vm5, %v3357_v4, %v10327_v10  ;;  %v8658_v4 = vpop.f32.mrf.mxu3 }
 0x6f9   : > { %v3714_v35 = vpop.f32.mrf.mxu1 }
 0x6fc   : > { %v3022_v3 = vpop.permute.xlu2 %3021 }
 0x6fd   : > { %v8539_v27 = vpop.permute.xlu0 %3293  ;;  %v3180_v50 = vpop.permute.xlu1 %3179 }
 0x6fe   : > { %v3577_v9 = vsel %vm1640_vm12, %v3545_v33, %v8539_v27  ;;  %v3533_v59 = vsel %vm1607_vm10, %v3501_v60, %v3180_v50  ;;  %v3419_v33 = vsel %vm1475_vm7, %v3387_v15, %v10328_v1  ;;  %v10335_v60 = vld [vmem:[#allocation199_spill] sm:$0xff] }
 0x6ff   : > { %4242 = vmatmul.msk.f32.gmra.mxu3 %vm1682_vm11, %v3577_v9  ;;  %v10329_v9 = vld [vmem:[#allocation74_spill] sm:$0xff] }
 0x700   : > { %v3451_v50 = vsel %vm1508_vm6, %v3419_v33, %v10329_v9  ;;  %v8660_v10 = vpop.f32.mrf.mxu3 }
 0x701   : > { %v3483_v43 = vsel %vm1541_vm8, %v3451_v50, %v3022_v3 }
 0x704   : > { %v3272_v6 = vpop.permute.xlu2 %3271 }
 0x705   : > { %v3020_v46 = vpop.permute.xlu0 %3019  ;;  %v8565_v34 = vpop.permute.xlu1 %3205 }
 0x706   : > { %v3482_v14 = vsel %vm1541_vm8, %v3450_v8, %v3020_v46  ;;  %v10331_v8 = vld [vmem:[#allocation134_spill] sm:$0xff] }
 0x707   : > { %v3514_v41 = vsel %vm1574_vm9, %v3482_v14, %v8537_v16  ;;  %v3388_v46 = vsel %vm1444_vm5, %v3358_v32, %v10331_v8  ;;  %v10333_v14 = vld [vmem:[#allocation213_spill] sm:$0xff] }
 0x708   : > { %v3546_v48 = vsel %vm1607_vm10, %v3514_v41, %v8565_v34  ;;  %v3420_v37 = vsel %vm1475_vm7, %v3388_v46, %v10332_v2  ;;  %v8662_v15 = vpop.f32.mrf.mxu3 }
 0x709   : > { %v3578_v29 = vsel %vm1640_vm12, %v3546_v48, %v8558_v23  ;;  %v3452_v30 = vsel %vm1508_vm6, %v3420_v37, %v10333_v14 }
 0x70a   : > { %4243 = vmatmul.msk.f32.gmra.mxu3 %vm1682_vm11, %v3578_v29  ;;  %v3360_v29 = vsel %vm1413_vm4, %v10261_v42, %v10334_v44 }
 0x70c   : > { %v3024_v52 = vpop.permute.xlu2 %3023 }
 0x70d   : > { %v3270_v51 = vpop.permute.xlu0 %3269  ;;  %v3092_v58 = vpop.permute.xlu1 %3091  ;;  %v3484_v54 = vsel %vm1541_vm8, %v3452_v30, %v3024_v52  ;;  %v8673_v52 = vld [vmem:[%s9165_s4] ss:$0 sm:$0xff] }
 0x70e   : > { %v3565_v45 = vsel %vm1640_vm12, %v3533_v59, %v3270_v51  ;;  %v3359_v59 = vsel %vm1413_vm4, %v10252_v24, %v10335_v60 }
 0x70f   : > { %4230 = vmatmul.msk.f32.gmra.mxu1 %vm1682_vm11, %v3565_v45  ;;  %v10336_v45 = vld [vmem:[#allocation71_spill] sm:$0xff] }
 0x710   : > { %v3390_v3 = vsel %vm1444_vm5, %v3360_v29, %v10336_v45  ;;  %v8664_v33 = vpop.f32.mrf.mxu3 }
 0x711   : > { %v3422_v31 = vsel %vm1475_vm7, %v3390_v3, %v10338_v13 }
 0x714   : > { %v3300_v41 = vpop.permute.xlu2 %3299 }
 0x715   : > { %v2996_v17 = vpop.permute.xlu0 %2995  ;;  %v3118_v28 = vpop.permute.xlu1 %3117 }
 0x716   : > { %v3470_v20 = vsel %vm1541_vm8, %v3438_v47, %v2996_v17  ;;  %v3515_v21 = vsel %vm1574_vm9, %v3483_v43, %v3118_v28 }
 0x717   : > { %v3502_v38 = vsel %vm1574_vm9, %v3470_v20, %v3092_v58  ;;  %v10337_v58 = vld [vmem:[#allocation49_spill] sm:$0xff] }
 0x718   : > { %v3389_v17 = vsel %vm1444_vm5, %v3359_v59, %v10337_v58  ;;  %v8666_v9 = vpop.f32.mrf.mxu3 }
 0x719   : > { %v3421_v28 = vsel %vm1475_vm7, %v3389_v17, %v10339_v40 }
 0x71a   : > { %v3453_v42 = vsel %vm1508_vm6, %v3421_v28, %v10340_v53 }
 0x71c   : > { %v3028_v47 = vpop.permute.xlu2 %3027 }
 0x71d   : > { %v3182_v63 = vpop.permute.xlu0 %3181  ;;  %v3298_v62 = vpop.permute.xlu1 %3297 }
 0x71e   : > { %v3534_v11 = vsel %vm1607_vm10, %v3502_v38, %v3182_v63 }
 0x71f   : > { %v3566_v57 = vsel %vm1640_vm12, %v3534_v11, %v3272_v6  ;;  %v3717_v11 = vpop.f32.mrf.mxu1 }
 0x720   : > { %4231 = vmatmul.msk.f32.gmra.mxu1 %vm1682_vm11, %v3566_v57  ;;  %v8668_v50 = vpop.f32.mrf.mxu3  ;;  %v8690_v56 = vadd.f32 %v8673_v52, %v3717_v11 }
 0x725   : > { %v3208_v0 = vpop.permute.xlu0 %3207  ;;  %v3210_v5 = vpop.permute.xlu1 %3209 }
 0x726   : > { %v3547_v25 = vsel %vm1607_vm10, %v3515_v21, %v3208_v0  ;;  %v8678_v0 = vadd.f32 %v8673_v52, %v3711_v22 }
 0x727   : > { %v3579_v61 = vsel %vm1640_vm12, %v3547_v25, %v3298_v62  ;;  %v3720_v12 = vpop.f32.mrf.mxu1  ;;  %v8682_v25 = vadd.f32 %v8673_v52, %v8593_v55 }
 0x728   : > { %4244 = vmatmul.msk.f32.gmra.mxu3 %vm1682_vm11, %v3579_v61  ;;  %v8685_v61 = vadd.f32 %v8673_v52, %v3714_v35  ;;  %v3805_v22 = vsel %vm1413_vm4, %v8678_v0, 0.0  ;;  %v8699_v55 = vadd.f32 %v8673_v52, %v3720_v12 }
 0x729   : > { %v3873_v32 = vmul.f32 %v8682_v25, %v8682_v25  ;;  %v3804_v46 = vsel %vm1413_vm4, %v8682_v25, 0.0 }
 0x72a   : > { %v3875_v8 = vmul.f32 %v8685_v61, %v8685_v61  ;;  %v3807_v30 = vsel %vm1413_vm4, %v8685_v61, 0.0  ;;  %v3877_v44 = vmul.f32 %v8699_v55, %v8699_v55  ;;  %v3811_v45 = vsel %vm1413_vm4, %v8699_v55, 0.0 }
 0x72b   : > { %v8675_v43 = vpop.f32.mrf.mxu3 }
 0x72c   : > { %v3912_v13 = vsel %vm1413_vm4, %v3877_v44, 0.0 }
 0x72d   : > { %v3120_v36 = vpop.permute.xlu0 %3119  ;;  %v2932_v51 = vpop.permute.xlu1 %2931 }
 0x72e   : > { %v3516_v26 = vsel %vm1574_vm9, %v3484_v54, %v3120_v36  ;;  %v3454_v39 = vsel %vm1508_vm6, %v3422_v31, %v2932_v51  ;;  %v3876_v54 = vmul.f32 %v8690_v56, %v8690_v56  ;;  %v3905_v36 = vsel %vm1413_vm4, %v3873_v32, 0.0 }
 0x72f   : > { %v3548_v48 = vsel %vm1607_vm10, %v3516_v26, %v3210_v5  ;;  %v3486_v20 = vsel %vm1541_vm8, %v3454_v39, %v3028_v47  ;;  %v3874_v5 = vmul.f32 %v8678_v0, %v8678_v0  ;;  %v3806_v26 = vadd.f32 %v3805_v22, %v3804_v46 }
 0x730   : > { %v3580_v7 = vsel %vm1640_vm12, %v3548_v48, %v3300_v41  ;;  %v3518_v57 = vsel %vm1574_vm9, %v3486_v20, %v8537_v16  ;;  %v3908_v48 = vsel %vm1413_vm4, %v3875_v8, 0.0  ;;  %v3910_v51 = vsel %vm1413_vm4, %v3876_v54, 0.0 }
 0x731   : > { %4245 = vmatmul.msk.f32.gmra.mxu3 %vm1682_vm11, %v3580_v7  ;;  %v3550_v62 = vsel %vm1607_vm10, %v3518_v57, %v8565_v34  ;;  %v3906_v14 = vsel %vm1413_vm4, %v3874_v5, 0.0  ;;  %v3809_v7 = vsel %vm1413_vm4, %v8690_v56, 0.0  ;;  %v3808_v59 = vadd.f32 %v3807_v30, %v3806_v26 }
 0x732   : > { %v3907_v60 = vadd.f32 %v3906_v14, %v3905_v36 }
 0x733   : > { %v3810_v35 = vadd.f32 %v3809_v7, %v3808_v59 }
 0x734   : > { %v3909_v17 = vadd.f32 %v3908_v48, %v3907_v60 }
 0x735   : > { %v3026_v24 = vpop.permute.xlu0 %3025 }
 0x736   : > { %v3485_v18 = vsel %vm1541_vm8, %v3453_v42, %v3026_v24  ;;  %v3911_v53 = vadd.f32 %v3910_v51, %v3909_v17  ;;  %v3812_v42 = vadd.f32 %v3811_v45, %v3810_v35 }
 0x737   : > { %v3517_v6 = vsel %vm1574_vm9, %v3485_v18, %v8526_v19  ;;  %v3582_v19 = vsel %vm1640_vm12, %v3550_v62, %v8558_v23 }
 0x738   : > { %v3549_v63 = vsel %vm1607_vm10, %v3517_v6, %v8505_v49  ;;  %v3723_v49 = vpop.f32.mrf.mxu1 }
 0x739   : > { %v3581_v38 = vsel %vm1640_vm12, %v3549_v63, %v8539_v27  ;;  %v8711_v41 = vadd.f32 %v8673_v52, %v3723_v49  ;;  %v3913_v63 = vadd.f32 %v3912_v13, %v3911_v53 }
 0x73a   : > { %4246 = vmatmul.msk.f32.gmra.mxu3 %vm1682_vm11, %v3581_v38 }
 0x73b   : > { %v3878_v3 = vmul.f32 %v8711_v41, %v8711_v41  ;;  %v3813_v31 = vsel %vm1413_vm4, %v8711_v41, 0.0 }
 0x73c   : > { %v3814_v38 = vadd.f32 %v3813_v31, %v3812_v42 }
 0x73d   : > { %v3914_v18 = vsel %vm1413_vm4, %v3878_v3, 0.0 }
 0x73e   : > { %v3915_v12 = vadd.f32 %v3914_v18, %v3913_v63 }
 0x740   : > { %v3726_v27 = vpop.f32.mrf.mxu1 }
 0x741   : > { %v8720_v29 = vadd.f32 %v8673_v52, %v3726_v27 }
 0x742   : > { %4247 = vmatmul.msk.f32.gmra.mxu3 %vm1682_vm11, %v3582_v19  ;;  %v8703_v2 = vpop.f32.mrf.mxu3 }
 0x743   : > { %v3879_v40 = vmul.f32 %v8720_v29, %v8720_v29  ;;  %v3815_v47 = vsel %vm1413_vm4, %v8720_v29, 0.0 }
 0x744   : > { %v3816_v49 = vadd.f32 %v3815_v47, %v3814_v38  ;;  %v8804_v38 = vadd.f32 %v8673_v52, %v8658_v4 }
 0x745   : > { %v3916_v11 = vsel %vm1413_vm4, %v3879_v40, 0.0 }
 0x746   : > { %v3917_v5 = vadd.f32 %v3916_v11, %v3915_v12 }
 0x748   : > { %v3729_v1 = vpop.f32.mrf.mxu1 }
 0x749   : > { %v8728_v58 = vadd.f32 %v8673_v52, %v3729_v1 }
 0x74b   : > { %v3880_v6 = vmul.f32 %v8728_v58, %v8728_v58  ;;  %v3817_v57 = vsel %vm1413_vm4, %v8728_v58, 0.0 }
 0x74c   : > { %v3818_v32 = vadd.f32 %v3817_v57, %v3816_v49 }
 0x74d   : > { %v8738_v39 = vpop.f32.mrf.mxu3  ;;  %v3918_v27 = vsel %vm1413_vm4, %v3880_v6, 0.0 }
 0x74e   : > { %v3919_v14 = vadd.f32 %v3918_v27, %v3917_v5  ;;  %v8811_v27 = vadd.f32 %v8673_v52, %v8660_v10 }
 0x750   : > { %v3732_v16 = vpop.f32.mrf.mxu1 }
 0x751   : > { %v8736_v28 = vadd.f32 %v8673_v52, %v3732_v16 }
 0x753   : > { %v3881_v62 = vmul.f32 %v8736_v28, %v8736_v28  ;;  %v3819_v1 = vsel %vm1413_vm4, %v8736_v28, 0.0 }
 0x754   : > { %v3820_v30 = vadd.f32 %v3819_v1, %v3818_v32  ;;  %v3889_v32 = vmul.f32 %v8804_v38, %v8804_v38 }
 0x755   : > { %v3920_v22 = vsel %vm1413_vm4, %v3881_v62, 0.0 }
 0x756   : > { %v3921_v44 = vadd.f32 %v3920_v22, %v3919_v14  ;;  %v8821_v22 = vadd.f32 %v8673_v52, %v8662_v15 }
 0x758   : > { %v3735_v34 = vpop.f32.mrf.mxu1 }
 0x759   : > { %v8746_v20 = vadd.f32 %v8673_v52, %v3735_v34 }
 0x75b   : > { %v3882_v16 = vmul.f32 %v8746_v20, %v8746_v20 }
 0x760   : > { %v3738_v23 = vpop.f32.mrf.mxu1 }
 0x761   : > { %v8754_v19 = vadd.f32 %v8673_v52, %v3738_v23  ;;  %v3821_v23 = vsel %vm1413_vm4, %v8746_v20, 0.0 }
 0x762   : > { %v3822_v60 = vadd.f32 %v3821_v23, %v3820_v30  ;;  %v3835_v30 = vsel %vm1413_vm4, %v8804_v38, 0.0 }
 0x763   : > { %v3883_v8 = vmul.f32 %v8754_v19, %v8754_v19  ;;  %v3823_v26 = vsel %vm1413_vm4, %v8754_v19, 0.0 }
 0x764   : > { %v3824_v17 = vadd.f32 %v3823_v26, %v3822_v60  ;;  %v3936_v60 = vsel %vm1413_vm4, %v3889_v32, 0.0  ;;  %v8879_v32 = vadd.f32 %v8673_v52, %v8738_v39 }
 0x768   : > { %v3741_v21 = vpop.f32.mrf.mxu1 }
 0x769   : > { %v8762_v34 = vadd.f32 %v8673_v52, %v3741_v21  ;;  %v3922_v21 = vsel %vm1413_vm4, %v3882_v16, 0.0 }
 0x76a   : > { %v3923_v3 = vadd.f32 %v3922_v21, %v3921_v44  ;;  %v8833_v21 = vadd.f32 %v8673_v52, %v8664_v33 }
 0x76b   : > { %v8772_v54 = vpop.f32.mrf.mxu3  ;;  %v3884_v48 = vmul.f32 %v8762_v34, %v8762_v34  ;;  %v3825_v59 = vsel %vm1413_vm4, %v8762_v34, 0.0 }
 0x76c   : > { %v3826_v53 = vadd.f32 %v3825_v59, %v3824_v17  ;;  %v3891_v59 = vmul.f32 %v8821_v22, %v8821_v22 }
 0x76d   : > { %v3926_v35 = vsel %vm1413_vm4, %v3884_v48, 0.0 }
 0x770   : > { %v3744_v37 = vpop.f32.mrf.mxu1 }
 0x771   : > { %v8770_v46 = vadd.f32 %v8673_v52, %v3744_v37  ;;  %v3924_v37 = vsel %vm1413_vm4, %v3883_v8, 0.0 }
 0x772   : > { %v3925_v40 = vadd.f32 %v3924_v37, %v3923_v3  ;;  %v3837_v37 = vsel %vm1413_vm4, %v8811_v27, 0.0 }
 0x773   : > { %v3885_v51 = vmul.f32 %v8770_v46, %v8770_v46  ;;  %v3827_v13 = vsel %vm1413_vm4, %v8770_v46, 0.0 }
 0x774   : > { %v3927_v47 = vadd.f32 %v3926_v35, %v3925_v40  ;;  %v3828_v6 = vadd.f32 %v3827_v13, %v3826_v53  ;;  %v3839_v35 = vsel %vm1413_vm4, %v8821_v22, 0.0  ;;  %v3892_v13 = vmul.f32 %v8833_v21, %v8833_v21 }
 0x775   : > { %v3928_v42 = vsel %vm1413_vm4, %v3885_v51, 0.0  ;;  %v8843_v51 = vadd.f32 %v8673_v52, %v8666_v9  ;;  %v3841_v9 = vsel %vm1413_vm4, %v8833_v21, 0.0 }
 0x776   : > { %v3929_v62 = vadd.f32 %v3928_v42, %v3927_v47  ;;  %v3940_v42 = vsel %vm1413_vm4, %v3891_v59, 0.0 }
 0x778   : > { %v3747_v24 = vpop.f32.mrf.mxu1 }
 0x779   : > { %v8780_v7 = vadd.f32 %v8673_v52, %v3747_v24 }
 0x77b   : > { %v3886_v31 = vmul.f32 %v8780_v7, %v8780_v7  ;;  %v3829_v24 = vsel %vm1413_vm4, %v8780_v7, 0.0 }
 0x77c   : > { %v3830_v12 = vadd.f32 %v3829_v24, %v3828_v6  ;;  %v3893_v24 = vmul.f32 %v8843_v51, %v8843_v51 }
 0x77d   : > { %v3930_v11 = vsel %vm1413_vm4, %v3886_v31, 0.0  ;;  %v8852_v31 = vadd.f32 %v8673_v52, %v8668_v50  ;;  %v3843_v50 = vsel %vm1413_vm4, %v8843_v51, 0.0 }
 0x77e   : > { %v3931_v5 = vadd.f32 %v3930_v11, %v3929_v62  ;;  %v3942_v11 = vsel %vm1413_vm4, %v3892_v13, 0.0  ;;  %v8870_v62 = vadd.f32 %v8673_v52, %v8703_v2 }
 0x780   : > { %v3849_v39 = vsel %vm1413_vm4, %v8870_v62, 0.0 }
 0x782   : > { %v8800_v63 = vpop.f32.mrf.mxu3 }
 0x78c   : > { %v3750_v36 = vpop.f32.mrf.mxu1 }
 0x78d   : > { %v8788_v45 = vadd.f32 %v8673_v52, %v3750_v36  ;;  %v3890_v36 = vmul.f32 %v8811_v27, %v8811_v27  ;;  %v3789_v26 = vpop.f32.mrf.mxu3 }
 0x78f   : > { %v3887_v18 = vmul.f32 %v8788_v45, %v8788_v45  ;;  %v3831_v57 = vsel %vm1413_vm4, %v8788_v45, 0.0  ;;  %v3938_v17 = vsel %vm1413_vm4, %v3890_v36, 0.0 }
 0x790   : > { %v3832_v4 = vadd.f32 %v3831_v57, %v3830_v12  ;;  %v3894_v57 = vmul.f32 %v8852_v31, %v8852_v31 }
 0x791   : > { %v3932_v1 = vsel %vm1413_vm4, %v3887_v18, 0.0  ;;  %v8861_v18 = vadd.f32 %v8673_v52, %v8675_v43  ;;  %v3944_v43 = vsel %vm1413_vm4, %v3893_v24, 0.0 }
 0x792   : > { %v3933_v8 = vadd.f32 %v3932_v1, %v3931_v5  ;;  %v3845_v5 = vsel %vm1413_vm4, %v8852_v31, 0.0  ;;  %v3946_v2 = vsel %vm1413_vm4, %v3894_v57, 0.0 }
 0x79d   : > { %v3753_v49 = vpop.f32.mrf.mxu1 }
 0x79e   : > { %v8815_v16 = vadd.f32 %v8673_v52, %v3753_v49 }
 0x7a0   : > { %v3833_v23 = vsel %vm1413_vm4, %v8815_v16, 0.0  ;;  %v3888_v10 = vmul.f32 %v8815_v16, %v8815_v16 }
 0x7a1   : > { %v3834_v14 = vadd.f32 %v3833_v23, %v3832_v4  ;;  %v3895_v4 = vmul.f32 %v8861_v18, %v8861_v18 }
 0x7a2   : > { %v3934_v15 = vsel %vm1413_vm4, %v3888_v10, 0.0 }
 0x7a3   : > { %v3836_v48 = vadd.f32 %v3835_v30, %v3834_v14  ;;  %v3935_v44 = vadd.f32 %v3934_v15, %v3933_v8  ;;  %v3847_v8 = vsel %vm1413_vm4, %v8861_v18, 0.0  ;;  %v3896_v14 = vmul.f32 %v8870_v62, %v8870_v62 }
 0x7a4   : > { %v8888_v30 = vadd.f32 %v8673_v52, %v8772_v54 }
 0x7a5   : > { %v3838_v3 = vadd.f32 %v3837_v37, %v3836_v48  ;;  %v3937_v33 = vadd.f32 %v3936_v60, %v3935_v44  ;;  %v3948_v48 = vsel %vm1413_vm4, %v3895_v4, 0.0  ;;  %v3897_v44 = vmul.f32 %v8879_v32, %v8879_v32 }
 0x7a6   : > { %v3950_v59 = vsel %vm1413_vm4, %v3896_v14, 0.0  ;;  %v3898_v54 = vmul.f32 %v8888_v30, %v8888_v30 }
 0x7a7   : > { %v3840_v40 = vadd.f32 %v3839_v35, %v3838_v3  ;;  %v3939_v53 = vadd.f32 %v3938_v17, %v3937_v33  ;;  %v3851_v3 = vsel %vm1413_vm4, %v8879_v32, 0.0  ;;  %v8902_v33 = vadd.f32 %v8673_v52, %v8800_v63 }
 0x7a8   : > { %v3952_v13 = vsel %vm1413_vm4, %v3897_v44, 0.0  ;;  %v3954_v24 = vsel %vm1413_vm4, %v3898_v54, 0.0 }
 0x7a9   : > { %v3842_v47 = vadd.f32 %v3841_v9, %v3840_v40  ;;  %v3941_v6 = vadd.f32 %v3940_v42, %v3939_v53  ;;  %v3853_v40 = vsel %vm1413_vm4, %v8888_v30, 0.0 }
 0x7ab   : > { %v3844_v12 = vadd.f32 %v3843_v50, %v3842_v47  ;;  %v3943_v49 = vadd.f32 %v3942_v11, %v3941_v6  ;;  %v3792_v1 = vpop.f32.mrf.mxu3  ;;  %v3899_v47 = vmul.f32 %v8902_v33, %v8902_v33  ;;  %v8911_v6 = vadd.f32 %v8673_v52, %v3789_v26 }
 0x7ac   : > { %v3855_v11 = vsel %vm1413_vm4, %v8902_v33, 0.0 }
 0x7ad   : > { %v3846_v23 = vadd.f32 %v3845_v5, %v3844_v12  ;;  %v3945_v10 = vadd.f32 %v3944_v43, %v3943_v49  ;;  %v3956_v57 = vsel %vm1413_vm4, %v3899_v47, 0.0  ;;  %v3900_v12 = vmul.f32 %v8911_v6, %v8911_v6 }
 0x7ae   : > { %v8919_v49 = vadd.f32 %v8673_v52, %v3792_v1  ;;  %v3857_v5 = vsel %vm1413_vm4, %v8911_v6, 0.0 }
 0x7af   : > { %v3947_v36 = vadd.f32 %v3946_v2, %v3945_v10  ;;  %v3848_v15 = vadd.f32 %v3847_v8, %v3846_v23  ;;  %v3958_v23 = vsel %vm1413_vm4, %v3900_v12, 0.0 }
 0x7b0   : > { %v3901_v10 = vmul.f32 %v8919_v49, %v8919_v49  ;;  %v3859_v1 = vsel %vm1413_vm4, %v8919_v49, 0.0 }
 0x7b1   : > { %v3850_v60 = vadd.f32 %v3849_v39, %v3848_v15  ;;  %v3949_v37 = vadd.f32 %v3948_v48, %v3947_v36 }
 0x7b2   : > { %v3960_v15 = vsel %vm1413_vm4, %v3901_v10, 0.0 }
 0x7b3   : > { %v3852_v17 = vadd.f32 %v3851_v3, %v3850_v60  ;;  %v3951_v35 = vadd.f32 %v3950_v59, %v3949_v37 }
 0x7b4   : > { %v3795_v53 = vpop.f32.mrf.mxu3 }
 0x7b5   : > { %v3854_v42 = vadd.f32 %v3853_v40, %v3852_v17  ;;  %v3953_v9 = vadd.f32 %v3952_v13, %v3951_v35  ;;  %v8927_v2 = vadd.f32 %v8673_v52, %v3795_v53 }
 0x7b7   : > { %v3955_v63 = vadd.f32 %v3954_v24, %v3953_v9  ;;  %v3856_v50 = vadd.f32 %v3855_v11, %v3854_v42  ;;  %v3902_v48 = vmul.f32 %v8927_v2, %v8927_v2  ;;  %v3861_v60 = vsel %vm1413_vm4, %v8927_v2, 0.0 }
 0x7b9   : > { %v3957_v43 = vadd.f32 %v3956_v57, %v3955_v63  ;;  %v3858_v4 = vadd.f32 %v3857_v5, %v3856_v50  ;;  %v3962_v54 = vsel %vm1413_vm4, %v3902_v48, 0.0 }
 0x7bb   : > { %v3959_v14 = vadd.f32 %v3958_v23, %v3957_v43  ;;  %v3860_v36 = vadd.f32 %v3859_v1, %v3858_v4 }
 0x7bd   : > { %v3798_v26 = vpop.f32.mrf.mxu3  ;;  %v3961_v44 = vadd.f32 %v3960_v15, %v3959_v14  ;;  %v3862_v59 = vadd.f32 %v3861_v60, %v3860_v36 }
 0x7be   : > { %v8930_v8 = vadd.f32 %v8673_v52, %v3798_v26 }
 0x7bf   : > { %v3963_v13 = vadd.f32 %v3962_v54, %v3961_v44 }
 0x7c0   : > { %v3903_v39 = vmul.f32 %v8930_v8, %v8930_v8  ;;  %v3863_v37 = vsel %vm1413_vm4, %v8930_v8, 0.0 }
 0x7c1   : > { %v3864_v40 = vadd.f32 %v3863_v37, %v3862_v59 }
 0x7c2   : > { %v3964_v17 = vsel %vm1413_vm4, %v3903_v39, 0.0 }
 0x7c3   : > { %v3965_v9 = vadd.f32 %v3964_v17, %v3963_v13 }
 0x7c5   : > { %v3801_v3 = vpop.f32.mrf.mxu3 }
 0x7c6   : > { %v8946_v35 = vadd.f32 %v8673_v52, %v3801_v3 }
 0x7c8   : > { %v3865_v53 = vsel %vm1413_vm4, %v8946_v35, 0.0  ;;  %v3904_v42 = vmul.f32 %v8946_v35, %v8946_v35 }
 0x7c9   : > { %v3866_v24 = vadd.f32 %v3865_v53, %v3864_v40 }
 0x7ca   : > { %v3966_v47 = vsel %vm1413_vm4, %v3904_v42, 0.0 }
 0x7cb   : > { %v3867_v63 = vrot.slane %v3866_v24, 4  ;;  %v3967_v11 = vadd.f32 %v3966_v47, %v3965_v9 }
 0x7cd   : > { %v3868_v50 = vadd.f32 %v3867_v63, %v3866_v24  ;;  %v3968_v57 = vrot.slane %v3967_v11, 4 }
 0x7cf   : > { %v3869_v12 = vrot.slane %v3868_v50, 2  ;;  %v3969_v43 = vadd.f32 %v3968_v57, %v3967_v11  ;;  %v4284_v57 = vld [vmem:[%s4351_s23] sm:$0xff] }
 0x7d1   : > { %v3870_v52 = vadd.f32 %v3869_v12, %v3868_v50  ;;  %v3970_v5 = vrot.slane %v3969_v43, 2 }
 0x7d3   : > { %v3871_v4 = vrot.slane %v3870_v52, 1  ;;  %v3971_v26 = vadd.f32 %v3970_v5, %v3969_v43  ;;  %v4285_v43 = vld [vmem:[%s4351_s23 + $0x8] sm:$0xff]  ;;  %v4286_v5 = vld [vmem:[%s4351_s23 + $0x10] sm:$0xff] }
 0x7d5   : > { %v3872_v23 = vadd.f32 %v3871_v4, %v3870_v52  ;;  %v3972_v10 = vrot.slane %v3971_v26, 1 }
 0x7d7   : > { %v3973_v14 = vadd.f32 %v3972_v10, %v3971_v26  ;;  %v8953_v1 = vmul.f32 0.00390625, %v3872_v23  ;;  %v4287_v23 = vld [vmem:[%s4351_s23 + $0x18] sm:$0xff] }
 0x7d9   : > { %v3975_v36 = vmul.f32 0.00390625, %v3973_v14  ;;  %v3976_v15 = vmul.f32 %v8953_v1, %v8953_v1  ;;  %v3979_v40 = vsub.f32 %v8682_v25, %v8953_v1  ;;  %v3980_v53 = vsub.f32 %v8678_v0, %v8953_v1 }
 0x7da   : > { %v3981_v42 = vsub.f32 %v8685_v61, %v8953_v1  ;;  %v3982_v9 = vsub.f32 %v8690_v56, %v8953_v1  ;;  %v3983_v24 = vsub.f32 %v8699_v55, %v8953_v1  ;;  %v3984_v0 = vsub.f32 %v8711_v41, %v8953_v1 }
 0x7db   : > { %v3977_v48 = vsub.f32 %v3975_v36, %v3976_v15  ;;  %v3985_v61 = vsub.f32 %v8720_v29, %v8953_v1  ;;  %v3986_v55 = vsub.f32 %v8728_v58, %v8953_v1  ;;  %v3987_v41 = vsub.f32 %v8736_v28, %v8953_v1  ;;  %v4288_v36 = vld [vmem:[%s4351_s23 + $0x20] sm:$0xff] }
 0x7dc   : > { %v3988_v26 = vsub.f32 %v8746_v20, %v8953_v1  ;;  %v3989_v10 = vsub.f32 %v8754_v19, %v8953_v1  ;;  %v3991_v19 = vsub.f32 %v8770_v46, %v8953_v1  ;;  %v3993_v46 = vsub.f32 %v8788_v45, %v8953_v1 }
 0x7dd   : > { %v3978_v39 = vmax.f32 %v3977_v48, 0.0  ;;  %v3990_v48 = vsub.f32 %v8762_v34, %v8953_v1  ;;  %v3992_v34 = vsub.f32 %v8780_v7, %v8953_v1  ;;  %v3994_v7 = vsub.f32 %v8815_v16, %v8953_v1 }
 0x7de   : > { %v3995_v45 = vsub.f32 %v8804_v38, %v8953_v1  ;;  %v3996_v16 = vsub.f32 %v8811_v27, %v8953_v1  ;;  %v3997_v38 = vsub.f32 %v8821_v22, %v8953_v1  ;;  %v3998_v27 = vsub.f32 %v8833_v21, %v8953_v1 }
 0x7df   : > { %v4011_v44 = vadd.f32 1e-05, %v3978_v39  ;;  %v10341_v39 = vld [vmem:[#allocation2_spill] sm:$0xff]  ;;  %v3999_v22 = vsub.f32 %v8843_v51, %v8953_v1  ;;  %v4000_v21 = vsub.f32 %v8852_v31, %v8953_v1  ;;  %v4001_v51 = vsub.f32 %v8861_v18, %v8953_v1 }
 0x7e0   : > { %v4002_v31 = vsub.f32 %v8870_v62, %v8953_v1  ;;  %v4003_v18 = vsub.f32 %v8879_v32, %v8953_v1  ;;  %v4004_v62 = vsub.f32 %v8888_v30, %v8953_v1  ;;  %v4005_v32 = vsub.f32 %v8902_v33, %v8953_v1 }
 0x7e1   : > { %4282 = vrsqrt.f32 %v4011_v44  ;;  %vm4018_vm1 = vweird.f32 %v4011_v44  ;;  %v4006_v30 = vsub.f32 %v8911_v6, %v8953_v1  ;;  %v4007_v33 = vsub.f32 %v8919_v49, %v8953_v1 }
 0x7e2   : > { %v4008_v6 = vsub.f32 %v8927_v2, %v8953_v1  ;;  %v4009_v49 = vsub.f32 %v8930_v8, %v8953_v1  ;;  %v4010_v2 = vsub.f32 %v8946_v35, %v8953_v1  ;;  %v10363_v35 = vld [vmem:[#allocation52_spill] sm:$0xff] }
 0x7e7   : > { %v4283_v60 = vpop.eup %4282 }
 0x7e8   : > { %v4013_v37 = vmul.f32 %v4283_v60, %v4011_v44  ;;  %vm4019_vm0 = vweird.f32 %v4283_v60 }
 0x7e9   : > { %vm4020_vm2 = vmor %vm4018_vm1, %vm4019_vm0 }
 0x7ea   : > { %v4014_v59 = vmul.f32 %v4283_v60, %v4013_v37  ;;  %v10342_v37 = vld [vmem:[#allocation8_spill] sm:$0xff] }
 0x7ec   : > { %v4015_v3 = vmul.f32 0.5, %v4014_v59 }
 0x7ee   : > { %v4016_v54 = vsub.f32 1.5, %v4015_v3 }
 0x7f0   : > { %v4017_v17 = vmul.f32 %v4283_v60, %v4016_v54  ;;  %v10343_v54 = vld [vmem:[#allocation9_spill] sm:$0xff] }
 0x7f2   : > { %v8957_v13 = vsel %vm4020_vm2, %v4283_v60, %v4017_v17 }
 0x7f3   : > { %v4022_v47 = vmul.f32 %v8957_v13, %v3979_v40  ;;  %v4023_v63 = vmul.f32 %v8957_v13, %v3980_v53  ;;  %v4024_v25 = vmul.f32 %v8957_v13, %v3981_v42  ;;  %v4025_v11 = vmul.f32 %v8957_v13, %v3982_v9  ;;  %v10344_v53 = vld [vmem:[#allocation5_spill] sm:$0xff] }
 0x7f4   : > { %v4026_v56 = vmul.f32 %v8957_v13, %v3983_v24  ;;  %v4027_v50 = vmul.f32 %v8957_v13, %v3984_v0  ;;  %v4028_v29 = vmul.f32 %v8957_v13, %v3985_v61  ;;  %v4029_v58 = vmul.f32 %v8957_v13, %v3986_v55  ;;  %v10345_v24 = vld [vmem:[#allocation7_spill] sm:$0xff]  ;;  %v10347_v61 = vld [vmem:[#allocation14_spill] sm:$0xff] }
 0x7f5   : > { %v4054_v12 = vadd.f32 %v4284_v57, %v4022_v47  ;;  %v4055_v52 = vadd.f32 %v4285_v43, %v4023_v63  ;;  %v4056_v4 = vadd.f32 %v4286_v5, %v4024_v25  ;;  %v4057_v28 = vadd.f32 %v4287_v23, %v4025_v11  ;;  %v10346_v25 = vld [vmem:[#allocation13_spill] sm:$0xff]  ;;  %v10349_v57 = vld [vmem:[#allocation23_spill] sm:$0xff] }
 0x7f6   : > { %v4030_v14 = vmul.f32 %v8957_v13, %v3987_v41  ;;  %v4058_v15 = vadd.f32 %v4288_v36, %v4026_v56  ;;  %v4031_v20 = vmul.f32 %v8957_v13, %v3988_v26  ;;  %v4059_v44 = vadd.f32 %v4027_v50, %v10341_v39  ;;  %v10348_v41 = vld [vmem:[#allocation22_spill] sm:$0xff]  ;;  %v10351_v26 = vld [vmem:[#allocation21_spill] sm:$0xff]  ;;  %v10353_v36 = vld [vmem:[#allocation31_spill] sm:$0xff] }
 0x7f7   : > { %4086 = vst.msk [vmem:[%s8983_s6] sm:$0xff] %vm1413_vm4, %v4054_v12  ;;  %v4032_v60 = vmul.f32 %v8957_v13, %v3989_v10  ;;  %v4060_v59 = vadd.f32 %v4028_v29, %v10342_v37  ;;  %v4033_v3 = vmul.f32 %v8957_v13, %v3990_v48  ;;  %v4061_v17 = vadd.f32 %v4029_v58, %v10343_v54  ;;  %v10357_v54 = vld [vmem:[#allocation36_spill] sm:$0xff] }
 0x7f8   : > { %4087 = vst.msk [vmem:[%s8983_s6 + $0x8] sm:$0xff] %vm1413_vm4, %v4055_v52  ;;  %v4034_v40 = vmul.f32 %v8957_v13, %v3991_v19  ;;  %v4062_v42 = vadd.f32 %v4030_v14, %v10344_v53  ;;  %v4035_v9 = vmul.f32 %v8957_v13, %v3992_v34  ;;  %v4063_v47 = vadd.f32 %v4031_v20, %v10345_v24  ;;  %v10350_v52 = vld [vmem:[#allocation19_spill] sm:$0xff]  ;;  %v10354_v20 = vld [vmem:[#allocation37_spill] sm:$0xff]  ;;  %v10355_v19 = vld [vmem:[#allocation38_spill] sm:$0xff] }
 0x7f9   : > { %4088 = vst.msk [vmem:[%s8983_s6 + $0x10] sm:$0xff] %vm1413_vm4, %v4056_v4  ;;  %v4036_v63 = vmul.f32 %v8957_v13, %v3993_v46  ;;  %v4064_v0 = vadd.f32 %v4032_v60, %v10346_v25  ;;  %v4037_v11 = vmul.f32 %v8957_v13, %v3994_v7  ;;  %v4065_v56 = vadd.f32 %v4033_v3, %v10347_v61  ;;  %v10359_v7 = vld [vmem:[#allocation46_spill] sm:$0xff]  ;;  %v10361_v25 = vld [vmem:[#allocation55_spill] sm:$0xff] }
 0x7fa   : > { %4089 = vst.msk [vmem:[%s8983_s6 + $0x18] sm:$0xff] %vm1413_vm4, %v4057_v28  ;;  %v4038_v55 = vmul.f32 %v8957_v13, %v3995_v45  ;;  %v4066_v50 = vadd.f32 %v4034_v40, %v10348_v41  ;;  %v4039_v29 = vmul.f32 %v8957_v13, %v3996_v16  ;;  %v4067_v12 = vadd.f32 %v4035_v9, %v10349_v57  ;;  %v10352_v28 = vld [vmem:[#allocation30_spill] sm:$0xff]  ;;  %v10358_v40 = vld [vmem:[#allocation43_spill] sm:$0xff] }
 0x7fb   : > { %4090 = vst.msk [vmem:[%s8983_s6 + $0x20] sm:$0xff] %vm1413_vm4, %v4058_v15  ;;  %v4040_v43 = vmul.f32 %v8957_v13, %v3997_v38  ;;  %v4068_v5 = vadd.f32 %v4036_v63, %v10350_v52  ;;  %v4041_v4 = vmul.f32 %v8957_v13, %v3998_v27  ;;  %v4069_v58 = vadd.f32 %v4037_v11, %v10351_v26  ;;  %v10362_v16 = vld [vmem:[#allocation50_spill] sm:$0xff] }
 0x7fc   : > { %4091 = vst.msk [vmem:[%s8983_s6 + $0x28] sm:$0xff] %vm1413_vm4, %v4059_v44  ;;  %v4042_v23 = vmul.f32 %v8957_v13, %v3999_v22  ;;  %v4070_v10 = vadd.f32 %v4038_v55, %v10352_v28  ;;  %v4043_v14 = vmul.f32 %v8957_v13, %v4000_v21  ;;  %v4071_v15 = vadd.f32 %v4039_v29, %v10353_v36  ;;  %v10365_v55 = vld [vmem:[#allocation64_spill] sm:$0xff]  ;;  %v10367_v29 = vld [vmem:[#allocation137_spill] sm:$0xff] }
 0x7fd   : > { %4092 = vst.msk [vmem:[%s8983_s6 + $0x30] sm:$0xff] %vm1413_vm4, %v4060_v59  ;;  %v4044_v48 = vmul.f32 %v8957_v13, %v4001_v51  ;;  %v4072_v39 = vadd.f32 %v4040_v43, %v10354_v20  ;;  %v4045_v44 = vmul.f32 %v8957_v13, %v4002_v31  ;;  %v4073_v60 = vadd.f32 %v4041_v4, %v10355_v19  ;;  %v10356_v59 = vld [vmem:[#allocation34_spill] sm:$0xff] }
 0x7fe   : > { %4093 = vst.msk [vmem:[%s8983_s6 + $0x38] sm:$0xff] %vm1413_vm4, %v4061_v17  ;;  %v4046_v37 = vmul.f32 %v8957_v13, %v4003_v18  ;;  %v4074_v34 = vadd.f32 %v4042_v23, %v10356_v59  ;;  %v4047_v3 = vmul.f32 %v8957_v13, %v4004_v62  ;;  %v4075_v17 = vadd.f32 %v4043_v14, %v10357_v54 }
 0x7ff   : > { %4094 = vst.msk [vmem:[%s8983_s6 + $0x40] sm:$0xff] %vm1413_vm4, %v4062_v42  ;;  %v4048_v46 = vmul.f32 %v8957_v13, %v4005_v32  ;;  %v4076_v53 = vadd.f32 %v4044_v48, %v10358_v40  ;;  %v4049_v42 = vmul.f32 %v8957_v13, %v4006_v30  ;;  %v4077_v9 = vadd.f32 %v4045_v44, %v10359_v7 }
 0x800   : > { %4095 = vst.msk [vmem:[%s8983_s6 + $0x48] sm:$0xff] %vm1413_vm4, %v4063_v47  ;;  %v4050_v24 = vmul.f32 %v8957_v13, %v4007_v33  ;;  %v10360_v47 = vld [vmem:[#allocation53_spill] sm:$0xff]  ;;  %v4051_v63 = vmul.f32 %v8957_v13, %v4008_v6  ;;  %v4052_v8 = vmul.f32 %v8957_v13, %v4009_v49  ;;  %v4053_v61 = vmul.f32 %v8957_v13, %v4010_v2 }
 0x801   : > { %4096 = vst.msk [vmem:[%s8983_s6 + $0x50] sm:$0xff] %vm1413_vm4, %v4064_v0  ;;  %v4078_v45 = vadd.f32 %v4046_v37, %v10360_v47  ;;  %v4079_v0 = vadd.f32 %v4047_v3, %v10361_v25  ;;  %v4080_v11 = vadd.f32 %v4048_v46, %v10362_v16  ;;  %v4081_v1 = vadd.f32 %v4049_v42, %v10363_v35 }
 0x802   : > { %4097 = vst.msk [vmem:[%s8983_s6 + $0x58] sm:$0xff] %vm1413_vm4, %v4065_v56  ;;  %v10364_v56 = vld [vmem:[#allocation63_spill] sm:$0xff]  ;;  %v4083_v41 = vadd.f32 %v4051_v63, %v10365_v55  ;;  %v4085_v57 = vadd.f32 %v4053_v61, %v10367_v29 }
 0x803   : > { %4098 = vst.msk [vmem:[%s8983_s6 + $0x60] sm:$0xff] %vm1413_vm4, %v4066_v50  ;;  %v4082_v38 = vadd.f32 %v4050_v24, %v10364_v56  ;;  %v10366_v50 = vld [vmem:[#allocation136_spill] sm:$0xff] }
 0x804   : > { %4099 = vst.msk [vmem:[%s8983_s6 + $0x68] sm:$0xff] %vm1413_vm4, %v4067_v12  ;;  %v4084_v27 = vadd.f32 %v4052_v8, %v10366_v50 }
 0x805   : > { %4100 = vst.msk [vmem:[%s8983_s6 + $0x70] sm:$0xff] %vm1413_vm4, %v4068_v5 }
 0x806   : > { %4101 = vst.msk [vmem:[%s8983_s6 + $0x78] sm:$0xff] %vm1413_vm4, %v4069_v58 }
 0x807   : > { %4102 = vst.msk [vmem:[%s8983_s6 + $0x80] sm:$0xff] %vm1413_vm4, %v4070_v10 }
 0x808   : > { %4103 = vst.msk [vmem:[%s8983_s6 + $0x88] sm:$0xff] %vm1413_vm4, %v4071_v15 }
 0x809   : > { %4104 = vst.msk [vmem:[%s8983_s6 + $0x90] sm:$0xff] %vm1413_vm4, %v4072_v39 }
 0x80a   : > { %4105 = vst.msk [vmem:[%s8983_s6 + $0x98] sm:$0xff] %vm1413_vm4, %v4073_v60 }
 0x80b   : > { %4106 = vst.msk [vmem:[%s8983_s6 + $0xa0] sm:$0xff] %vm1413_vm4, %v4074_v34 }
 0x80c   : > { %4107 = vst.msk [vmem:[%s8983_s6 + $0xa8] sm:$0xff] %vm1413_vm4, %v4075_v17 }
 0x80d   : > { %4108 = vst.msk [vmem:[%s8983_s6 + $0xb0] sm:$0xff] %vm1413_vm4, %v4076_v53 }
 0x80e   : > { %4109 = vst.msk [vmem:[%s8983_s6 + $0xb8] sm:$0xff] %vm1413_vm4, %v4077_v9 }
 0x80f   : > { %4110 = vst.msk [vmem:[%s8983_s6 + $0xc0] sm:$0xff] %vm1413_vm4, %v4078_v45 }
 0x810   : > { %4111 = vst.msk [vmem:[%s8983_s6 + $0xc8] sm:$0xff] %vm1413_vm4, %v4079_v0 }
 0x811   : > { %4112 = vst.msk [vmem:[%s8983_s6 + $0xd0] sm:$0xff] %vm1413_vm4, %v4080_v11 }
 0x812   : > { %4113 = vst.msk [vmem:[%s8983_s6 + $0xd8] sm:$0xff] %vm1413_vm4, %v4081_v1 }
 0x813   : > { %4114 = vst.msk [vmem:[%s8983_s6 + $0xe0] sm:$0xff] %vm1413_vm4, %v4082_v38 }
 0x814   : > { %4115 = vst.msk [vmem:[%s8983_s6 + $0xe8] sm:$0xff] %vm1413_vm4, %v4083_v41 }
 0x815   : > { %4116 = vst.msk [vmem:[%s8983_s6 + $0xf0] sm:$0xff] %vm1413_vm4, %v4084_v27 }
 0x816   : > { %4117 = vst.msk [vmem:[%s8983_s6 + $0xf8] sm:$0xff] %vm1413_vm4, %v4085_v57 }
 0x817 PF: > { %s15_s18 = sadd.s32 1, %s4295_s18  }
 0x818   : > { %p12_p4 = scmp.ge.s32.totalorder %s15_s18, 4  }
 0x81a   :  { %14 = sbr.rel (!%p12_p4) target bundleno = 1 (0x1), region = 70 }

</bundles_post_ra>
